<compile_context>
chip_gen: v5e
topology: v5e:2x2
jax: 0.10.0
libtpu: 0.0.40
codegen_flags: <defaults>
</compile_context>

<pallas_src>
import functools

import numpy as np

import jax
import jax.numpy as jnp
from jax.experimental import pallas as pl
from jax.experimental.pallas import tpu as pltpu

EPS = 1e-5


# ----------------------------------------------------------------------------
# Fused kernel: one grid step per image.
# All activations are channels-first with the flattened (padded) spatial grid
# on the lane axis.  `shifts` are the 9 static lane offsets of the 3x3 taps on
# the extended grid, `l_grid` the padded-grid length, `base` the extension
# offset (== shift of the (0,0) tap).
# ----------------------------------------------------------------------------
def up_fused_kernel(x1_ref, x2_ref, wup_ref, bup_ref, s_ref, p_ref,
                    w1a_ref, w1b_ref, b1_ref, me_ref,
                    w2_ref, b2_ref, wida_ref, widb_ref, bid_ref, g_ref,
                    out_ref, *, shifts, l_grid, base):
    f32 = jnp.float32
    Lg = l_grid

    x1 = x1_ref[0]                    # [Cin1, H1*W1]
    x2 = x2_ref[0]                    # [Cskip, H2*W2]

    # ---- skip path of the channel concat, scattered onto the zero-padded,
    #      zero-extended grid (conv pad + F.pad handled by the scatter) ----
    cat_a = jnp.dot(x2, p_ref[...], preferred_element_type=f32)    # [Cskip, Lext]

    # ---- ConvTranspose2d(k=2, s=2) + bias, de-interleaved + padded via the
    #      four per-parity scatter matrices ----
    bup = bup_ref[...]                                             # [Cup, 1]
    cat_b = None
    for k in range(4):
        yk = jnp.dot(wup_ref[k], x1, preferred_element_type=f32) + bup
        sk = jnp.dot(yk, s_ref[k], preferred_element_type=f32)     # [Cup, Lext]
        cat_b = sk if cat_b is None else cat_b + sk

    # ---- conv1 3x3 (BN1 scale folded into weights) + bias + ReLU ----
    acc1 = None
    for k, s in enumerate(shifts):
        t = (jnp.dot(w1a_ref[k], cat_a[:, s:s + Lg], preferred_element_type=f32)
             + jnp.dot(w1b_ref[k], cat_b[:, s:s + Lg], preferred_element_type=f32))
        acc1 = t if acc1 is None else acc1 + t
    h1 = jnp.maximum(acc1 + b1_ref[...], 0.0)                      # [Cout, Lg]

    # ---- zero the conv-pad halo and re-embed h1 on the extended grid ----
    h1e = jnp.dot(h1, me_ref[...], preferred_element_type=f32)     # [Cout, Lext]

    # ---- conv2 3x3 (BN2 folded) + bias + ReLU ----
    acc2 = None
    for k, s in enumerate(shifts):
        t = jnp.dot(w2_ref[k], h1e[:, s:s + Lg], preferred_element_type=f32)
        acc2 = t if acc2 is None else acc2 + t
    h2 = jnp.maximum(acc2 + b2_ref[...], 0.0)                      # [Cout, Lg]

    # ---- identity path: 1x1 conv (BN folded, no conv bias) ----
    ca0 = cat_a[:, base:base + Lg]
    cb0 = cat_b[:, base:base + Lg]
    ident = (jnp.dot(wida_ref[...], ca0, preferred_element_type=f32)
             + jnp.dot(widb_ref[...], cb0, preferred_element_type=f32)
             + bid_ref[...])                                       # [Cout, Lg]

    # ---- residual add, final ReLU, gather the H*W interior, lane-dense store
    res = jnp.maximum(h2 + ident, 0.0)
    out_ref[0] = jnp.dot(res, g_ref[...], preferred_element_type=f32)


# ----------------------------------------------------------------------------
# Up.forward wrapper (NCHW in / NCHW out, matching PyTorch).  BN is inference
# mode (running stats), folded into per-channel scale (into weights) and bias.
# ----------------------------------------------------------------------------
def up_forward_pallas(x1, x2, p):
    N, Cin1, H1, W1 = x1.shape
    _, Cskip, H2, W2 = x2.shape
    Cup = p["up_w"].shape[1]
    Cout = p["w1"].shape[0]
    Cin = p["w1"].shape[1]
    assert Cin == Cskip + Cup

    diffY = H2 - 2 * H1
    diffX = W2 - 2 * W1
    assert diffY >= 0 and diffX >= 0  # TODO(synk): negative F.pad (crop) unsupported
    padT, padL = diffY // 2, diffX // 2

    Hg, Wg = H2 + 2, W2 + 2            # conv zero-pad grid
    Lg = Hg * Wg
    B = Wg + 1                          # extension so every tap slice is in range
    Lext = Lg + 2 * B

    # ---- constant scatter / gather / mask matrices (built once, numpy) ----
    P_mat = np.zeros((H2 * W2, Lext), np.float32)          # place x2 on the grid
    for i in range(H2):
        for j in range(W2):
            P_mat[i * W2 + j, B + (i + 1) * Wg + (j + 1)] = 1.0

    S_mat = np.zeros((4, H1 * W1, Lext), np.float32)       # place upsample (per parity)
    for di in range(2):
        for dj in range(2):
            k = di * 2 + dj
            for i in range(H1):
                for j in range(W1):
                    r = padT + 2 * i + di + 1
                    c = padL + 2 * j + dj + 1
                    S_mat[k, i * W1 + j, B + r * Wg + c] = 1.0

    ME_mat = np.zeros((Lg, Lext), np.float32)               # mask halo + re-extend
    for r in range(1, H2 + 1):
        for c in range(1, W2 + 1):
            q = r * Wg + c
            ME_mat[q, B + q] = 1.0

    G_mat = np.zeros((Lg, H2 * W2), np.float32)             # gather image interior
    for i in range(H2):
        for j in range(W2):
            G_mat[(i + 1) * Wg + (j + 1), i * W2 + j] = 1.0

    # ---- fold BN (inference) into scale / bias ----
    def fold(bn, conv_b):
        gamma, beta, mean, var = bn
        s = gamma / jnp.sqrt(var + EPS)
        b = (conv_b - mean) * s + beta if conv_b is not None else beta - mean * s
        return s, b

    s1, b1 = fold(p["bn1"], p["b1"])
    s2, b2 = fold(p["bn2"], p["b2"])
    sid, bid = fold(p["bnid"], None)

    def conv_w(w, scale):              # [O,I,3,3] -> [9,O,I], BN scale folded
        wf = jnp.transpose(w, (2, 3, 0, 1)).reshape(9, w.shape[0], w.shape[1])
        return wf * scale[None, :, None]

    w1a = conv_w(p["w1"][:, :Cskip], s1)       # taps for the x2 channels
    w1b = conv_w(p["w1"][:, Cskip:], s1)       # taps for the upsampled channels
    w2f = conv_w(p["w2"], s2)
    wid = p["wid"][:, :, 0, 0] * sid[:, None]
    wida, widb = wid[:, :Cskip], wid[:, Cskip:]

    # ConvTranspose weight [Cin,Cup,2,2] -> [4,Cup,Cin]  (k = di*2+dj)
    wup = jnp.transpose(p["up_w"], (2, 3, 1, 0)).reshape(4, Cup, Cin1)
    bup = p["up_b"][:, None]
    b1c, b2c, bidc = b1[:, None], b2[:, None], bid[:, None]

    x1f = x1.reshape(N, Cin1, H1 * W1)
    x2f = x2.reshape(N, Cskip, H2 * W2)

    shifts = tuple(B + dy * Wg + dx for dy in (-1, 0, 1) for dx in (-1, 0, 1))
    kernel = functools.partial(up_fused_kernel, shifts=shifts, l_grid=Lg, base=B)

    out_flat = pl.pallas_call(
        kernel,
        out_shape=jax.ShapeDtypeStruct((N, Cout, H2 * W2), jnp.float32),
        grid_spec=pltpu.PrefetchScalarGridSpec(
            num_scalar_prefetch=0,
            grid=(N,),
            in_specs=[
                pl.BlockSpec((1, Cin1, H1 * W1), lambda n: (n, 0, 0)),
                pl.BlockSpec((1, Cskip, H2 * W2), lambda n: (n, 0, 0)),
                pl.BlockSpec((4, Cup, Cin1), lambda n: (0, 0, 0)),
                pl.BlockSpec((Cup, 1), lambda n: (0, 0)),
                pl.BlockSpec((4, H1 * W1, Lext), lambda n: (0, 0, 0)),
                pl.BlockSpec((H2 * W2, Lext), lambda n: (0, 0)),
                pl.BlockSpec((9, Cout, Cskip), lambda n: (0, 0, 0)),
                pl.BlockSpec((9, Cout, Cup), lambda n: (0, 0, 0)),
                pl.BlockSpec((Cout, 1), lambda n: (0, 0)),
                pl.BlockSpec((Lg, Lext), lambda n: (0, 0)),
                pl.BlockSpec((9, Cout, Cout), lambda n: (0, 0, 0)),
                pl.BlockSpec((Cout, 1), lambda n: (0, 0)),
                pl.BlockSpec((Cout, Cskip), lambda n: (0, 0)),
                pl.BlockSpec((Cout, Cup), lambda n: (0, 0)),
                pl.BlockSpec((Cout, 1), lambda n: (0, 0)),
                pl.BlockSpec((Lg, H2 * W2), lambda n: (0, 0)),
            ],
            out_specs=pl.BlockSpec((1, Cout, H2 * W2), lambda n: (n, 0, 0)),
        ),
        compiler_params=pltpu.CompilerParams(dimension_semantics=("parallel",)),
    )(x1f, x2f, wup, bup,
      jnp.asarray(S_mat), jnp.asarray(P_mat),
      w1a, w1b, b1c, jnp.asarray(ME_mat),
      w2f, b2c, wida, widb, bidc, jnp.asarray(G_mat))

    return out_flat.reshape(N, Cout, H2, W2)


# ----------------------------------------------------------------------------
# Pure-JAX reference (NCHW, lax convolutions) for verification
# ----------------------------------------------------------------------------
def up_forward_ref(x1, x2, p):
    N, Cin1, H1, W1 = x1.shape
    Cup = p["up_w"].shape[1]

    y = jnp.einsum("ncij,coab->noiajb", x1, p["up_w"])
    y = y.reshape(N, Cup, 2 * H1, 2 * W1) + p["up_b"][None, :, None, None]
    diffY = x2.shape[2] - y.shape[2]
    diffX = x2.shape[3] - y.shape[3]
    y = jnp.pad(y, ((0, 0), (0, 0),
                    (diffY // 2, diffY - diffY // 2),
                    (diffX // 2, diffX - diffX // 2)))
    x = jnp.concatenate([x2, y], axis=1)

    def conv(inp, w, b=None, pad=1):
        out = jax.lax.conv_general_dilated(
            inp, w, (1, 1), [(pad, pad), (pad, pad)],
            dimension_numbers=("NCHW", "OIHW", "NCHW"))
        if b is not None:
            out = out + b[None, :, None, None]
        return out

    def bn(inp, gamma, beta, mean, var):
        return ((inp - mean[None, :, None, None])
                / jnp.sqrt(var[None, :, None, None] + EPS)
                * gamma[None, :, None, None] + beta[None, :, None, None])

    h = jax.nn.relu(bn(conv(x, p["w1"], p["b1"]), *p["bn1"]))
    h = jax.nn.relu(bn(conv(h, p["w2"], p["b2"]), *p["bn2"]))
    ident = bn(conv(x, p["wid"], None, pad=0), *p["bnid"])
    return jax.nn.relu(h + ident)


# ----------------------------------------------------------------------------
if __name__ == "__main__":
    key = jax.random.PRNGKey(0)
    keys = jax.random.split(key, 24)

    N = 2
    in_channels = 8
    out_channels = 4
    Cup = in_channels // 2
    H1, W1 = 8, 8          # x1 spatial (deep features)
    H2, W2 = 16, 16        # x2 spatial (skip connection)

    def bn_params(k, c):
        k1, k2, k3, k4 = jax.random.split(k, 4)
        gamma = jax.random.uniform(k1, (c,), jnp.float32, 0.5, 1.5)
        beta = 0.1 * jax.random.normal(k2, (c,), jnp.float32)
        mean = 0.1 * jax.random.normal(k3, (c,), jnp.float32)
        var = jax.random.uniform(k4, (c,), jnp.float32, 0.5, 1.5)
        return (gamma, beta, mean, var)

    params = {
        "up_w": 0.3 * jax.random.normal(keys[0], (in_channels, Cup, 2, 2), jnp.float32),
        "up_b": 0.1 * jax.random.normal(keys[1], (Cup,), jnp.float32),
        "w1": 0.3 * jax.random.normal(keys[2], (out_channels, in_channels, 3, 3), jnp.float32),
        "b1": 0.1 * jax.random.normal(keys[3], (out_channels,), jnp.float32),
        "bn1": bn_params(keys[4], out_channels),
        "w2": 0.3 * jax.random.normal(keys[5], (out_channels, out_channels, 3, 3), jnp.float32),
        "b2": 0.1 * jax.random.normal(keys[6], (out_channels,), jnp.float32),
        "bn2": bn_params(keys[7], out_channels),
        "wid": 0.3 * jax.random.normal(keys[8], (out_channels, in_channels, 1, 1), jnp.float32),
        "bnid": bn_params(keys[9], out_channels),
    }

    x1 = jax.random.normal(keys[10], (N, in_channels, H1, W1), jnp.float32)
    x2 = jax.random.normal(keys[11], (N, Cup, H2, W2), jnp.float32)

    out = jax.block_until_ready(up_forward_pallas(x1, x2, params))
    ref = jax.block_until_ready(up_forward_ref(x1, x2, params))

    assert out.shape == (N, out_channels, H2, W2), out.shape
    err = float(jnp.max(jnp.abs(out - ref)))
    assert err < 1e-3, f"max abs error {err}"
    print("KERNEL_OK")
</pallas_src>

<mosaic_0001>
module attributes {stable_mosaic.version = 11 : i64} {
  func.func @up_fused_kernel(%arg0: i32, %arg1: memref<1x8x64xf32, #tpu.memory_space<vmem>>, %arg2: memref<1x4x256xf32, #tpu.memory_space<vmem>>, %arg3: memref<4x4x8xf32, #tpu.memory_space<vmem>>, %arg4: memref<4x1xf32, #tpu.memory_space<vmem>>, %arg5: memref<4x64x362xf32, #tpu.memory_space<vmem>>, %arg6: memref<256x362xf32, #tpu.memory_space<vmem>>, %arg7: memref<9x4x4xf32, #tpu.memory_space<vmem>>, %arg8: memref<9x4x4xf32, #tpu.memory_space<vmem>>, %arg9: memref<4x1xf32, #tpu.memory_space<vmem>>, %arg10: memref<324x362xf32, #tpu.memory_space<vmem>>, %arg11: memref<9x4x4xf32, #tpu.memory_space<vmem>>, %arg12: memref<4x1xf32, #tpu.memory_space<vmem>>, %arg13: memref<4x4xf32, #tpu.memory_space<vmem>>, %arg14: memref<4x4xf32, #tpu.memory_space<vmem>>, %arg15: memref<4x1xf32, #tpu.memory_space<vmem>>, %arg16: memref<324x256xf32, #tpu.memory_space<vmem>>, %arg17: memref<1x4x256xf32, #tpu.memory_space<vmem>>) attributes {dimension_semantics = [#tpu.dimension_semantics<parallel>], iteration_bounds = array<i64: 2>, scalar_prefetch = 0 : i64, scratch_operands = 0 : i64, tpu.core_type = #tpu.core_type<tc>, window_params = [{transform_indices = @transform_0, window_bounds = array<i64: 1, 8, 64>}, {transform_indices = @transform_1, window_bounds = array<i64: 1, 4, 256>}, {pipeline_mode = #tpu.pipeline_mode<synchronous>, transform_indices = @transform_2, window_bounds = array<i64: 4, 4, 8>}, {pipeline_mode = #tpu.pipeline_mode<synchronous>, transform_indices = @transform_3, window_bounds = array<i64: 4, 1>}, {pipeline_mode = #tpu.pipeline_mode<synchronous>, transform_indices = @transform_4, window_bounds = array<i64: 4, 64, 362>}, {pipeline_mode = #tpu.pipeline_mode<synchronous>, transform_indices = @transform_5, window_bounds = array<i64: 256, 362>}, {pipeline_mode = #tpu.pipeline_mode<synchronous>, transform_indices = @transform_6, window_bounds = array<i64: 9, 4, 4>}, {pipeline_mode = #tpu.pipeline_mode<synchronous>, transform_indices = @transform_7, window_bounds = array<i64: 9, 4, 4>}, {pipeline_mode = #tpu.pipeline_mode<synchronous>, transform_indices = @transform_8, window_bounds = array<i64: 4, 1>}, {pipeline_mode = #tpu.pipeline_mode<synchronous>, transform_indices = @transform_9, window_bounds = array<i64: 324, 362>}, {pipeline_mode = #tpu.pipeline_mode<synchronous>, transform_indices = @transform_10, window_bounds = array<i64: 9, 4, 4>}, {pipeline_mode = #tpu.pipeline_mode<synchronous>, transform_indices = @transform_11, window_bounds = array<i64: 4, 1>}, {pipeline_mode = #tpu.pipeline_mode<synchronous>, transform_indices = @transform_12, window_bounds = array<i64: 4, 4>}, {pipeline_mode = #tpu.pipeline_mode<synchronous>, transform_indices = @transform_13, window_bounds = array<i64: 4, 4>}, {pipeline_mode = #tpu.pipeline_mode<synchronous>, transform_indices = @transform_14, window_bounds = array<i64: 4, 1>}, {pipeline_mode = #tpu.pipeline_mode<synchronous>, transform_indices = @transform_15, window_bounds = array<i64: 324, 256>}, {transform_indices = @transform_16, window_bounds = array<i64: 1, 4, 256>}]} {
    %c0 = arith.constant 0 : index
    %c0_0 = arith.constant 0 : index
    %c0_1 = arith.constant 0 : index
    %0 = vector.load %arg1[%c0, %c0_0, %c0_1] : memref<1x8x64xf32, #tpu.memory_space<vmem>>, vector<1x8x64xf32>
    %1 = vector.shape_cast %0 : vector<1x8x64xf32> to vector<8x64xf32>
    %c0_2 = arith.constant 0 : index
    %c0_3 = arith.constant 0 : index
    %c0_4 = arith.constant 0 : index
    %2 = vector.load %arg2[%c0_2, %c0_3, %c0_4] : memref<1x4x256xf32, #tpu.memory_space<vmem>>, vector<1x4x256xf32>
    %3 = vector.shape_cast %2 : vector<1x4x256xf32> to vector<4x256xf32>
    %c0_5 = arith.constant 0 : index
    %c0_6 = arith.constant 0 : index
    %4 = vector.load %arg6[%c0_5, %c0_6] : memref<256x362xf32, #tpu.memory_space<vmem>>, vector<256x362xf32>
    %cst = arith.constant dense<0.000000e+00> : vector<4x362xf32>
    %5 = tpu.matmul %3, %4, %cst {dimension_numbers = #tpu.dot_dimension_numbers<[1], [0], [0], [1], [0, 0, 1, 1], [], []>} : vector<4x256xf32>, vector<256x362xf32>, vector<4x362xf32> -> vector<4x362xf32>
    %c0_7 = arith.constant 0 : index
    %c0_8 = arith.constant 0 : index
    %6 = vector.load %arg4[%c0_7, %c0_8] : memref<4x1xf32, #tpu.memory_space<vmem>>, vector<4x1xf32>
    %c0_9 = arith.constant 0 : index
    %c0_10 = arith.constant 0 : index
    %c0_11 = arith.constant 0 : index
    %7 = vector.load %arg3[%c0_9, %c0_10, %c0_11] : memref<4x4x8xf32, #tpu.memory_space<vmem>>, vector<1x4x8xf32>
    %8 = vector.shape_cast %7 : vector<1x4x8xf32> to vector<4x8xf32>
    %cst_12 = arith.constant dense<0.000000e+00> : vector<4x64xf32>
    %9 = tpu.matmul %8, %1, %cst_12 {dimension_numbers = #tpu.dot_dimension_numbers<[1], [0], [0], [1], [0, 0, 1, 1], [], []>} : vector<4x8xf32>, vector<8x64xf32>, vector<4x64xf32> -> vector<4x64xf32>
    %10 = vector.broadcast %6 : vector<4x1xf32> to vector<4x64xf32>
    %11 = arith.addf %9, %10 : vector<4x64xf32>
    %c0_13 = arith.constant 0 : index
    %c0_14 = arith.constant 0 : index
    %c0_15 = arith.constant 0 : index
    %12 = vector.load %arg5[%c0_13, %c0_14, %c0_15] : memref<4x64x362xf32, #tpu.memory_space<vmem>>, vector<1x64x362xf32>
    %13 = vector.shape_cast %12 : vector<1x64x362xf32> to vector<64x362xf32>
    %cst_16 = arith.constant dense<0.000000e+00> : vector<4x362xf32>
    %14 = tpu.matmul %11, %13, %cst_16 {dimension_numbers = #tpu.dot_dimension_numbers<[1], [0], [0], [1], [0, 0, 1, 1], [], []>} : vector<4x64xf32>, vector<64x362xf32>, vector<4x362xf32> -> vector<4x362xf32>
    %c1 = arith.constant 1 : index
    %c0_17 = arith.constant 0 : index
    %c0_18 = arith.constant 0 : index
    %15 = vector.load %arg3[%c1, %c0_17, %c0_18] : memref<4x4x8xf32, #tpu.memory_space<vmem>>, vector<1x4x8xf32>
    %16 = vector.shape_cast %15 : vector<1x4x8xf32> to vector<4x8xf32>
    %cst_19 = arith.constant dense<0.000000e+00> : vector<4x64xf32>
    %17 = tpu.matmul %16, %1, %cst_19 {dimension_numbers = #tpu.dot_dimension_numbers<[1], [0], [0], [1], [0, 0, 1, 1], [], []>} : vector<4x8xf32>, vector<8x64xf32>, vector<4x64xf32> -> vector<4x64xf32>
    %18 = vector.broadcast %6 : vector<4x1xf32> to vector<4x64xf32>
    %19 = arith.addf %17, %18 : vector<4x64xf32>
    %c1_20 = arith.constant 1 : index
    %c0_21 = arith.constant 0 : index
    %c0_22 = arith.constant 0 : index
    %20 = vector.load %arg5[%c1_20, %c0_21, %c0_22] : memref<4x64x362xf32, #tpu.memory_space<vmem>>, vector<1x64x362xf32>
    %21 = vector.shape_cast %20 : vector<1x64x362xf32> to vector<64x362xf32>
    %cst_23 = arith.constant dense<0.000000e+00> : vector<4x362xf32>
    %22 = tpu.matmul %19, %21, %cst_23 {dimension_numbers = #tpu.dot_dimension_numbers<[1], [0], [0], [1], [0, 0, 1, 1], [], []>} : vector<4x64xf32>, vector<64x362xf32>, vector<4x362xf32> -> vector<4x362xf32>
    %23 = arith.addf %14, %22 : vector<4x362xf32>
    %c2 = arith.constant 2 : index
    %c0_24 = arith.constant 0 : index
    %c0_25 = arith.constant 0 : index
    %24 = vector.load %arg3[%c2, %c0_24, %c0_25] : memref<4x4x8xf32, #tpu.memory_space<vmem>>, vector<1x4x8xf32>
    %25 = vector.shape_cast %24 : vector<1x4x8xf32> to vector<4x8xf32>
    %cst_26 = arith.constant dense<0.000000e+00> : vector<4x64xf32>
    %26 = tpu.matmul %25, %1, %cst_26 {dimension_numbers = #tpu.dot_dimension_numbers<[1], [0], [0], [1], [0, 0, 1, 1], [], []>} : vector<4x8xf32>, vector<8x64xf32>, vector<4x64xf32> -> vector<4x64xf32>
    %27 = vector.broadcast %6 : vector<4x1xf32> to vector<4x64xf32>
    %28 = arith.addf %26, %27 : vector<4x64xf32>
    %c2_27 = arith.constant 2 : index
    %c0_28 = arith.constant 0 : index
    %c0_29 = arith.constant 0 : index
    %29 = vector.load %arg5[%c2_27, %c0_28, %c0_29] : memref<4x64x362xf32, #tpu.memory_space<vmem>>, vector<1x64x362xf32>
    %30 = vector.shape_cast %29 : vector<1x64x362xf32> to vector<64x362xf32>
    %cst_30 = arith.constant dense<0.000000e+00> : vector<4x362xf32>
    %31 = tpu.matmul %28, %30, %cst_30 {dimension_numbers = #tpu.dot_dimension_numbers<[1], [0], [0], [1], [0, 0, 1, 1], [], []>} : vector<4x64xf32>, vector<64x362xf32>, vector<4x362xf32> -> vector<4x362xf32>
    %32 = arith.addf %23, %31 : vector<4x362xf32>
    %c3 = arith.constant 3 : index
    %c0_31 = arith.constant 0 : index
    %c0_32 = arith.constant 0 : index
    %33 = vector.load %arg3[%c3, %c0_31, %c0_32] : memref<4x4x8xf32, #tpu.memory_space<vmem>>, vector<1x4x8xf32>
    %34 = vector.shape_cast %33 : vector<1x4x8xf32> to vector<4x8xf32>
    %cst_33 = arith.constant dense<0.000000e+00> : vector<4x64xf32>
    %35 = tpu.matmul %34, %1, %cst_33 {dimension_numbers = #tpu.dot_dimension_numbers<[1], [0], [0], [1], [0, 0, 1, 1], [], []>} : vector<4x8xf32>, vector<8x64xf32>, vector<4x64xf32> -> vector<4x64xf32>
    %36 = vector.broadcast %6 : vector<4x1xf32> to vector<4x64xf32>
    %37 = arith.addf %35, %36 : vector<4x64xf32>
    %c3_34 = arith.constant 3 : index
    %c0_35 = arith.constant 0 : index
    %c0_36 = arith.constant 0 : index
    %38 = vector.load %arg5[%c3_34, %c0_35, %c0_36] : memref<4x64x362xf32, #tpu.memory_space<vmem>>, vector<1x64x362xf32>
    %39 = vector.shape_cast %38 : vector<1x64x362xf32> to vector<64x362xf32>
    %cst_37 = arith.constant dense<0.000000e+00> : vector<4x362xf32>
    %40 = tpu.matmul %37, %39, %cst_37 {dimension_numbers = #tpu.dot_dimension_numbers<[1], [0], [0], [1], [0, 0, 1, 1], [], []>} : vector<4x64xf32>, vector<64x362xf32>, vector<4x362xf32> -> vector<4x362xf32>
    %41 = arith.addf %32, %40 : vector<4x362xf32>
    %c0_38 = arith.constant 0 : index
    %c0_39 = arith.constant 0 : index
    %c0_40 = arith.constant 0 : index
    %42 = vector.load %arg7[%c0_38, %c0_39, %c0_40] : memref<9x4x4xf32, #tpu.memory_space<vmem>>, vector<1x4x4xf32>
    %43 = vector.shape_cast %42 : vector<1x4x4xf32> to vector<4x4xf32>
    %44 = vector.extract_strided_slice %5 {offsets = [0, 0], sizes = [4, 324], strides = [1, 1]} : vector<4x362xf32> to vector<4x324xf32>
    %cst_41 = arith.constant dense<0.000000e+00> : vector<4x324xf32>
    %45 = tpu.matmul %43, %44, %cst_41 {dimension_numbers = #tpu.dot_dimension_numbers<[1], [0], [0], [1], [0, 0, 1, 1], [], []>} : vector<4x4xf32>, vector<4x324xf32>, vector<4x324xf32> -> vector<4x324xf32>
    %c0_42 = arith.constant 0 : index
    %c0_43 = arith.constant 0 : index
    %c0_44 = arith.constant 0 : index
    %46 = vector.load %arg8[%c0_42, %c0_43, %c0_44] : memref<9x4x4xf32, #tpu.memory_space<vmem>>, vector<1x4x4xf32>
    %47 = vector.shape_cast %46 : vector<1x4x4xf32> to vector<4x4xf32>
    %48 = vector.extract_strided_slice %41 {offsets = [0, 0], sizes = [4, 324], strides = [1, 1]} : vector<4x362xf32> to vector<4x324xf32>
    %cst_45 = arith.constant dense<0.000000e+00> : vector<4x324xf32>
    %49 = tpu.matmul %47, %48, %cst_45 {dimension_numbers = #tpu.dot_dimension_numbers<[1], [0], [0], [1], [0, 0, 1, 1], [], []>} : vector<4x4xf32>, vector<4x324xf32>, vector<4x324xf32> -> vector<4x324xf32>
    %50 = arith.addf %45, %49 : vector<4x324xf32>
    %c1_46 = arith.constant 1 : index
    %c0_47 = arith.constant 0 : index
    %c0_48 = arith.constant 0 : index
    %51 = vector.load %arg7[%c1_46, %c0_47, %c0_48] : memref<9x4x4xf32, #tpu.memory_space<vmem>>, vector<1x4x4xf32>
    %52 = vector.shape_cast %51 : vector<1x4x4xf32> to vector<4x4xf32>
    %53 = vector.extract_strided_slice %5 {offsets = [0, 1], sizes = [4, 324], strides = [1, 1]} : vector<4x362xf32> to vector<4x324xf32>
    %cst_49 = arith.constant dense<0.000000e+00> : vector<4x324xf32>
    %54 = tpu.matmul %52, %53, %cst_49 {dimension_numbers = #tpu.dot_dimension_numbers<[1], [0], [0], [1], [0, 0, 1, 1], [], []>} : vector<4x4xf32>, vector<4x324xf32>, vector<4x324xf32> -> vector<4x324xf32>
    %c1_50 = arith.constant 1 : index
    %c0_51 = arith.constant 0 : index
    %c0_52 = arith.constant 0 : index
    %55 = vector.load %arg8[%c1_50, %c0_51, %c0_52] : memref<9x4x4xf32, #tpu.memory_space<vmem>>, vector<1x4x4xf32>
    %56 = vector.shape_cast %55 : vector<1x4x4xf32> to vector<4x4xf32>
    %57 = vector.extract_strided_slice %41 {offsets = [0, 1], sizes = [4, 324], strides = [1, 1]} : vector<4x362xf32> to vector<4x324xf32>
    %cst_53 = arith.constant dense<0.000000e+00> : vector<4x324xf32>
    %58 = tpu.matmul %56, %57, %cst_53 {dimension_numbers = #tpu.dot_dimension_numbers<[1], [0], [0], [1], [0, 0, 1, 1], [], []>} : vector<4x4xf32>, vector<4x324xf32>, vector<4x324xf32> -> vector<4x324xf32>
    %59 = arith.addf %54, %58 : vector<4x324xf32>
    %60 = arith.addf %50, %59 : vector<4x324xf32>
    %c2_54 = arith.constant 2 : index
    %c0_55 = arith.constant 0 : index
    %c0_56 = arith.constant 0 : index
    %61 = vector.load %arg7[%c2_54, %c0_55, %c0_56] : memref<9x4x4xf32, #tpu.memory_space<vmem>>, vector<1x4x4xf32>
    %62 = vector.shape_cast %61 : vector<1x4x4xf32> to vector<4x4xf32>
    %63 = vector.extract_strided_slice %5 {offsets = [0, 2], sizes = [4, 324], strides = [1, 1]} : vector<4x362xf32> to vector<4x324xf32>
    %cst_57 = arith.constant dense<0.000000e+00> : vector<4x324xf32>
    %64 = tpu.matmul %62, %63, %cst_57 {dimension_numbers = #tpu.dot_dimension_numbers<[1], [0], [0], [1], [0, 0, 1, 1], [], []>} : vector<4x4xf32>, vector<4x324xf32>, vector<4x324xf32> -> vector<4x324xf32>
    %c2_58 = arith.constant 2 : index
    %c0_59 = arith.constant 0 : index
    %c0_60 = arith.constant 0 : index
    %65 = vector.load %arg8[%c2_58, %c0_59, %c0_60] : memref<9x4x4xf32, #tpu.memory_space<vmem>>, vector<1x4x4xf32>
    %66 = vector.shape_cast %65 : vector<1x4x4xf32> to vector<4x4xf32>
    %67 = vector.extract_strided_slice %41 {offsets = [0, 2], sizes = [4, 324], strides = [1, 1]} : vector<4x362xf32> to vector<4x324xf32>
    %cst_61 = arith.constant dense<0.000000e+00> : vector<4x324xf32>
    %68 = tpu.matmul %66, %67, %cst_61 {dimension_numbers = #tpu.dot_dimension_numbers<[1], [0], [0], [1], [0, 0, 1, 1], [], []>} : vector<4x4xf32>, vector<4x324xf32>, vector<4x324xf32> -> vector<4x324xf32>
    %69 = arith.addf %64, %68 : vector<4x324xf32>
    %70 = arith.addf %60, %69 : vector<4x324xf32>
    %c3_62 = arith.constant 3 : index
    %c0_63 = arith.constant 0 : index
    %c0_64 = arith.constant 0 : index
    %71 = vector.load %arg7[%c3_62, %c0_63, %c0_64] : memref<9x4x4xf32, #tpu.memory_space<vmem>>, vector<1x4x4xf32>
    %72 = vector.shape_cast %71 : vector<1x4x4xf32> to vector<4x4xf32>
    %73 = vector.extract_strided_slice %5 {offsets = [0, 18], sizes = [4, 324], strides = [1, 1]} : vector<4x362xf32> to vector<4x324xf32>
    %cst_65 = arith.constant dense<0.000000e+00> : vector<4x324xf32>
    %74 = tpu.matmul %72, %73, %cst_65 {dimension_numbers = #tpu.dot_dimension_numbers<[1], [0], [0], [1], [0, 0, 1, 1], [], []>} : vector<4x4xf32>, vector<4x324xf32>, vector<4x324xf32> -> vector<4x324xf32>
    %c3_66 = arith.constant 3 : index
    %c0_67 = arith.constant 0 : index
    %c0_68 = arith.constant 0 : index
    %75 = vector.load %arg8[%c3_66, %c0_67, %c0_68] : memref<9x4x4xf32, #tpu.memory_space<vmem>>, vector<1x4x4xf32>
    %76 = vector.shape_cast %75 : vector<1x4x4xf32> to vector<4x4xf32>
    %77 = vector.extract_strided_slice %41 {offsets = [0, 18], sizes = [4, 324], strides = [1, 1]} : vector<4x362xf32> to vector<4x324xf32>
    %cst_69 = arith.constant dense<0.000000e+00> : vector<4x324xf32>
    %78 = tpu.matmul %76, %77, %cst_69 {dimension_numbers = #tpu.dot_dimension_numbers<[1], [0], [0], [1], [0, 0, 1, 1], [], []>} : vector<4x4xf32>, vector<4x324xf32>, vector<4x324xf32> -> vector<4x324xf32>
    %79 = arith.addf %74, %78 : vector<4x324xf32>
    %80 = arith.addf %70, %79 : vector<4x324xf32>
    %c4 = arith.constant 4 : index
    %c0_70 = arith.constant 0 : index
    %c0_71 = arith.constant 0 : index
    %81 = vector.load %arg7[%c4, %c0_70, %c0_71] : memref<9x4x4xf32, #tpu.memory_space<vmem>>, vector<1x4x4xf32>
    %82 = vector.shape_cast %81 : vector<1x4x4xf32> to vector<4x4xf32>
    %83 = vector.extract_strided_slice %5 {offsets = [0, 19], sizes = [4, 324], strides = [1, 1]} : vector<4x362xf32> to vector<4x324xf32>
    %cst_72 = arith.constant dense<0.000000e+00> : vector<4x324xf32>
    %84 = tpu.matmul %82, %83, %cst_72 {dimension_numbers = #tpu.dot_dimension_numbers<[1], [0], [0], [1], [0, 0, 1, 1], [], []>} : vector<4x4xf32>, vector<4x324xf32>, vector<4x324xf32> -> vector<4x324xf32>
    %c4_73 = arith.constant 4 : index
    %c0_74 = arith.constant 0 : index
    %c0_75 = arith.constant 0 : index
    %85 = vector.load %arg8[%c4_73, %c0_74, %c0_75] : memref<9x4x4xf32, #tpu.memory_space<vmem>>, vector<1x4x4xf32>
    %86 = vector.shape_cast %85 : vector<1x4x4xf32> to vector<4x4xf32>
    %87 = vector.extract_strided_slice %41 {offsets = [0, 19], sizes = [4, 324], strides = [1, 1]} : vector<4x362xf32> to vector<4x324xf32>
    %cst_76 = arith.constant dense<0.000000e+00> : vector<4x324xf32>
    %88 = tpu.matmul %86, %87, %cst_76 {dimension_numbers = #tpu.dot_dimension_numbers<[1], [0], [0], [1], [0, 0, 1, 1], [], []>} : vector<4x4xf32>, vector<4x324xf32>, vector<4x324xf32> -> vector<4x324xf32>
    %89 = arith.addf %84, %88 : vector<4x324xf32>
    %90 = arith.addf %80, %89 : vector<4x324xf32>
    %c5 = arith.constant 5 : index
    %c0_77 = arith.constant 0 : index
    %c0_78 = arith.constant 0 : index
    %91 = vector.load %arg7[%c5, %c0_77, %c0_78] : memref<9x4x4xf32, #tpu.memory_space<vmem>>, vector<1x4x4xf32>
    %92 = vector.shape_cast %91 : vector<1x4x4xf32> to vector<4x4xf32>
    %93 = vector.extract_strided_slice %5 {offsets = [0, 20], sizes = [4, 324], strides = [1, 1]} : vector<4x362xf32> to vector<4x324xf32>
    %cst_79 = arith.constant dense<0.000000e+00> : vector<4x324xf32>
    %94 = tpu.matmul %92, %93, %cst_79 {dimension_numbers = #tpu.dot_dimension_numbers<[1], [0], [0], [1], [0, 0, 1, 1], [], []>} : vector<4x4xf32>, vector<4x324xf32>, vector<4x324xf32> -> vector<4x324xf32>
    %c5_80 = arith.constant 5 : index
    %c0_81 = arith.constant 0 : index
    %c0_82 = arith.constant 0 : index
    %95 = vector.load %arg8[%c5_80, %c0_81, %c0_82] : memref<9x4x4xf32, #tpu.memory_space<vmem>>, vector<1x4x4xf32>
    %96 = vector.shape_cast %95 : vector<1x4x4xf32> to vector<4x4xf32>
    %97 = vector.extract_strided_slice %41 {offsets = [0, 20], sizes = [4, 324], strides = [1, 1]} : vector<4x362xf32> to vector<4x324xf32>
    %cst_83 = arith.constant dense<0.000000e+00> : vector<4x324xf32>
    %98 = tpu.matmul %96, %97, %cst_83 {dimension_numbers = #tpu.dot_dimension_numbers<[1], [0], [0], [1], [0, 0, 1, 1], [], []>} : vector<4x4xf32>, vector<4x324xf32>, vector<4x324xf32> -> vector<4x324xf32>
    %99 = arith.addf %94, %98 : vector<4x324xf32>
    %100 = arith.addf %90, %99 : vector<4x324xf32>
    %c6 = arith.constant 6 : index
    %c0_84 = arith.constant 0 : index
    %c0_85 = arith.constant 0 : index
    %101 = vector.load %arg7[%c6, %c0_84, %c0_85] : memref<9x4x4xf32, #tpu.memory_space<vmem>>, vector<1x4x4xf32>
    %102 = vector.shape_cast %101 : vector<1x4x4xf32> to vector<4x4xf32>
    %103 = vector.extract_strided_slice %5 {offsets = [0, 36], sizes = [4, 324], strides = [1, 1]} : vector<4x362xf32> to vector<4x324xf32>
    %cst_86 = arith.constant dense<0.000000e+00> : vector<4x324xf32>
    %104 = tpu.matmul %102, %103, %cst_86 {dimension_numbers = #tpu.dot_dimension_numbers<[1], [0], [0], [1], [0, 0, 1, 1], [], []>} : vector<4x4xf32>, vector<4x324xf32>, vector<4x324xf32> -> vector<4x324xf32>
    %c6_87 = arith.constant 6 : index
    %c0_88 = arith.constant 0 : index
    %c0_89 = arith.constant 0 : index
    %105 = vector.load %arg8[%c6_87, %c0_88, %c0_89] : memref<9x4x4xf32, #tpu.memory_space<vmem>>, vector<1x4x4xf32>
    %106 = vector.shape_cast %105 : vector<1x4x4xf32> to vector<4x4xf32>
    %107 = vector.extract_strided_slice %41 {offsets = [0, 36], sizes = [4, 324], strides = [1, 1]} : vector<4x362xf32> to vector<4x324xf32>
    %cst_90 = arith.constant dense<0.000000e+00> : vector<4x324xf32>
    %108 = tpu.matmul %106, %107, %cst_90 {dimension_numbers = #tpu.dot_dimension_numbers<[1], [0], [0], [1], [0, 0, 1, 1], [], []>} : vector<4x4xf32>, vector<4x324xf32>, vector<4x324xf32> -> vector<4x324xf32>
    %109 = arith.addf %104, %108 : vector<4x324xf32>
    %110 = arith.addf %100, %109 : vector<4x324xf32>
    %c7 = arith.constant 7 : index
    %c0_91 = arith.constant 0 : index
    %c0_92 = arith.constant 0 : index
    %111 = vector.load %arg7[%c7, %c0_91, %c0_92] : memref<9x4x4xf32, #tpu.memory_space<vmem>>, vector<1x4x4xf32>
    %112 = vector.shape_cast %111 : vector<1x4x4xf32> to vector<4x4xf32>
    %113 = vector.extract_strided_slice %5 {offsets = [0, 37], sizes = [4, 324], strides = [1, 1]} : vector<4x362xf32> to vector<4x324xf32>
    %cst_93 = arith.constant dense<0.000000e+00> : vector<4x324xf32>
    %114 = tpu.matmul %112, %113, %cst_93 {dimension_numbers = #tpu.dot_dimension_numbers<[1], [0], [0], [1], [0, 0, 1, 1], [], []>} : vector<4x4xf32>, vector<4x324xf32>, vector<4x324xf32> -> vector<4x324xf32>
    %c7_94 = arith.constant 7 : index
    %c0_95 = arith.constant 0 : index
    %c0_96 = arith.constant 0 : index
    %115 = vector.load %arg8[%c7_94, %c0_95, %c0_96] : memref<9x4x4xf32, #tpu.memory_space<vmem>>, vector<1x4x4xf32>
    %116 = vector.shape_cast %115 : vector<1x4x4xf32> to vector<4x4xf32>
    %117 = vector.extract_strided_slice %41 {offsets = [0, 37], sizes = [4, 324], strides = [1, 1]} : vector<4x362xf32> to vector<4x324xf32>
    %cst_97 = arith.constant dense<0.000000e+00> : vector<4x324xf32>
    %118 = tpu.matmul %116, %117, %cst_97 {dimension_numbers = #tpu.dot_dimension_numbers<[1], [0], [0], [1], [0, 0, 1, 1], [], []>} : vector<4x4xf32>, vector<4x324xf32>, vector<4x324xf32> -> vector<4x324xf32>
    %119 = arith.addf %114, %118 : vector<4x324xf32>
    %120 = arith.addf %110, %119 : vector<4x324xf32>
    %c8 = arith.constant 8 : index
    %c0_98 = arith.constant 0 : index
    %c0_99 = arith.constant 0 : index
    %121 = vector.load %arg7[%c8, %c0_98, %c0_99] : memref<9x4x4xf32, #tpu.memory_space<vmem>>, vector<1x4x4xf32>
    %122 = vector.shape_cast %121 : vector<1x4x4xf32> to vector<4x4xf32>
    %123 = vector.extract_strided_slice %5 {offsets = [0, 38], sizes = [4, 324], strides = [1, 1]} : vector<4x362xf32> to vector<4x324xf32>
    %cst_100 = arith.constant dense<0.000000e+00> : vector<4x324xf32>
    %124 = tpu.matmul %122, %123, %cst_100 {dimension_numbers = #tpu.dot_dimension_numbers<[1], [0], [0], [1], [0, 0, 1, 1], [], []>} : vector<4x4xf32>, vector<4x324xf32>, vector<4x324xf32> -> vector<4x324xf32>
    %c8_101 = arith.constant 8 : index
    %c0_102 = arith.constant 0 : index
    %c0_103 = arith.constant 0 : index
    %125 = vector.load %arg8[%c8_101, %c0_102, %c0_103] : memref<9x4x4xf32, #tpu.memory_space<vmem>>, vector<1x4x4xf32>
    %126 = vector.shape_cast %125 : vector<1x4x4xf32> to vector<4x4xf32>
    %127 = vector.extract_strided_slice %41 {offsets = [0, 38], sizes = [4, 324], strides = [1, 1]} : vector<4x362xf32> to vector<4x324xf32>
    %cst_104 = arith.constant dense<0.000000e+00> : vector<4x324xf32>
    %128 = tpu.matmul %126, %127, %cst_104 {dimension_numbers = #tpu.dot_dimension_numbers<[1], [0], [0], [1], [0, 0, 1, 1], [], []>} : vector<4x4xf32>, vector<4x324xf32>, vector<4x324xf32> -> vector<4x324xf32>
    %129 = arith.addf %124, %128 : vector<4x324xf32>
    %130 = arith.addf %120, %129 : vector<4x324xf32>
    %c0_105 = arith.constant 0 : index
    %c0_106 = arith.constant 0 : index
    %131 = vector.load %arg9[%c0_105, %c0_106] : memref<4x1xf32, #tpu.memory_space<vmem>>, vector<4x1xf32>
    %132 = vector.broadcast %131 : vector<4x1xf32> to vector<4x324xf32>
    %133 = arith.addf %130, %132 : vector<4x324xf32>
    %cst_107 = arith.constant 0.000000e+00 : f32
    %134 = vector.broadcast %cst_107 : f32 to vector<4x324xf32>
    %135 = arith.maximumf %133, %134 : vector<4x324xf32>
    %c0_108 = arith.constant 0 : index
    %c0_109 = arith.constant 0 : index
    %136 = vector.load %arg10[%c0_108, %c0_109] : memref<324x362xf32, #tpu.memory_space<vmem>>, vector<324x362xf32>
    %cst_110 = arith.constant dense<0.000000e+00> : vector<4x362xf32>
    %137 = tpu.matmul %135, %136, %cst_110 {dimension_numbers = #tpu.dot_dimension_numbers<[1], [0], [0], [1], [0, 0, 1, 1], [], []>} : vector<4x324xf32>, vector<324x362xf32>, vector<4x362xf32> -> vector<4x362xf32>
    %c0_111 = arith.constant 0 : index
    %c0_112 = arith.constant 0 : index
    %c0_113 = arith.constant 0 : index
    %138 = vector.load %arg11[%c0_111, %c0_112, %c0_113] : memref<9x4x4xf32, #tpu.memory_space<vmem>>, vector<1x4x4xf32>
    %139 = vector.shape_cast %138 : vector<1x4x4xf32> to vector<4x4xf32>
    %140 = vector.extract_strided_slice %137 {offsets = [0, 0], sizes = [4, 324], strides = [1, 1]} : vector<4x362xf32> to vector<4x324xf32>
    %cst_114 = arith.constant dense<0.000000e+00> : vector<4x324xf32>
    %141 = tpu.matmul %139, %140, %cst_114 {dimension_numbers = #tpu.dot_dimension_numbers<[1], [0], [0], [1], [0, 0, 1, 1], [], []>} : vector<4x4xf32>, vector<4x324xf32>, vector<4x324xf32> -> vector<4x324xf32>
    %c1_115 = arith.constant 1 : index
    %c0_116 = arith.constant 0 : index
    %c0_117 = arith.constant 0 : index
    %142 = vector.load %arg11[%c1_115, %c0_116, %c0_117] : memref<9x4x4xf32, #tpu.memory_space<vmem>>, vector<1x4x4xf32>
    %143 = vector.shape_cast %142 : vector<1x4x4xf32> to vector<4x4xf32>
    %144 = vector.extract_strided_slice %137 {offsets = [0, 1], sizes = [4, 324], strides = [1, 1]} : vector<4x362xf32> to vector<4x324xf32>
    %cst_118 = arith.constant dense<0.000000e+00> : vector<4x324xf32>
    %145 = tpu.matmul %143, %144, %cst_118 {dimension_numbers = #tpu.dot_dimension_numbers<[1], [0], [0], [1], [0, 0, 1, 1], [], []>} : vector<4x4xf32>, vector<4x324xf32>, vector<4x324xf32> -> vector<4x324xf32>
    %146 = arith.addf %141, %145 : vector<4x324xf32>
    %c2_119 = arith.constant 2 : index
    %c0_120 = arith.constant 0 : index
    %c0_121 = arith.constant 0 : index
    %147 = vector.load %arg11[%c2_119, %c0_120, %c0_121] : memref<9x4x4xf32, #tpu.memory_space<vmem>>, vector<1x4x4xf32>
    %148 = vector.shape_cast %147 : vector<1x4x4xf32> to vector<4x4xf32>
    %149 = vector.extract_strided_slice %137 {offsets = [0, 2], sizes = [4, 324], strides = [1, 1]} : vector<4x362xf32> to vector<4x324xf32>
    %cst_122 = arith.constant dense<0.000000e+00> : vector<4x324xf32>
    %150 = tpu.matmul %148, %149, %cst_122 {dimension_numbers = #tpu.dot_dimension_numbers<[1], [0], [0], [1], [0, 0, 1, 1], [], []>} : vector<4x4xf32>, vector<4x324xf32>, vector<4x324xf32> -> vector<4x324xf32>
    %151 = arith.addf %146, %150 : vector<4x324xf32>
    %c3_123 = arith.constant 3 : index
    %c0_124 = arith.constant 0 : index
    %c0_125 = arith.constant 0 : index
    %152 = vector.load %arg11[%c3_123, %c0_124, %c0_125] : memref<9x4x4xf32, #tpu.memory_space<vmem>>, vector<1x4x4xf32>
    %153 = vector.shape_cast %152 : vector<1x4x4xf32> to vector<4x4xf32>
    %154 = vector.extract_strided_slice %137 {offsets = [0, 18], sizes = [4, 324], strides = [1, 1]} : vector<4x362xf32> to vector<4x324xf32>
    %cst_126 = arith.constant dense<0.000000e+00> : vector<4x324xf32>
    %155 = tpu.matmul %153, %154, %cst_126 {dimension_numbers = #tpu.dot_dimension_numbers<[1], [0], [0], [1], [0, 0, 1, 1], [], []>} : vector<4x4xf32>, vector<4x324xf32>, vector<4x324xf32> -> vector<4x324xf32>
    %156 = arith.addf %151, %155 : vector<4x324xf32>
    %c4_127 = arith.constant 4 : index
    %c0_128 = arith.constant 0 : index
    %c0_129 = arith.constant 0 : index
    %157 = vector.load %arg11[%c4_127, %c0_128, %c0_129] : memref<9x4x4xf32, #tpu.memory_space<vmem>>, vector<1x4x4xf32>
    %158 = vector.shape_cast %157 : vector<1x4x4xf32> to vector<4x4xf32>
    %159 = vector.extract_strided_slice %137 {offsets = [0, 19], sizes = [4, 324], strides = [1, 1]} : vector<4x362xf32> to vector<4x324xf32>
    %cst_130 = arith.constant dense<0.000000e+00> : vector<4x324xf32>
    %160 = tpu.matmul %158, %159, %cst_130 {dimension_numbers = #tpu.dot_dimension_numbers<[1], [0], [0], [1], [0, 0, 1, 1], [], []>} : vector<4x4xf32>, vector<4x324xf32>, vector<4x324xf32> -> vector<4x324xf32>
    %161 = arith.addf %156, %160 : vector<4x324xf32>
    %c5_131 = arith.constant 5 : index
    %c0_132 = arith.constant 0 : index
    %c0_133 = arith.constant 0 : index
    %162 = vector.load %arg11[%c5_131, %c0_132, %c0_133] : memref<9x4x4xf32, #tpu.memory_space<vmem>>, vector<1x4x4xf32>
    %163 = vector.shape_cast %162 : vector<1x4x4xf32> to vector<4x4xf32>
    %164 = vector.extract_strided_slice %137 {offsets = [0, 20], sizes = [4, 324], strides = [1, 1]} : vector<4x362xf32> to vector<4x324xf32>
    %cst_134 = arith.constant dense<0.000000e+00> : vector<4x324xf32>
    %165 = tpu.matmul %163, %164, %cst_134 {dimension_numbers = #tpu.dot_dimension_numbers<[1], [0], [0], [1], [0, 0, 1, 1], [], []>} : vector<4x4xf32>, vector<4x324xf32>, vector<4x324xf32> -> vector<4x324xf32>
    %166 = arith.addf %161, %165 : vector<4x324xf32>
    %c6_135 = arith.constant 6 : index
    %c0_136 = arith.constant 0 : index
    %c0_137 = arith.constant 0 : index
    %167 = vector.load %arg11[%c6_135, %c0_136, %c0_137] : memref<9x4x4xf32, #tpu.memory_space<vmem>>, vector<1x4x4xf32>
    %168 = vector.shape_cast %167 : vector<1x4x4xf32> to vector<4x4xf32>
    %169 = vector.extract_strided_slice %137 {offsets = [0, 36], sizes = [4, 324], strides = [1, 1]} : vector<4x362xf32> to vector<4x324xf32>
    %cst_138 = arith.constant dense<0.000000e+00> : vector<4x324xf32>
    %170 = tpu.matmul %168, %169, %cst_138 {dimension_numbers = #tpu.dot_dimension_numbers<[1], [0], [0], [1], [0, 0, 1, 1], [], []>} : vector<4x4xf32>, vector<4x324xf32>, vector<4x324xf32> -> vector<4x324xf32>
    %171 = arith.addf %166, %170 : vector<4x324xf32>
    %c7_139 = arith.constant 7 : index
    %c0_140 = arith.constant 0 : index
    %c0_141 = arith.constant 0 : index
    %172 = vector.load %arg11[%c7_139, %c0_140, %c0_141] : memref<9x4x4xf32, #tpu.memory_space<vmem>>, vector<1x4x4xf32>
    %173 = vector.shape_cast %172 : vector<1x4x4xf32> to vector<4x4xf32>
    %174 = vector.extract_strided_slice %137 {offsets = [0, 37], sizes = [4, 324], strides = [1, 1]} : vector<4x362xf32> to vector<4x324xf32>
    %cst_142 = arith.constant dense<0.000000e+00> : vector<4x324xf32>
    %175 = tpu.matmul %173, %174, %cst_142 {dimension_numbers = #tpu.dot_dimension_numbers<[1], [0], [0], [1], [0, 0, 1, 1], [], []>} : vector<4x4xf32>, vector<4x324xf32>, vector<4x324xf32> -> vector<4x324xf32>
    %176 = arith.addf %171, %175 : vector<4x324xf32>
    %c8_143 = arith.constant 8 : index
    %c0_144 = arith.constant 0 : index
    %c0_145 = arith.constant 0 : index
    %177 = vector.load %arg11[%c8_143, %c0_144, %c0_145] : memref<9x4x4xf32, #tpu.memory_space<vmem>>, vector<1x4x4xf32>
    %178 = vector.shape_cast %177 : vector<1x4x4xf32> to vector<4x4xf32>
    %179 = vector.extract_strided_slice %137 {offsets = [0, 38], sizes = [4, 324], strides = [1, 1]} : vector<4x362xf32> to vector<4x324xf32>
    %cst_146 = arith.constant dense<0.000000e+00> : vector<4x324xf32>
    %180 = tpu.matmul %178, %179, %cst_146 {dimension_numbers = #tpu.dot_dimension_numbers<[1], [0], [0], [1], [0, 0, 1, 1], [], []>} : vector<4x4xf32>, vector<4x324xf32>, vector<4x324xf32> -> vector<4x324xf32>
    %181 = arith.addf %176, %180 : vector<4x324xf32>
    %c0_147 = arith.constant 0 : index
    %c0_148 = arith.constant 0 : index
    %182 = vector.load %arg12[%c0_147, %c0_148] : memref<4x1xf32, #tpu.memory_space<vmem>>, vector<4x1xf32>
    %183 = vector.broadcast %182 : vector<4x1xf32> to vector<4x324xf32>
    %184 = arith.addf %181, %183 : vector<4x324xf32>
    %cst_149 = arith.constant 0.000000e+00 : f32
    %185 = vector.broadcast %cst_149 : f32 to vector<4x324xf32>
    %186 = arith.maximumf %184, %185 : vector<4x324xf32>
    %187 = vector.extract_strided_slice %5 {offsets = [0, 19], sizes = [4, 324], strides = [1, 1]} : vector<4x362xf32> to vector<4x324xf32>
    %188 = vector.extract_strided_slice %41 {offsets = [0, 19], sizes = [4, 324], strides = [1, 1]} : vector<4x362xf32> to vector<4x324xf32>
    %c0_150 = arith.constant 0 : index
    %c0_151 = arith.constant 0 : index
    %189 = vector.load %arg13[%c0_150, %c0_151] : memref<4x4xf32, #tpu.memory_space<vmem>>, vector<4x4xf32>
    %cst_152 = arith.constant dense<0.000000e+00> : vector<4x324xf32>
    %190 = tpu.matmul %189, %187, %cst_152 {dimension_numbers = #tpu.dot_dimension_numbers<[1], [0], [0], [1], [0, 0, 1, 1], [], []>} : vector<4x4xf32>, vector<4x324xf32>, vector<4x324xf32> -> vector<4x324xf32>
    %c0_153 = arith.constant 0 : index
    %c0_154 = arith.constant 0 : index
    %191 = vector.load %arg14[%c0_153, %c0_154] : memref<4x4xf32, #tpu.memory_space<vmem>>, vector<4x4xf32>
    %cst_155 = arith.constant dense<0.000000e+00> : vector<4x324xf32>
    %192 = tpu.matmul %191, %188, %cst_155 {dimension_numbers = #tpu.dot_dimension_numbers<[1], [0], [0], [1], [0, 0, 1, 1], [], []>} : vector<4x4xf32>, vector<4x324xf32>, vector<4x324xf32> -> vector<4x324xf32>
    %193 = arith.addf %190, %192 : vector<4x324xf32>
    %c0_156 = arith.constant 0 : index
    %c0_157 = arith.constant 0 : index
    %194 = vector.load %arg15[%c0_156, %c0_157] : memref<4x1xf32, #tpu.memory_space<vmem>>, vector<4x1xf32>
    %195 = vector.broadcast %194 : vector<4x1xf32> to vector<4x324xf32>
    %196 = arith.addf %193, %195 : vector<4x324xf32>
    %197 = arith.addf %186, %196 : vector<4x324xf32>
    %cst_158 = arith.constant 0.000000e+00 : f32
    %198 = vector.broadcast %cst_158 : f32 to vector<4x324xf32>
    %199 = arith.maximumf %197, %198 : vector<4x324xf32>
    %c0_159 = arith.constant 0 : index
    %c0_160 = arith.constant 0 : index
    %200 = vector.load %arg16[%c0_159, %c0_160] : memref<324x256xf32, #tpu.memory_space<vmem>>, vector<324x256xf32>
    %cst_161 = arith.constant dense<0.000000e+00> : vector<4x256xf32>
    %201 = tpu.matmul %199, %200, %cst_161 {dimension_numbers = #tpu.dot_dimension_numbers<[1], [0], [0], [1], [0, 0, 1, 1], [], []>} : vector<4x324xf32>, vector<324x256xf32>, vector<4x256xf32> -> vector<4x256xf32>
    %c0_162 = arith.constant 0 : index
    %c0_163 = arith.constant 0 : index
    %c0_164 = arith.constant 0 : index
    %202 = vector.load %arg17[%c0_162, %c0_163, %c0_164] : memref<1x4x256xf32, #tpu.memory_space<vmem>>, vector<1x4x256xf32>
    %203 = vector.shape_cast %202 : vector<1x4x256xf32> to vector<4x256xf32>
    %204 = vector.shape_cast %201 : vector<4x256xf32> to vector<1x4x256xf32>
    tpu.vector_store %arg17[%c0_162, %c0_163, %c0_164], %204 {strides = array<i32>} : memref<1x4x256xf32, #tpu.memory_space<vmem>>, vector<1x4x256xf32>,
    return
  }
  func.func @transform_0(%arg0: i32) -> (i32, i32, i32) {
    %c0_i32 = arith.constant 0 : i32
    %c0_i32_0 = arith.constant 0 : i32
    %c0_i32_1 = arith.constant 0 : i32
    return %arg0, %c0_i32, %c0_i32_0 : i32, i32, i32
  }
  func.func @transform_1(%arg0: i32) -> (i32, i32, i32) {
    %c0_i32 = arith.constant 0 : i32
    %c0_i32_0 = arith.constant 0 : i32
    %c0_i32_1 = arith.constant 0 : i32
    return %arg0, %c0_i32, %c0_i32_0 : i32, i32, i32
  }
  func.func @transform_2(%arg0: i32) -> (i32, i32, i32) {
    %c0_i32 = arith.constant 0 : i32
    %c0_i32_0 = arith.constant 0 : i32
    %c0_i32_1 = arith.constant 0 : i32
    %c0_i32_2 = arith.constant 0 : i32
    return %c0_i32, %c0_i32_0, %c0_i32_1 : i32, i32, i32
  }
  func.func @transform_3(%arg0: i32) -> (i32, i32) {
    %c0_i32 = arith.constant 0 : i32
    %c0_i32_0 = arith.constant 0 : i32
    %c0_i32_1 = arith.constant 0 : i32
    return %c0_i32, %c0_i32_0 : i32, i32
  }
  func.func @transform_4(%arg0: i32) -> (i32, i32, i32) {
    %c0_i32 = arith.constant 0 : i32
    %c0_i32_0 = arith.constant 0 : i32
    %c0_i32_1 = arith.constant 0 : i32
    %c0_i32_2 = arith.constant 0 : i32
    return %c0_i32, %c0_i32_0, %c0_i32_1 : i32, i32, i32
  }
  func.func @transform_5(%arg0: i32) -> (i32, i32) {
    %c0_i32 = arith.constant 0 : i32
    %c0_i32_0 = arith.constant 0 : i32
    %c0_i32_1 = arith.constant 0 : i32
    return %c0_i32, %c0_i32_0 : i32, i32
  }
  func.func @transform_6(%arg0: i32) -> (i32, i32, i32) {
    %c0_i32 = arith.constant 0 : i32
    %c0_i32_0 = arith.constant 0 : i32
    %c0_i32_1 = arith.constant 0 : i32
    %c0_i32_2 = arith.constant 0 : i32
    return %c0_i32, %c0_i32_0, %c0_i32_1 : i32, i32, i32
  }
  func.func @transform_7(%arg0: i32) -> (i32, i32, i32) {
    %c0_i32 = arith.constant 0 : i32
    %c0_i32_0 = arith.constant 0 : i32
    %c0_i32_1 = arith.constant 0 : i32
    %c0_i32_2 = arith.constant 0 : i32
    return %c0_i32, %c0_i32_0, %c0_i32_1 : i32, i32, i32
  }
  func.func @transform_8(%arg0: i32) -> (i32, i32) {
    %c0_i32 = arith.constant 0 : i32
    %c0_i32_0 = arith.constant 0 : i32
    %c0_i32_1 = arith.constant 0 : i32
    return %c0_i32, %c0_i32_0 : i32, i32
  }
  func.func @transform_9(%arg0: i32) -> (i32, i32) {
    %c0_i32 = arith.constant 0 : i32
    %c0_i32_0 = arith.constant 0 : i32
    %c0_i32_1 = arith.constant 0 : i32
    return %c0_i32, %c0_i32_0 : i32, i32
  }
  func.func @transform_10(%arg0: i32) -> (i32, i32, i32) {
    %c0_i32 = arith.constant 0 : i32
    %c0_i32_0 = arith.constant 0 : i32
    %c0_i32_1 = arith.constant 0 : i32
    %c0_i32_2 = arith.constant 0 : i32
    return %c0_i32, %c0_i32_0, %c0_i32_1 : i32, i32, i32
  }
  func.func @transform_11(%arg0: i32) -> (i32, i32) {
    %c0_i32 = arith.constant 0 : i32
    %c0_i32_0 = arith.constant 0 : i32
    %c0_i32_1 = arith.constant 0 : i32
    return %c0_i32, %c0_i32_0 : i32, i32
  }
  func.func @transform_12(%arg0: i32) -> (i32, i32) {
    %c0_i32 = arith.constant 0 : i32
    %c0_i32_0 = arith.constant 0 : i32
    %c0_i32_1 = arith.constant 0 : i32
    return %c0_i32, %c0_i32_0 : i32, i32
  }
  func.func @transform_13(%arg0: i32) -> (i32, i32) {
    %c0_i32 = arith.constant 0 : i32
    %c0_i32_0 = arith.constant 0 : i32
    %c0_i32_1 = arith.constant 0 : i32
    return %c0_i32, %c0_i32_0 : i32, i32
  }
  func.func @transform_14(%arg0: i32) -> (i32, i32) {
    %c0_i32 = arith.constant 0 : i32
    %c0_i32_0 = arith.constant 0 : i32
    %c0_i32_1 = arith.constant 0 : i32
    return %c0_i32, %c0_i32_0 : i32, i32
  }
  func.func @transform_15(%arg0: i32) -> (i32, i32) {
    %c0_i32 = arith.constant 0 : i32
    %c0_i32_0 = arith.constant 0 : i32
    %c0_i32_1 = arith.constant 0 : i32
    return %c0_i32, %c0_i32_0 : i32, i32
  }
  func.func @transform_16(%arg0: i32) -> (i32, i32, i32) {
    %c0_i32 = arith.constant 0 : i32
    %c0_i32_0 = arith.constant 0 : i32
    %c0_i32_1 = arith.constant 0 : i32
    return %arg0, %c0_i32, %c0_i32_0 : i32, i32, i32
  }
}

</mosaic_0001>

<bundles_post_ra>
// kernel: tpu_custom_call.1
= control target key start
LH: loop header
LB: loop body
LE: loop exit
PB: predicated region body
PF: predicated region fallthrough
CT: control target
= control target key end

     0   :  { %s6282_s0 = inlined_call_operand.vmem [shape: f32[2,8,64], index: 0, kind: input, shape index: {}]   ;;  %s6283_s1 = inlined_call_operand.vmem [shape: f32[2,4,256], index: 1, kind: input, shape index: {}]   ;;  %s6284_s2 = inlined_call_operand.vmem [shape: f32[4,4,8], index: 2, kind: input, shape index: {}]   ;;  %s6285_s3 = inlined_call_operand.vmem [shape: f32[4,1], index: 3, kind: input, shape index: {}]   ;;  %s6286_s4 = inlined_call_operand.hbm [shape: f32[4,64,362], index: 4, kind: input, shape index: {}]   ;;  %s6287_s5 = inlined_call_operand.vmem [shape: f32[256,362], index: 5, kind: input, shape index: {}]   ;;  %s6288_s6 = inlined_call_operand.vmem [shape: f32[9,4,4], index: 6, kind: input, shape index: {}]   ;;  %s6289_s7 = inlined_call_operand.vmem [shape: f32[9,4,4], index: 7, kind: input, shape index: {}]   ;;  %s6290_s8 = inlined_call_operand.vmem [shape: f32[4,1], index: 8, kind: input, shape index: {}]   ;;  %s6291_s9 = inlined_call_operand.vmem [shape: f32[324,362], index: 9, kind: input, shape index: {}]   ;;  %s6292_s10 = inlined_call_operand.vmem [shape: f32[9,4,4], index: 10, kind: input, shape index: {}]   ;;  %s6293_s11 = inlined_call_operand.vmem [shape: f32[4,1], index: 11, kind: input, shape index: {}]   ;;  %s6294_s12 = inlined_call_operand.vmem [shape: f32[4,4], index: 12, kind: input, shape index: {}]   ;;  %s6295_s13 = inlined_call_operand.vmem [shape: f32[4,4], index: 13, kind: input, shape index: {}]   ;;  %s6296_s14 = inlined_call_operand.vmem [shape: f32[4,1], index: 14, kind: input, shape index: {}]   ;;  %s6297_s15 = inlined_call_operand.hbm [shape: f32[324,256], index: 15, kind: input, shape index: {}]   ;;  %s6298_s16 = inlined_call_operand.hbm [shape: f32[2,4,256], index: 16, kind: output, shape index: {}]  }
   0x1   :  { %6313 = sst [smem:[#allocation17_spill]] %s6282_s0 }
   0x2   :  { %6314 = sst [smem:[#allocation18_spill]] %s6283_s1 }
   0x3   :  { %6315 = sst [smem:[#allocation19_spill]] %s6286_s4 }
   0x4   :  { %21 = vsyncpa [#allocation3], 0 }
   0x5   :  { %22 = vsyncpa [#allocation6], 0 }
   0x6   :  { %23 = vsyncpa [#allocation4], 0 }
   0x7   :  { %25 = vsyncpa [#allocation4 + $0x1], 0  ;;  %s4793_s21 = smov 0   ;;  %s4795_s22 = smov 0  }
   0x8   :  { %s4797_s23 = smov 0   ;;  %s4799_s24 = smov 0  }
   0x9 LB: > { %6316 = sst [smem:[#allocation11_spill]] %s4679_s21  ;;  %s4814_s25 = sadd.s32 4294967295, %s4691_s24   ;;  %s4691_s24 = sphi %s4799_s24, %s6335_s24   ;;  %s4687_s23 = sphi %s4797_s23, %s6337_s23   ;;  %s4683_s22 = sphi %s4795_s22, %s6339_s22   ;;  %s4679_s21 = sphi %s4793_s21, %s6338_s21  }
   0xa   : > { %6317 = sst [smem:[#allocation12_spill]] %s4687_s23  ;;  %s4239_s26 = sadd.s32 4294967294, %s4691_s24  }
   0xb   : > { %6318 = sst [smem:[#allocation13_spill]] %s4691_s24  ;;  %s4818_s27 = sadd.s32 1, %s4691_s24  }
   0xc   : > { %6319 = sst [smem:[#allocation14_spill]] %s4818_s27  ;;  %s384_s28 = sadd.s32 1, %s4687_s23 }
   0xd   : > { %s381_s29 = ssub.s32 %s4691_s24, %s4818_s27  ;;  %p394_p0 = scmp.ne.s32.totalorder %s4687_s23, %s4683_s22 }
   0xe   : > { %p382_p1 = scmp.eq.s32.totalorder %s381_s29, 0  ;;  %p395_p2 = scmp.eq.s32.totalorder %s4814_s25, 1 }
   0xf   : > { %p400_p3 = scmp.ne.s32.totalorder %s4683_s22, %s4679_s21  ;;  %p401_p4 = scmp.eq.s32.totalorder %s4239_s26, 1 }
  0x10   : > { %s4829_s30 = scalar_select %p382_p1, %s4687_s23, %s384_s28  }
  0x11   : > { %p4831_p5 = por %p395_p2, %p394_p0  ;;  %p4835_p6 = por %p401_p4, %p400_p3 }
  0x12   : > { %6320 = sst [smem:[#allocation15_spill]] %s4829_s30  ;;  %p4240_p7 = scmp.ge.s32.totalorder %s4691_s24, 1 }
  0x13   : > { %s6322_s17 = scalar_select %p4835_p6, 1, 0 }
  0x14   : > { %p408_p8 = scmp.lt.s32.totalorder %s4691_s24, 3  ;;  %p4506_p9 = scmp.eq.s32.totalorder %s4814_s25, 0 }
  0x15   : > { %6323 = sst [smem:[#allocation16_spill]] %s6322_s17  ;;  %s4693_s28 = smov [#allocation2]  }
  0x16   : > { %p4842_p10 = pnand %p4240_p7, %p408_p8  ;;  %s6325_s4 = sld [smem:[#allocation19_spill]] }
  0x17   : > { %s427_s29 = sshll.u32 %s4693_s28, 4  ;;  %s469_s27 = sshll.u32 %s6297_s15, 4  ;;  %s428_s29 = int_to_ptr.vmem [resolvable:$true] %s427_s29  ;;  %s470_s27 = int_to_ptr.hbm [resolvable:$true] %s469_s27 }
  0x18   : > { %p4495_p11 = pneg %p4842_p10  ;;  %s4694_s17 = smov 384  }
  0x19   : > { %s4695_s21 = smov 24   ;;  %s4696_s24 = smov [#allocation5]  }
  0x1a   : > { %p4496_p12 = pnand %p4506_p9, %p4495_p11  ;;  %s471_s19 = sshll.u32 %s4696_s24, 4  ;;  %s472_s19 = int_to_ptr.vmem [resolvable:$true] %s471_s19 }
  0x1b   : > { %s4697_s20 = smov 256   ;;  %502 = sbr.rel (%p4842_p10) target bundleno = 1497 (0x5d9), region = 84 }
  0x1c   : > { %s425_s26 = sshll.u32 %s6325_s4, 4  ;;  %s4698_s4 = smov 16   ;;  %s426_s26 = int_to_ptr.hbm [resolvable:$true] %s425_s26 }
  0x1d   : > { %4498 = dma.hbm_to_vmem [thread:$0]  (!%p4496_p12), %s426_s26, 12288, %s428_s29, [#allocation3], %s4694_s17, %s4694_s17, %s4695_s21  }
  0x1e   : > { %4501 = dma.hbm_to_vmem [thread:$0]  (!%p4496_p12), %s470_s27, 10496, %s472_s19, [#allocation6], %s4697_s20, %s4697_s20, %s4698_s4  }
  0x20   : > { %4666 = dma.done.wait (%p4506_p9), [#allocation3], 12288  }
  0x21   : > { %4668 = vsyncadd (%p4506_p9), [#allocation3], 4294955008 }
  0x22   : > { %4670 = dma.done.wait (%p4506_p9), [#allocation6], 10496  }
  0x23   : > { %4672 = vsyncadd (%p4506_p9), [#allocation6], 4294956800  ;;  %v618_v0 = vld [vmem:[%s6287_s5 + $0x168] sm:$0xff]  ;;  %v619_v2 = vld [vmem:[%s6287_s5 + $0x170] sm:$0xff]  ;;  %p562_p13 = scmp.lt.s32.totalorder %s4814_s25, 1  ;;  %s6326_s1 = sld [smem:[#allocation18_spill]] }
  0x24   : > { %v666_v1 = vld [vmem:[%s6287_s5 + $0x2e8] sm:$0xff]  ;;  %675 = vmatpush.msra.mxu0 %v618_v0  ;;  %v667_v3 = vld [vmem:[%s6287_s5 + $0x2f0] sm:$0xff]  ;;  %715 = vmatpush.msra.mxu2 %v619_v2  ;;  %v616_v6 = vld [vmem:[%s6287_s5 + $0x158] sm:$0xff]  ;;  %vm802_vm0 = vcmask 64512   ;;  %s4700_s18 = smov 127   ;;  %s4701_s26 = smov 126  }
  0x25   : > { %695 = vmatpush.msra.mxu1 %v666_v1  ;;  %v615_v4 = vld [vmem:[%s6287_s5 + $0x150] sm:$0xff]  ;;  %735 = vmatpush.msra.mxu3 %v667_v3  ;;  %v664_v7 = vld [vmem:[%s6287_s5 + $0x2d8] sm:$0xff]  ;;  %v613_v10 = vld [vmem:[%s6287_s5 + $0x140] sm:$0xff]  ;;  %s4954_s27 = scalar_select %p562_p13, %s4814_s25, 1  ;;  %vm900_vm1 = vcmask 523264   ;;  %vm1265_vm2 = vcmask 1043456  }
  0x26   : > { %v663_v5 = vld [vmem:[%s6287_s5 + $0x2d0] sm:$0xff]  ;;  %v612_v8 = vld [vmem:[%s6287_s5 + $0x138] sm:$0xff]  ;;  %676 = vmatpush.msra.mxu0 %v615_v4  ;;  %v661_v11 = vld [vmem:[%s6287_s5 + $0x2c0] sm:$0xff]  ;;  %716 = vmatpush.msra.mxu2 %v616_v6  ;;  %s4702_s29 = smov 110   ;;  %vm1261_vm3 = vcmask 31744   ;;  %s4703_s30 = smov 109  }
  0x27   : > { %696 = vmatpush.msra.mxu1 %v663_v5  ;;  %v660_v9 = vld [vmem:[%s6287_s5 + $0x2b8] sm:$0xff]  ;;  %736 = vmatpush.msra.mxu3 %v664_v7  ;;  %v609_v12 = vld [vmem:[%s6287_s5 + $0x120] sm:$0xff]  ;;  %v610_v14 = vld [vmem:[%s6287_s5 + $0x128] sm:$0xff]  ;;  %s4248_s28 = sshll.u32 %s4954_s27, 3  ;;  %vm1417_vm4 = vcmask 1039360   ;;  %s6311_s27 = smov 108  }
  0x28   : > { %v657_v13 = vld [vmem:[%s6287_s5 + $0x2a0] sm:$0xff]  ;;  %677 = vmatpush.msra.mxu0 %v612_v8  ;;  %v658_v15 = vld [vmem:[%s6287_s5 + $0x2a8] sm:$0xff]  ;;  %717 = vmatpush.msra.mxu2 %v613_v10  ;;  %v607_v18 = vld [vmem:[%s6287_s5 + $0x110] sm:$0xff]  ;;  %s6305_s17 = smov 90   ;;  %vm1579_vm5 = vcmask 1031168   ;;  %vm1741_vm6 = vcmask 900096  }
  0x29   : > { %697 = vmatpush.msra.mxu1 %v660_v9  ;;  %737 = vmatpush.msra.mxu3 %v661_v11  ;;  %v606_v16 = vld [vmem:[%s6287_s5 + $0x108] sm:$0xff]  ;;  %v655_v19 = vld [vmem:[%s6287_s5 + $0x290] sm:$0xff]  ;;  %v604_v22 = vld [vmem:[%s6287_s5 + $0xf8] sm:$0xff]  ;;  %s570_s21 = scalar_lea.vmem %s6326_s1, %s4248_s28  ;;  %s6307_s1 = smov 91   ;;  %vm1903_vm7 = vcmask 891904   ;;  %vm2065_vm8 = vcmask 883712  }
  0x2a   : > { %v654_v17 = vld [vmem:[%s6287_s5 + $0x288] sm:$0xff]  ;;  %678 = vmatpush.msra.mxu0 %v609_v12  ;;  %718 = vmatpush.msra.mxu2 %v610_v14  ;;  %v603_v20 = vld [vmem:[%s6287_s5 + $0xf0] sm:$0xff]  ;;  %v652_v23 = vld [vmem:[%s6287_s5 + $0x278] sm:$0xff]  ;;  %vm2227_vm9 = vcmask 752640   ;;  %vm2389_vm10 = vcmask 744448   ;;  %vm2551_vm11 = vcmask 736256  }
  0x2b   : > { %698 = vmatpush.msra.mxu1 %v657_v13  ;;  %738 = vmatpush.msra.mxu3 %v658_v15  ;;  %v651_v21 = vld [vmem:[%s6287_s5 + $0x270] sm:$0xff]  ;;  %v600_v24 = vld [vmem:[%s6287_s5 + $0xd8] sm:$0xff]  ;;  %v601_v26 = vld [vmem:[%s6287_s5 + $0xe0] sm:$0xff]  ;;  %vm2838_vm12 = vcmask 556032  }
  0x2c   : > { %679 = vmatpush.msra.mxu0 %v606_v16  ;;  %719 = vmatpush.msra.mxu2 %v607_v18  ;;  %v648_v25 = vld [vmem:[%s6287_s5 + $0x258] sm:$0xff]  ;;  %v649_v27 = vld [vmem:[%s6287_s5 + $0x260] sm:$0xff]  ;;  %v598_v30 = vld [vmem:[%s6287_s5 + $0xc8] sm:$0xff]  ;;  %v4699_v18 = vmov 0  }
  0x2d   : > { %699 = vmatpush.msra.mxu1 %v654_v17  ;;  %739 = vmatpush.msra.mxu3 %v655_v19  ;;  %v597_v28 = vld [vmem:[%s6287_s5 + $0xc0] sm:$0xff]  ;;  %v646_v31 = vld [vmem:[%s6287_s5 + $0x248] sm:$0xff]  ;;  %v595_v34 = vld [vmem:[%s6287_s5 + $0xb0] sm:$0xff] }
  0x2e   : > { %680 = vmatpush.msra.mxu0 %v603_v20  ;;  %720 = vmatpush.msra.mxu2 %v604_v22  ;;  %v645_v29 = vld [vmem:[%s6287_s5 + $0x240] sm:$0xff]  ;;  %v594_v32 = vld [vmem:[%s6287_s5 + $0xa8] sm:$0xff]  ;;  %v643_v35 = vld [vmem:[%s6287_s5 + $0x230] sm:$0xff] }
  0x2f   : > { %700 = vmatpush.msra.mxu1 %v651_v21  ;;  %740 = vmatpush.msra.mxu3 %v652_v23  ;;  %v642_v33 = vld [vmem:[%s6287_s5 + $0x228] sm:$0xff]  ;;  %v591_v36 = vld [vmem:[%s6287_s5 + $0x90] sm:$0xff]  ;;  %v592_v38 = vld [vmem:[%s6287_s5 + $0x98] sm:$0xff] }
  0x30   : > { %681 = vmatpush.msra.mxu0 %v600_v24  ;;  %721 = vmatpush.msra.mxu2 %v601_v26  ;;  %v639_v37 = vld [vmem:[%s6287_s5 + $0x210] sm:$0xff]  ;;  %v640_v39 = vld [vmem:[%s6287_s5 + $0x218] sm:$0xff]  ;;  %v589_v42 = vld [vmem:[%s6287_s5 + $0x80] sm:$0xff] }
  0x31   : > { %701 = vmatpush.msra.mxu1 %v648_v25  ;;  %741 = vmatpush.msra.mxu3 %v649_v27  ;;  %v588_v40 = vld [vmem:[%s6287_s5 + $0x78] sm:$0xff]  ;;  %v637_v43 = vld [vmem:[%s6287_s5 + $0x200] sm:$0xff]  ;;  %v586_v46 = vld [vmem:[%s6287_s5 + $0x68] sm:$0xff] }
  0x32   : > { %682 = vmatpush.msra.mxu0 %v597_v28  ;;  %722 = vmatpush.msra.mxu2 %v598_v30  ;;  %v636_v41 = vld [vmem:[%s6287_s5 + $0x1f8] sm:$0xff]  ;;  %v585_v44 = vld [vmem:[%s6287_s5 + $0x60] sm:$0xff]  ;;  %v634_v47 = vld [vmem:[%s6287_s5 + $0x1e8] sm:$0xff] }
  0x33   : > { %702 = vmatpush.msra.mxu1 %v645_v29  ;;  %742 = vmatpush.msra.mxu3 %v646_v31  ;;  %v633_v45 = vld [vmem:[%s6287_s5 + $0x1e0] sm:$0xff]  ;;  %v582_v49 = vld [vmem:[%s6287_s5 + $0x48] sm:$0xff]  ;;  %v583_v51 = vld [vmem:[%s6287_s5 + $0x50] sm:$0xff] }
  0x34   : > { %683 = vmatpush.msra.mxu0 %v594_v32  ;;  %723 = vmatpush.msra.mxu2 %v595_v34  ;;  %v572_v48 = vld [vmem:[%s570_s21] sm:$0xff]  ;;  %v630_v50 = vld [vmem:[%s6287_s5 + $0x1c8] sm:$0xff]  ;;  %v631_v52 = vld [vmem:[%s6287_s5 + $0x1d0] sm:$0xff]  ;;  %s6327_s21 = sld [smem:[#allocation17_spill]] }
  0x35   : > { %703 = vmatpush.msra.mxu1 %v642_v33  ;;  %743 = vmatpush.msra.mxu3 %v643_v35  ;;  %670 = vst [vmem:[#allocation1] ss:$2 sm:$0xff] %v572_v48  ;;  %v579_v53 = vld [vmem:[%s6287_s5 + $0x30] sm:$0xff]  ;;  %v580_v55 = vld [vmem:[%s6287_s5 + $0x38] sm:$0xff]  ;;  %v577_v59 = vld [vmem:[%s6287_s5 + $0x20] sm:$0xff] }
  0x36   : > { %684 = vmatpush.msra.mxu0 %v591_v36  ;;  %724 = vmatpush.msra.mxu2 %v592_v38  ;;  %v627_v54 = vld [vmem:[%s6287_s5 + $0x1b0] sm:$0xff]  ;;  %v628_v56 = vld [vmem:[%s6287_s5 + $0x1b8] sm:$0xff]  ;;  %v625_v60 = vld [vmem:[%s6287_s5 + $0x1a0] sm:$0xff] }
  0x37   : > { %704 = vmatpush.msra.mxu1 %v639_v37  ;;  %744 = vmatpush.msra.mxu3 %v640_v39  ;;  %v576_v57 = vld [vmem:[%s6287_s5 + $0x18] sm:$0xff]  ;;  %v573_v61 = vld [vmem:[%s6287_s5] sm:$0xff]  ;;  %v574_v63 = vld [vmem:[%s6287_s5 + $0x8] sm:$0xff] }
  0x38   : > { %685 = vmatpush.msra.mxu0 %v588_v40  ;;  %725 = vmatpush.msra.mxu2 %v589_v42  ;;  %v624_v58 = vld [vmem:[%s6287_s5 + $0x198] sm:$0xff]  ;;  %v621_v62 = vld [vmem:[%s6287_s5 + $0x180] sm:$0xff]  ;;  %v622_v0 = vld [vmem:[%s6287_s5 + $0x188] sm:$0xff] }
  0x39   : > { %705 = vmatpush.msra.mxu1 %v636_v41  ;;  %745 = vmatpush.msra.mxu3 %v637_v43  ;;  %v620_v3 = vld [vmem:[%s6287_s5 + $0x178] sm:$0xff]  ;;  %v617_v5 = vld [vmem:[%s6287_s5 + $0x160] sm:$0xff]  ;;  %v614_v7 = vld [vmem:[%s6287_s5 + $0x148] sm:$0xff] }
  0x3a   : > { %686 = vmatpush.msra.mxu0 %v585_v44  ;;  %726 = vmatpush.msra.mxu2 %v586_v46  ;;  %v668_v4 = vld [vmem:[%s6287_s5 + $0x2f8] sm:$0xff]  ;;  %v665_v6 = vld [vmem:[%s6287_s5 + $0x2e0] sm:$0xff]  ;;  %v662_v8 = vld [vmem:[%s6287_s5 + $0x2c8] sm:$0xff]  ;;  %s565_s23 = scalar_lea.vmem %s6327_s21, %s4248_s28  ;;  %s6309_s28 = smov 92  }
  0x3b   : > { %706 = vmatpush.msra.mxu1 %v633_v45  ;;  %746 = vmatpush.msra.mxu3 %v634_v47  ;;  %v611_v9 = vld [vmem:[%s6287_s5 + $0x130] sm:$0xff]  ;;  %v608_v11 = vld [vmem:[%s6287_s5 + $0x118] sm:$0xff]  ;;  %v605_v13 = vld [vmem:[%s6287_s5 + $0x100] sm:$0xff] }
  0x3c   : > { %687 = vmatpush.msra.mxu0 %v582_v49  ;;  %727 = vmatpush.msra.mxu2 %v583_v51  ;;  %v5070_v1 = vld.sshfl [vmem:[#allocation1] sm:$0xff pattern:$0x75316420]  ;;  %v5072_v2 = vld.sshfl [vmem:[#allocation1 + $0x8] sm:$0xff pattern:$0x75316420] }
  0x3d   : > { %707 = vmatpush.msra.mxu1 %v630_v50  ;;  %747 = vmatpush.msra.mxu3 %v631_v52  ;;  %v659_v10 = vld [vmem:[%s6287_s5 + $0x2b0] sm:$0xff]  ;;  %v656_v12 = vld [vmem:[%s6287_s5 + $0x298] sm:$0xff]  ;;  %v653_v14 = vld [vmem:[%s6287_s5 + $0x280] sm:$0xff] }
  0x3e   : > { %688 = vmatpush.msra.mxu0 %v579_v53  ;;  %728 = vmatpush.msra.mxu2 %v580_v55  ;;  %v795_v15 = vld [vmem:[%s6285_s3] sm:$0xf]  ;;  %v602_v16 = vld [vmem:[%s6287_s5 + $0xe8] sm:$0xff]  ;;  %v599_v19 = vld [vmem:[%s6287_s5 + $0xd0] sm:$0xff] }
  0x3f   : > { %708 = vmatpush.msra.mxu1 %v627_v54  ;;  %748 = vmatpush.msra.mxu3 %v628_v56  ;;  %v650_v17 = vld [vmem:[%s6287_s5 + $0x268] sm:$0xff]  ;;  %v647_v20 = vld [vmem:[%s6287_s5 + $0x250] sm:$0xff]  ;;  %v596_v21 = vld [vmem:[%s6287_s5 + $0xb8] sm:$0xff] }
  0x40   : > { %689 = vmatpush.msra.mxu0 %v576_v57  ;;  %729 = vmatpush.msra.mxu2 %v577_v59  ;;  %v644_v22 = vld [vmem:[%s6287_s5 + $0x238] sm:$0xff]  ;;  %v593_v23 = vld [vmem:[%s6287_s5 + $0xa0] sm:$0xff]  ;;  %v590_v25 = vld [vmem:[%s6287_s5 + $0x88] sm:$0xff] }
  0x41   : > { %709 = vmatpush.msra.mxu1 %v624_v58  ;;  %749 = vmatpush.msra.mxu3 %v625_v60  ;;  %v641_v24 = vld [vmem:[%s6287_s5 + $0x220] sm:$0xff]  ;;  %v638_v26 = vld [vmem:[%s6287_s5 + $0x208] sm:$0xff]  ;;  %v587_v27 = vld [vmem:[%s6287_s5 + $0x70] sm:$0xff] }
  0x42   : > { %690 = vmatpush.msra.mxu0 %v573_v61  ;;  %730 = vmatpush.msra.mxu2 %v574_v63  ;;  %v635_v28 = vld [vmem:[%s6287_s5 + $0x1f0] sm:$0xff]  ;;  %v584_v29 = vld [vmem:[%s6287_s5 + $0x58] sm:$0xff]  ;;  %v581_v31 = vld [vmem:[%s6287_s5 + $0x40] sm:$0xff] }
  0x43   : > { %710 = vmatpush.msra.mxu1 %v621_v62  ;;  %750 = vmatpush.msra.mxu3 %v622_v0  ;;  %v632_v30 = vld [vmem:[%s6287_s5 + $0x1d8] sm:$0xff]  ;;  %v629_v32 = vld [vmem:[%s6287_s5 + $0x1c0] sm:$0xff]  ;;  %v578_v33 = vld [vmem:[%s6287_s5 + $0x28] sm:$0xff] }
  0x44   : > { %731 = vmatmul.f32.vlgmr.msra.gmra.mxu2 %v5070_v1  ;;  %751 = vmatmul.f32.vlgmr.msra.gmra.mxu3 %v5072_v2  ;;  %v626_v34 = vld [vmem:[%s6287_s5 + $0x1a8] sm:$0xff]  ;;  %v575_v35 = vld [vmem:[%s6287_s5 + $0x10] sm:$0xff]  ;;  %v5182_v37 = vld [vmem:[%s565_s23] sm:$0xff] }
  0x45   : > { %755 = vmatpush.msrb.mxu0 %v620_v3  ;;  %775 = vmatpush.msrb.mxu1 %v668_v4  ;;  %v623_v36 = vld [vmem:[%s6287_s5 + $0x190] sm:$0xff]  ;;  %v796_v38 = vld [vmem:[%s6284_s2] sm:$0xf]  ;;  %v4252_v39 = vld [vmem:[%s6284_s2 + $0x4] sm:$0xf] }
  0x46   : > { %691 = vmatmul.f32.vlgmr.msra.gmra.mxu0 %v5070_v1  ;;  %711 = vmatmul.f32.vlgmr.msra.gmra.mxu1 %v5072_v2  ;;  %v897_v40 = vld [vmem:[#allocation2 + $0x168] sm:$0xff]  ;;  %v898_v41 = vld [vmem:[#allocation2 + $0x170] sm:$0xff]  ;;  %v895_v43 = vld [vmem:[#allocation2 + $0x158] sm:$0xff] }
  0x47   : > { %756 = vmatpush.msrb.mxu0 %v617_v5  ;;  %776 = vmatpush.msrb.mxu1 %v665_v6  ;;  %v894_v42 = vld [vmem:[#allocation2 + $0x150] sm:$0xff]  ;;  %v891_v44 = vld [vmem:[#allocation2 + $0x138] sm:$0xff]  ;;  %v892_v45 = vld [vmem:[#allocation2 + $0x140] sm:$0xff] }
  0x48   : > { %4558 = vset.pattern.permute.xlu0 %v4699_v18  ;;  %4559 = vset.pattern.permute.xlu1 %v4699_v18  ;;  %v888_v46 = vld [vmem:[#allocation2 + $0x120] sm:$0xff]  ;;  %v889_v47 = vld [vmem:[#allocation2 + $0x128] sm:$0xff]  ;;  %v848_v48 = vld [vmem:[#allocation2 + $0xb0] sm:$0xff] }
  0x49   : > { %757 = vmatpush.msrb.mxu0 %v614_v7  ;;  %777 = vmatpush.msrb.mxu1 %v662_v8  ;;  %v849_v49 = vld [vmem:[#allocation2 + $0xb8] sm:$0xff]  ;;  %v846_v51 = vld [vmem:[#allocation2 + $0xa0] sm:$0xff]  ;;  %v885_v52 = vld [vmem:[#allocation2 + $0x108] sm:$0xff] }
  0x4a   : > { %799 = vperm.xlu0 %4558, %v795_v15   ;;  %4560 = vset.pattern.permute.xlu2 %v4699_v18  ;;  %v845_v50 = vld [vmem:[#allocation2 + $0x98] sm:$0xff]  ;;  %v886_v53 = vld [vmem:[#allocation2 + $0x110] sm:$0xff]  ;;  %v842_v56 = vld [vmem:[#allocation2 + $0x80] sm:$0xff] }
  0x4b   : > { %758 = vmatpush.msrb.mxu0 %v611_v9  ;;  %778 = vmatpush.msrb.mxu1 %v659_v10  ;;  %v882_v54 = vld [vmem:[#allocation2 + $0xf0] sm:$0xff]  ;;  %v883_v55 = vld [vmem:[#allocation2 + $0xf8] sm:$0xff]  ;;  %v843_v57 = vld [vmem:[#allocation2 + $0x88] sm:$0xff] }
  0x4c   : > { %912 = vmatpush.msrb.mxu2 %v897_v40  ;;  %932 = vmatpush.msrb.mxu3 %v898_v41  ;;  %v879_v58 = vld [vmem:[#allocation2 + $0xd8] sm:$0xff]  ;;  %v880_v59 = vld [vmem:[#allocation2 + $0xe0] sm:$0xff]  ;;  %v839_v60 = vld [vmem:[#allocation2 + $0x68] sm:$0xff] }
  0x4d   : > { %759 = vmatpush.msrb.mxu0 %v608_v11  ;;  %779 = vmatpush.msrb.mxu1 %v656_v12  ;;  %v840_v61 = vld [vmem:[#allocation2 + $0x70] sm:$0xff]  ;;  %v876_v62 = vld [vmem:[#allocation2 + $0xc0] sm:$0xff]  ;;  %v899_v3 = vld [vmem:[#allocation2 + $0x178] sm:$0xff] }
  0x4e   : > { %913 = vmatpush.msrb.mxu2 %v894_v42  ;;  %933 = vmatpush.msrb.mxu3 %v895_v43  ;;  %v847_v4 = vld [vmem:[#allocation2 + $0xa8] sm:$0xff]  ;;  %v836_v5 = vld [vmem:[#allocation2 + $0x50] sm:$0xff]  ;;  %v837_v6 = vld [vmem:[#allocation2 + $0x58] sm:$0xff] }
  0x4f   : > { %760 = vmatpush.msrb.mxu0 %v605_v13  ;;  %780 = vmatpush.msrb.mxu1 %v653_v14  ;;  %v896_v7 = vld [vmem:[#allocation2 + $0x160] sm:$0xff]  ;;  %v844_v8 = vld [vmem:[#allocation2 + $0x90] sm:$0xff]  ;;  %v833_v9 = vld [vmem:[#allocation2 + $0x38] sm:$0xff] }
  0x50   : > { %914 = vmatpush.msrb.mxu2 %v891_v44  ;;  %934 = vmatpush.msrb.mxu3 %v892_v45  ;;  %v834_v10 = vld [vmem:[#allocation2 + $0x40] sm:$0xff]  ;;  %v893_v14 = vld [vmem:[#allocation2 + $0x148] sm:$0xff]  ;;  %v841_v15 = vld [vmem:[#allocation2 + $0x78] sm:$0xff] }
  0x51   : > { %761 = vmatpush.msrb.mxu0 %v602_v16  ;;  %781 = vmatpush.msrb.mxu1 %v650_v17  ;;  %v830_v16 = vld [vmem:[#allocation2 + $0x20] sm:$0xff]  ;;  %v831_v17 = vld [vmem:[#allocation2 + $0x28] sm:$0xff]  ;;  %v890_v18 = vld [vmem:[#allocation2 + $0x130] sm:$0xff] }
  0x52   : > { %915 = vmatpush.msrb.mxu2 %v888_v46  ;;  %935 = vmatpush.msrb.mxu3 %v889_v47  ;;  %v4265_v40 = vld [vmem:[%s6284_s2 + $0xc] sm:$0xf]  ;;  %v1074_v41 = vld [vmem:[#allocation2 + $0x228] sm:$0xff]  ;;  %v1075_v42 = vld [vmem:[#allocation2 + $0x230] sm:$0xff] }
  0x53   : > { %762 = vmatpush.msrb.mxu0 %v599_v19  ;;  %782 = vmatpush.msrb.mxu1 %v647_v20  ;;  %v838_v19 = vld [vmem:[#allocation2 + $0x60] sm:$0xff]  ;;  %v827_v20 = vld [vmem:[#allocation2 + $0x8] sm:$0xff]  ;;  %v1071_v43 = vld [vmem:[#allocation2 + $0x210] sm:$0xff] }
  0x54   : > { %916 = vmatpush.msrb.mxu2 %v885_v52  ;;  %936 = vmatpush.msrb.mxu3 %v886_v53  ;;  %v1072_v44 = vld [vmem:[#allocation2 + $0x218] sm:$0xff]  ;;  %v1065_v46 = vld [vmem:[#allocation2 + $0x1e0] sm:$0xff]  ;;  %v1066_v47 = vld [vmem:[#allocation2 + $0x1e8] sm:$0xff] }
  0x55   : > { %763 = vmatpush.msrb.mxu0 %v596_v21  ;;  %783 = vmatpush.msrb.mxu1 %v644_v22  ;;  %v828_v21 = vld [vmem:[#allocation2 + $0x10] sm:$0xff]  ;;  %v887_v22 = vld [vmem:[#allocation2 + $0x118] sm:$0xff]  ;;  %v1057_v53 = vld [vmem:[#allocation2 + $0x1a0] sm:$0xff] }
  0x56   : > { %917 = vmatpush.msrb.mxu2 %v882_v54  ;;  %937 = vmatpush.msrb.mxu3 %v883_v55  ;;  %v1068_v45 = vld [vmem:[#allocation2 + $0x1f8] sm:$0xff]  ;;  %v1053_v54 = vld [vmem:[#allocation2 + $0x180] sm:$0xff]  ;;  %v1054_v55 = vld [vmem:[#allocation2 + $0x188] sm:$0xff] }
  0x57   : > { %764 = vmatpush.msrb.mxu0 %v593_v23  ;;  %784 = vmatpush.msrb.mxu1 %v641_v24  ;;  %v835_v23 = vld [vmem:[#allocation2 + $0x48] sm:$0xff]  ;;  %v884_v24 = vld [vmem:[#allocation2 + $0x100] sm:$0xff]  ;;  %v1056_v52 = vld [vmem:[#allocation2 + $0x198] sm:$0xff] }
  0x58   : > { %918 = vmatpush.msrb.mxu2 %v879_v58  ;;  %938 = vmatpush.msrb.mxu3 %v880_v59  ;;  %v1192_v58 = vld [vmem:[#allocation2 + $0x2f8] sm:$0xff]  ;;  %v1073_v59 = vld [vmem:[#allocation2 + $0x220] sm:$0xff] }
  0x59   : > { %765 = vmatpush.msrb.mxu0 %v590_v25  ;;  %785 = vmatpush.msrb.mxu1 %v638_v26  ;;  %v832_v25 = vld [vmem:[#allocation2 + $0x30] sm:$0xff]  ;;  %v881_v26 = vld [vmem:[#allocation2 + $0xe8] sm:$0xff] }
  0x5a   : > { %919 = vmatpush.msrb.mxu2 %v876_v62  ;;  %v1070_v62 = vld [vmem:[#allocation2 + $0x208] sm:$0xff] }
  0x5b   : > { %766 = vmatpush.msrb.mxu0 %v587_v27  ;;  %786 = vmatpush.msrb.mxu1 %v635_v28  ;;  %v829_v27 = vld [vmem:[#allocation2 + $0x18] sm:$0xff]  ;;  %v878_v28 = vld [vmem:[#allocation2 + $0xd0] sm:$0xff] }
  0x5c   : > { %952 = vmatpush.msra.mxu2 %v899_v3  ;;  %v1182_v3 = vld [vmem:[#allocation2 + $0x2a8] sm:$0xff] }
  0x5d   : > { %767 = vmatpush.msrb.mxu0 %v584_v29  ;;  %787 = vmatpush.msrb.mxu1 %v632_v30  ;;  %v826_v29 = vld [vmem:[#allocation2] sm:$0xff] }
  0x5e   : > { %953 = vmatpush.msra.mxu2 %v896_v7  ;;  %v1179_v7 = vld [vmem:[#allocation2 + $0x290] sm:$0xff] }
  0x5f   : > { %768 = vmatpush.msrb.mxu0 %v581_v31  ;;  %788 = vmatpush.msrb.mxu1 %v629_v32 }
  0x60   : > { %954 = vmatpush.msra.mxu2 %v893_v14  ;;  %v1058_v14 = vld [vmem:[#allocation2 + $0x1a8] sm:$0xff] }
  0x61   : > { %769 = vmatpush.msrb.mxu0 %v578_v33  ;;  %789 = vmatpush.msrb.mxu1 %v626_v34 }
  0x62   : > { %955 = vmatpush.msra.mxu2 %v890_v18  ;;  %v1055_v18 = vld [vmem:[#allocation2 + $0x190] sm:$0xff] }
  0x63   : > { %770 = vmatpush.msrb.mxu0 %v575_v35  ;;  %790 = vmatpush.msrb.mxu1 %v623_v36 }
  0x64   : > { %771 = vmatmul.f32.vlgmr.msrb.gmra.mxu0 %v5070_v1  ;;  %791 = vmatmul.f32.vlgmr.msrb.gmra.mxu1 %v5072_v2  ;;  %v877_v1 = vld [vmem:[#allocation2 + $0xc8] sm:$0xff] }
  0x65   : > { %821 = vmatpush.msra.mxu0 %v5182_v37  ;;  %870 = vmatpush.msra.mxu1 %v5182_v37 }
  0x66   : > { %939 = vmatpush.msrb.mxu3 %v877_v1  ;;  %956 = vmatpush.msra.mxu2 %v887_v22  ;;  %v1067_v1 = vld [vmem:[#allocation2 + $0x1f0] sm:$0xff]  ;;  %v1178_v22 = vld [vmem:[#allocation2 + $0x288] sm:$0xff] }
  0x67   : > { %995 = vmatpush.msrb.mxu0 %v848_v48  ;;  %1015 = vmatpush.msrb.mxu1 %v849_v49  ;;  %v1062_v48 = vld [vmem:[#allocation2 + $0x1c8] sm:$0xff]  ;;  %v1063_v49 = vld [vmem:[#allocation2 + $0x1d0] sm:$0xff] }
  0x68   : > { %975 = vmatpush.msra.mxu3 %v847_v4  ;;  %957 = vmatpush.msra.mxu2 %v884_v24  ;;  %v1183_v4 = vld [vmem:[#allocation2 + $0x2b0] sm:$0xff]  ;;  %v1172_v24 = vld [vmem:[#allocation2 + $0x258] sm:$0xff] }
  0x69   : > { %996 = vmatpush.msrb.mxu0 %v845_v50  ;;  %1016 = vmatpush.msrb.mxu1 %v846_v51  ;;  %v1059_v50 = vld [vmem:[#allocation2 + $0x1b0] sm:$0xff]  ;;  %v1060_v51 = vld [vmem:[#allocation2 + $0x1b8] sm:$0xff] }
  0x6a   : > { %976 = vmatpush.msra.mxu3 %v844_v8  ;;  %958 = vmatpush.msra.mxu2 %v881_v26  ;;  %v1180_v8 = vld [vmem:[#allocation2 + $0x298] sm:$0xff] }
  0x6b   : > { %997 = vmatpush.msrb.mxu0 %v842_v56  ;;  %1017 = vmatpush.msrb.mxu1 %v843_v57  ;;  %v1076_v56 = vld [vmem:[#allocation2 + $0x238] sm:$0xff]  ;;  %v1191_v57 = vld [vmem:[#allocation2 + $0x2f0] sm:$0xff] }
  0x6c   : > { %4251 = vmatmul.msk.f32.vlgmr.msra.gmra.mxu0 %vm802_vm0, %v796_v38  ;;  %4253 = vmatmul.msk.f32.vlgmr.msra.gmra.mxu1 %vm802_vm0, %v4252_v39  ;;  %v4260_v39 = vld [vmem:[%s6284_s2 + $0x8] sm:$0xf] }
  0x6d   : > { %998 = vmatpush.msrb.mxu0 %v839_v60  ;;  %1018 = vmatpush.msrb.mxu1 %v840_v61  ;;  %v1188_v60 = vld [vmem:[#allocation2 + $0x2d8] sm:$0xff]  ;;  %v1189_v61 = vld [vmem:[#allocation2 + $0x2e0] sm:$0xff] }
  0x6e   : > { %977 = vmatpush.msra.mxu3 %v841_v15  ;;  %959 = vmatpush.msra.mxu2 %v878_v28  ;;  %v1184_v15 = vld [vmem:[#allocation2 + $0x2b8] sm:$0xff] }
  0x6f   : > { %999 = vmatpush.msrb.mxu0 %v836_v5  ;;  %1019 = vmatpush.msrb.mxu1 %v837_v6  ;;  %v1064_v5 = vld [vmem:[#allocation2 + $0x1d8] sm:$0xff]  ;;  %v1190_v6 = vld [vmem:[#allocation2 + $0x2e8] sm:$0xff] }
  0x70   : > { %978 = vmatpush.msra.mxu3 %v838_v19  ;;  %v1181_v19 = vld [vmem:[#allocation2 + $0x2a0] sm:$0xff] }
  0x71   : > { %1000 = vmatpush.msrb.mxu0 %v833_v9  ;;  %1020 = vmatpush.msrb.mxu1 %v834_v10  ;;  %v1187_v9 = vld [vmem:[#allocation2 + $0x2d0] sm:$0xff]  ;;  %v1061_v10 = vld [vmem:[#allocation2 + $0x1c0] sm:$0xff] }
  0x72   : > { %979 = vmatpush.msra.mxu3 %v835_v23  ;;  %v1175_v23 = vld [vmem:[#allocation2 + $0x270] sm:$0xff] }
  0x73   : > { %1001 = vmatpush.msrb.mxu0 %v830_v16  ;;  %1021 = vmatpush.msrb.mxu1 %v831_v17  ;;  %v1173_v16 = vld [vmem:[#allocation2 + $0x260] sm:$0xff]  ;;  %v1174_v17 = vld [vmem:[#allocation2 + $0x268] sm:$0xff] }
  0x74   : > { %980 = vmatpush.msra.mxu3 %v832_v25  ;;  %v1169_v25 = vld [vmem:[#allocation2 + $0x240] sm:$0xff] }
  0x75   : > { %1002 = vmatpush.msrb.mxu0 %v827_v20  ;;  %1022 = vmatpush.msrb.mxu1 %v828_v21  ;;  %v1170_v20 = vld [vmem:[#allocation2 + $0x248] sm:$0xff]  ;;  %v1171_v21 = vld [vmem:[#allocation2 + $0x250] sm:$0xff] }
  0x76   : > { %981 = vmatpush.msra.mxu3 %v829_v27 }
  0x77   : > { %1108 = vmatpush.msra.mxu0 %v1075_v42  ;;  %1128 = vmatpush.msra.mxu1 %v1076_v56 }
  0x78   : > { %982 = vmatpush.msra.mxu3 %v826_v29 }
  0x79   : > { %1109 = vmatpush.msra.mxu0 %v1072_v44  ;;  %1129 = vmatpush.msra.mxu1 %v1073_v59 }
  0x7b   : > { %1130 = vmatpush.msra.mxu1 %v1070_v62 }
  0x7d   : > { %1131 = vmatpush.msra.mxu1 %v1067_v1 }
  0x7f   : > { %1132 = vmatpush.msra.mxu1 %v1064_v5 }
  0x81   : > { %1133 = vmatpush.msra.mxu1 %v1061_v10 }
  0x83   : > { %1134 = vmatpush.msra.mxu1 %v1058_v14  ;;  %v4296_v14 = vld [vmem:[%s6288_s6 + $0x8] sm:$0xf] }
  0x85   : > { %1135 = vmatpush.msra.mxu1 %v1055_v18 }
  0xbc   : > { %v5218_v33 = vpop.permute.xlu0 %799 }
  0xc3   : > { %v692_v63 = vpop.f32.mrf.mxu0  ;;  %v712_v0 = vpop.f32.mrf.mxu1 }
  0xc4   : > { %v5196_v2 = vadd.f32 %v712_v0, %v692_v63  ;;  %v1185_v63 = vld [vmem:[#allocation2 + $0x2c0] sm:$0xff]  ;;  %v1186_v0 = vld [vmem:[#allocation2 + $0x2c8] sm:$0xff] }
  0xc6   : > { %1489 = vrot.lane.b32.xlu2 %v5196_v2, %s4700_s18  ;;  %1651 = vrot.lane.b32.xlu1 %v5196_v2, %s4701_s26 }
  0xc7   : > { %v732_v11 = vpop.f32.mrf.mxu2  ;;  %v752_v12 = vpop.f32.mrf.mxu3 }
  0xc8   : > { %v5202_v13 = vadd.f32 %v752_v12, %v732_v11  ;;  %v1176_v11 = vld [vmem:[#allocation2 + $0x278] sm:$0xff]  ;;  %v1177_v12 = vld [vmem:[#allocation2 + $0x280] sm:$0xff] }
  0xca   : > { %1491 = vrot.lane.b32.xlu0 %v5202_v13, %s4700_s18 }
  0xce   : > { %1813 = vrot.lane.b32.xlu2 %v5196_v2, %s4702_s29 }
  0xd2   : > { %1815 = vrot.lane.b32.xlu0 %v5202_v13, %s4702_s29 }
  0xd6   : > { %1653 = vrot.lane.b32.xlu2 %v5202_v13, %s4701_s26 }
  0xe1   : > { %v772_v30 = vpop.f32.mrf.mxu0  ;;  %v792_v31 = vpop.f32.mrf.mxu1 }
  0xe2   : > { %v5212_v32 = vadd.f32 %v792_v31, %v772_v30 }
  0xe4   : > { %1817 = vrot.lane.b32.xlu1 %v5212_v32, %s4702_s29  ;;  %1493 = vrot.lane.b32.xlu2 %v5212_v32, %s4700_s18 }
  0xe9   : > { %v823_v34 = vpop.f32.mrf.mxu0  ;;  %v872_v35 = vpop.f32.mrf.mxu1 }
  0xea   : > { %v824_v36 = vadd.f32 %v823_v34, %v5218_v33  ;;  %v873_v38 = vadd.f32 %v872_v35, %v5218_v33 }
  0xec   : > { %1655 = vrot.lane.b32.xlu2 %v5212_v32, %s4701_s26  ;;  %4254 = vmatmul.msk.f32.vlgmr.msrb.gmra.mxu2 %vm900_vm1, %v873_v38 }
  0xed   : > { %4255 = vmatmul.msk.f32.vlgmr.msrb.gmra.mxu3 %vm900_vm1, %v873_v38  ;;  %4258 = vmatmul.msk.f32.vlgmr.msrb.gmra.mxu0 %vm900_vm1, %v824_v36 }
  0xee   : > { %4259 = vmatmul.msk.f32.vlgmr.msrb.gmra.mxu1 %vm900_vm1, %v824_v36  ;;  %1047 = vmatpush.msrb.mxu2 %v5182_v37 }
  0xef   : > { %1088 = vmatpush.msrb.mxu3 %v1074_v41 }
  0xf1   : > { %1089 = vmatpush.msrb.mxu3 %v1071_v43 }
  0xf3   : > { %1090 = vmatpush.msrb.mxu3 %v1068_v45 }
  0xf4   : > { %4256 = vmatmul.msk.f32.vlgmr.msra.gmra.mxu2 %vm900_vm1, %v873_v38 }
  0xf5   : > { %4257 = vmatmul.msk.f32.vlgmr.msra.gmra.mxu3 %vm900_vm1, %v824_v36  ;;  %1163 = vmatpush.msra.mxu2 %v5182_v37  ;;  %v1069_v37 = vld [vmem:[#allocation2 + $0x200] sm:$0xff] }
  0xf6   : > { %1110 = vmatpush.msra.mxu0 %v1069_v37  ;;  %1091 = vmatpush.msrb.mxu3 %v1065_v46 }
  0xf8   : > { %1111 = vmatpush.msra.mxu0 %v1066_v47  ;;  %1092 = vmatpush.msrb.mxu3 %v1062_v48  ;;  %v1260_v48 = vld [vmem:[%s6289_s7] sm:$0xf] }
  0xfa   : > { %1112 = vmatpush.msra.mxu0 %v1063_v49  ;;  %1093 = vmatpush.msrb.mxu3 %v1059_v50 }
  0xfc   : > { %4261 = vmatmul.msk.f32.vlgmr.msrb.gmra.mxu2 %vm802_vm0, %v4260_v39  ;;  %1113 = vmatpush.msra.mxu0 %v1060_v51 }
  0xfd   : > { %1094 = vmatpush.msrb.mxu3 %v1056_v52  ;;  %1204 = vmatpush.msrb.mxu2 %v1190_v6 }
  0xfe   : > { %1114 = vmatpush.msra.mxu0 %v1057_v53 }
  0xff   : > { %1095 = vmatpush.msrb.mxu3 %v1053_v54  ;;  %1205 = vmatpush.msrb.mxu2 %v1187_v9 }
 0x100   : > { %1115 = vmatpush.msra.mxu0 %v1054_v55 }
 0x101   : > { %1224 = vmatpush.msra.mxu3 %v1191_v57  ;;  %1206 = vmatpush.msrb.mxu2 %v1184_v15  ;;  %v1259_v57 = vld [vmem:[%s6288_s6] sm:$0xf] }
 0x102   : > { %1244 = vmatpush.msrb.mxu0 %v1192_v58 }
 0x103   : > { %1225 = vmatpush.msra.mxu3 %v1188_v60  ;;  %1207 = vmatpush.msrb.mxu2 %v1181_v19  ;;  %v4311_v19 = vld [vmem:[%s6289_s7 + $0xc] sm:$0xf] }
 0x104   : > { %4266 = vmatmul.msk.f32.vlgmr.msra.gmra.mxu2 %vm802_vm0, %v4265_v40  ;;  %1245 = vmatpush.msrb.mxu0 %v1189_v61  ;;  %v4282_v61 = vld [vmem:[%s6288_s6 + $0x4] sm:$0xf] }
 0x105   : > { %1226 = vmatpush.msra.mxu3 %v1185_v63  ;;  %1208 = vmatpush.msrb.mxu2 %v1178_v22 }
 0x106   : > { %1246 = vmatpush.msrb.mxu0 %v1186_v0 }
 0x107   : > { %1227 = vmatpush.msra.mxu3 %v1182_v3  ;;  %1209 = vmatpush.msrb.mxu2 %v1175_v23 }
 0x108   : > { %1247 = vmatpush.msrb.mxu0 %v1183_v4 }
 0x109   : > { %1228 = vmatpush.msra.mxu3 %v1179_v7  ;;  %1210 = vmatpush.msrb.mxu2 %v1172_v24 }
 0x10a   : > { %1248 = vmatpush.msrb.mxu0 %v1180_v8 }
 0x10b   : > { %1229 = vmatpush.msra.mxu3 %v1176_v11  ;;  %1211 = vmatpush.msrb.mxu2 %v1169_v25 }
 0x10c   : > { %1249 = vmatpush.msrb.mxu0 %v1177_v12 }
 0x10d   : > { %1230 = vmatpush.msra.mxu3 %v1173_v16 }
 0x10e   : > { %1250 = vmatpush.msrb.mxu0 %v1174_v17 }
 0x10f   : > { %1231 = vmatpush.msra.mxu3 %v1170_v20 }
 0x110   : > { %1251 = vmatpush.msrb.mxu0 %v1171_v21  ;;  %v4297_v21 = vld [vmem:[%s6289_s7 + $0x8] sm:$0xf] }
 0x120   : > { %v1490_v54 = vpop.permute.xlu2 %1489 }
 0x128   : > { %v5314_v56 = vpop.permute.xlu2 %1813 }
 0x130   : > { %v5330_v58 = vpop.permute.xlu2 %1653 }
 0x138   : > { %v1652_v60 = vpop.permute.xlu1 %1651 }
 0x13c   : > { %v5274_v53 = vpop.permute.xlu0 %1491 }
 0x13d   : > { %v1495_v55 = vsel %vm1417_vm4, %v1490_v54, %v5274_v53 }
 0x13e   : > { %v1494_v59 = vpop.permute.xlu2 %1493 }
 0x13f   : > { %v1496_v11 = vsel %vm1417_vm4, %v5274_v53, %v1494_v59 }
 0x146   : > { %v1656_v62 = vpop.permute.xlu2 %1655 }
 0x156   : > { %v5345_v63 = vpop.permute.xlu1 %1817 }
 0x16a   : > { %v1004_v35 = vpop.f32.mrf.mxu0 }
 0x16b   : > { %v1024_v36 = vpop.f32.mrf.mxu1 }
 0x16f   : > { %v921_v26 = vpop.f32.mrf.mxu2 }
 0x170   : > { %v941_v34 = vpop.f32.mrf.mxu3 }
 0x171   : > { %v1005_v37 = vadd.f32 %v1004_v35, %v941_v34 }
 0x177   : > { %v961_v27 = vpop.f32.mrf.mxu2 }
 0x178   : > { %v984_v38 = vpop.f32.mrf.mxu3  ;;  %v1025_v41 = vadd.f32 %v1024_v36, %v961_v27 }
 0x17f   : > { %v1049_v28 = vpop.f32.mrf.mxu2 }
 0x180   : > { %v1050_v29 = vadd.f32 %v1049_v28, %v5218_v33 }
 0x182   : > { %4262 = vmatmul.msk.f32.vlgmr.msrb.gmra.mxu3 %vm900_vm1, %v1050_v29  ;;  %4263 = vmatmul.msk.f32.vlgmr.msra.gmra.mxu0 %vm900_vm1, %v1050_v29 }
 0x183   : > { %4264 = vmatmul.msk.f32.vlgmr.msra.gmra.mxu1 %vm900_vm1, %v1050_v29  ;;  %4276 = vmatpush.msk.msrb.mxu3 %vm1265_vm2, %v5196_v2 }
 0x184   : > { %4278 = vmatpush.msk.msra.mxu0 %vm1265_vm2, %v5202_v13 }
 0x187   : > { %v1165_v30 = vpop.f32.mrf.mxu2 }
 0x188   : > { %v1166_v31 = vadd.f32 %v1165_v30, %v5218_v33  ;;  %v985_v33 = vadd.f32 %v984_v38, %v921_v26  ;;  %v1658_v26 = vsel %vm1579_vm5, %v5330_v58, %v1656_v62  ;;  %v4310_v30 = vld [vmem:[%s6288_s6 + $0xc] sm:$0xf]  ;;  %v4324_v38 = vld [vmem:[%s6288_s6 + $0x10] sm:$0xf] }
 0x18a   : > { %4267 = vmatmul.msk.f32.vlgmr.msrb.gmra.mxu2 %vm900_vm1, %v1166_v31  ;;  %4268 = vmatmul.msk.f32.vlgmr.msra.gmra.mxu3 %vm900_vm1, %v1166_v31 }
 0x18b   : > { %4269 = vmatmul.msk.f32.vlgmr.msrb.gmra.mxu0 %vm900_vm1, %v1166_v31 }
 0x192   : > { %4277 = vmatmul.msk.f32.vlgmr.msrb.gmra.mxu3 %vm1261_vm3, %v1259_v57 }
 0x193   : > { %4279 = vmatmul.msk.f32.vlgmr.msra.gmra.mxu0 %vm1261_vm3, %v1259_v57 }
 0x1ff   : > { %v1117_v39 = vpop.f32.mrf.mxu0 }
 0x200   : > { %v1137_v40 = vpop.f32.mrf.mxu1  ;;  %v1141_v46 = vadd.f32 %v1117_v39, %v1005_v37 }
 0x201   : > { %v1142_v43 = vadd.f32 %v1137_v40, %v1025_v41 }
 0x205   : > { %v1097_v42 = vpop.f32.mrf.mxu3 }
 0x206   : > { %v1140_v47 = vadd.f32 %v1097_v42, %v985_v33  ;;  %v4339_v42 = vld [vmem:[%s6289_s7 + $0x14] sm:$0xf] }
 0x208   : > { %v1253_v44 = vpop.f32.mrf.mxu0 }
 0x209   : > { %v5252_v45 = vadd.f32 %v1253_v44, %v1142_v43 }
 0x20b   : > { %1577 = vrot.lane.b32.xlu2 %v5252_v45, %s4701_s26  ;;  %1415 = vrot.lane.b32.xlu1 %v5252_v45, %s4700_s18 }
 0x20c   : > { %4274 = vmatpush.msk.msra.mxu2 %vm1265_vm2, %v5252_v45 }
 0x20d   : > { %v1213_v49 = vpop.f32.mrf.mxu2  ;;  %v1233_v50 = vpop.f32.mrf.mxu3  ;;  %4275 = vmatmul.msk.f32.vlgmr.msra.gmra.mxu2 %vm1261_vm3, %v1260_v48 }
 0x20e   : > { %v1256_v51 = vadd.f32 %v1213_v49, %v1140_v47  ;;  %v1257_v52 = vadd.f32 %v1233_v50, %v1141_v46  ;;  %v4338_v50 = vld [vmem:[%s6288_s6 + $0x14] sm:$0xf] }
 0x210   : > { %1413 = vrot.lane.b32.xlu0 %v1257_v52, %s4700_s18  ;;  %4270 = vmatpush.msk.msrb.mxu1 %vm1265_vm2, %v1256_v51 }
 0x211   : > { %4271 = vmatmul.msk.f32.vlgmr.msrb.gmra.mxu1 %vm1261_vm3, %v1260_v48 }
 0x212   : > { %4272 = vmatpush.msk.msra.mxu1 %vm1265_vm2, %v1257_v52 }
 0x213   : > { %1977 = vrot.lane.b32.xlu2 %v5202_v13, %s4703_s30  ;;  %1739 = vrot.lane.b32.xlu1 %v5252_v45, %s4702_s29 }
 0x214   : > { %4280 = vmatpush.msk.msrb.mxu1 %vm1265_vm2, %v5212_v32 }
 0x218   : > { %1573 = vrot.lane.b32.xlu0 %v1256_v51, %s4701_s26 }
 0x219   : > { %4273 = vmatmul.msk.f32.vlgmr.msra.gmra.mxu1 %vm1261_vm3, %v1260_v48 }
 0x21a   : > { %4290 = vmatpush.msk.msra.mxu1 %vm1265_vm2, %v1495_v55 }
 0x21b   : > { %1901 = vrot.lane.b32.xlu2 %v5252_v45, %s4703_s30  ;;  %1411 = vrot.lane.b32.xlu1 %v1256_v51, %s4700_s18 }
 0x220   : > { %2139 = vrot.lane.b32.xlu0 %v5202_v13, %s6311_s27 }
 0x221   : > { %4281 = vmatmul.msk.f32.vlgmr.msrb.gmra.mxu1 %vm1261_vm3, %v1259_v57 }
 0x223   : > { %1979 = vrot.lane.b32.xlu2 %v5212_v32, %s4703_s30  ;;  %1975 = vrot.lane.b32.xlu1 %v5196_v2, %s4703_s30 }
 0x228   : > { %1737 = vrot.lane.b32.xlu0 %v1257_v52, %s4702_s29 }
 0x229   : > { %4291 = vmatmul.msk.f32.vlgmr.msra.gmra.mxu1 %vm1261_vm3, %v4282_v61 }
 0x22b   : > { %2137 = vrot.lane.b32.xlu2 %v5196_v2, %s6311_s27  ;;  %1575 = vrot.lane.b32.xlu1 %v1257_v52, %s4701_s26 }
 0x230   : > { %1735 = vrot.lane.b32.xlu0 %v1256_v51, %s4702_s29 }
 0x233   : > { %2301 = vrot.lane.b32.xlu2 %v5202_v13, %s6309_s28  ;;  %2063 = vrot.lane.b32.xlu1 %v5252_v45, %s6311_s27 }
 0x238   : > { %1897 = vrot.lane.b32.xlu0 %v1256_v51, %s4703_s30 }
 0x23b   : > { %2225 = vrot.lane.b32.xlu2 %v5252_v45, %s6309_s28  ;;  %2141 = vrot.lane.b32.xlu1 %v5212_v32, %s6311_s27 }
 0x240   : > { %2061 = vrot.lane.b32.xlu0 %v1257_v52, %s6311_s27 }
 0x243   : > { %2303 = vrot.lane.b32.xlu2 %v5212_v32, %s6309_s28  ;;  %1899 = vrot.lane.b32.xlu1 %v1257_v52, %s4703_s30 }
 0x248   : > { %2059 = vrot.lane.b32.xlu0 %v1256_v51, %s6311_s27 }
 0x24b   : > { %2461 = vrot.lane.b32.xlu2 %v5196_v2, %s6307_s1  ;;  %2299 = vrot.lane.b32.xlu1 %v5196_v2, %s6309_s28 }
 0x250   : > { %2221 = vrot.lane.b32.xlu0 %v1256_v51, %s6309_s28 }
 0x253   : > { %2625 = vrot.lane.b32.xlu2 %v5202_v13, %s6305_s17  ;;  %2387 = vrot.lane.b32.xlu1 %v5252_v45, %s6307_s1 }
 0x258   : > { %2385 = vrot.lane.b32.xlu0 %v1257_v52, %s6307_s1 }
 0x25b   : > { %2549 = vrot.lane.b32.xlu2 %v5252_v45, %s6305_s17  ;;  %2223 = vrot.lane.b32.xlu1 %v1257_v52, %s6309_s28  ;;  %v4325_v45 = vld [vmem:[%s6289_s7 + $0x10] sm:$0xf] }
 0x260   : > { %2383 = vrot.lane.b32.xlu0 %v1256_v51, %s6307_s1 }
 0x263   : > { %2465 = vrot.lane.b32.xlu1 %v5212_v32, %s6307_s1 }
 0x265   : > { %v1578_v0 = vpop.permute.xlu2 %1577 }
 0x268   : > { %2463 = vrot.lane.b32.xlu0 %v5202_v13, %s6307_s1  ;;  %v1816_v13 = vpop.permute.xlu0 %1815  ;;  %s6328_s1 = smov 108  }
 0x269   : > { %v1819_v27 = vsel %vm1741_vm6, %v5314_v56, %v1816_v13  ;;  %v1820_v31 = vsel %vm1741_vm6, %v1816_v13, %v5345_v63  ;;  %v4352_v56 = vld [vmem:[%s6288_s6 + $0x18] sm:$0xf] }
 0x26b   : > { %2623 = vrot.lane.b32.xlu1 %v5196_v2, %s6305_s17  ;;  %v4283_v2 = vld [vmem:[%s6289_s7 + $0x4] sm:$0xf] }
 0x26d   : > { %v5354_v3 = vpop.permute.xlu2 %1977 }
 0x270   : > { %2545 = vrot.lane.b32.xlu0 %v1256_v51, %s6305_s17 }
 0x273   : > { %2547 = vrot.lane.b32.xlu1 %v1257_v52, %s6305_s17 }
 0x275   : > { %v5363_v8 = vpop.permute.xlu2 %1901 }
 0x278   : > { %2627 = vrot.lane.b32.xlu0 %v5212_v32, %s6305_s17  ;;  %v1657_v32 = vsel %vm1579_vm5, %v1652_v60, %v5330_v58  ;;  %s6329_s17 = smov 92  }
 0x27d   : > { %v1416_v1 = vpop.permute.xlu1 %1415  ;;  %v5379_v16 = vpop.permute.xlu2 %1979 }
 0x27e   : > { %4288 = vmatpush.msk.msrb.mxu0 %vm1265_vm2, %v1416_v1  ;;  %v5464_v46 = vsel %vm1903_vm7, %v5354_v3, %v5379_v16 }
 0x27f   : > { %4289 = vmatmul.msk.f32.vlgmr.msrb.gmra.mxu0 %vm1261_vm3, %v4283_v2 }
 0x282   : > { %v1414_v4 = vpop.permute.xlu0 %1413 }
 0x283   : > { %v1419_v5 = vsel %vm1417_vm4, %v1414_v4, %v1416_v1 }
 0x284   : > { %4286 = vmatpush.msk.msra.mxu3 %vm1265_vm2, %v1419_v5 }
 0x285   : > { %v1740_v6 = vpop.permute.xlu1 %1739  ;;  %4287 = vmatmul.msk.f32.vlgmr.msra.gmra.mxu3 %vm1261_vm3, %v4283_v2  ;;  %v2138_v25 = vpop.permute.xlu2 %2137 }
 0x286   : > { %4294 = vmatpush.msk.msrb.mxu3 %vm1265_vm2, %v1494_v59 }
 0x288   : > { %4304 = vmatpush.msk.msra.mxu3 %vm1265_vm2, %v1657_v32 }
 0x28a   : > { %v1574_v7 = vpop.permute.xlu0 %1573 }
 0x28d   : > { %v1412_v9 = vpop.permute.xlu1 %1411  ;;  %4295 = vmatmul.msk.f32.vlgmr.msrb.gmra.mxu3 %vm1261_vm3, %v4282_v61  ;;  %v5426_v35 = vpop.permute.xlu2 %2301 }
 0x28e   : > { %v1418_v10 = vsel %vm1417_vm4, %v1412_v9, %v1414_v4 }
 0x28f   : > { %4284 = vmatpush.msk.msrb.mxu2 %vm1265_vm2, %v1418_v10 }
 0x290   : > { %4285 = vmatmul.msk.f32.vlgmr.msrb.gmra.mxu2 %vm1261_vm3, %v4283_v2  ;;  %v2703_v2 = vld [vmem:[%s6290_s8] sm:$0xf] }
 0x291   : > { %4292 = vmatpush.msk.msra.mxu2 %vm1265_vm2, %v1496_v11  ;;  %2706 = vperm.xlu1 %4559, %v2703_v2  }
 0x292   : > { %v5373_v12 = vpop.permute.xlu0 %2139 }
 0x293   : > { %4302 = vmatpush.msk.msrb.mxu2 %vm1265_vm2, %v1578_v0  ;;  %v2143_v47 = vsel %vm2065_vm8, %v2138_v25, %v5373_v12  ;;  %v5560_v25 = vpop.f32.mrf.mxu1 }
 0x295   : > { %v1976_v15 = vpop.permute.xlu1 %1975  ;;  %4305 = vmatmul.msk.f32.vlgmr.msra.gmra.mxu3 %vm1261_vm3, %v4296_v14  ;;  %v2226_v43 = vpop.permute.xlu2 %2225 }
 0x296   : > { %v5397_v24 = vsel %vm1903_vm7, %v1976_v15, %v5354_v3 }
 0x298   : > { %4293 = vmatmul.msk.f32.vlgmr.msra.gmra.mxu2 %vm1261_vm3, %v4282_v61  ;;  %v4367_v61 = vld [vmem:[%s6289_s7 + $0x1c] sm:$0xf] }
 0x29a   : > { %v1738_v17 = vpop.permute.xlu0 %1737 }
 0x29b   : > { %v1743_v18 = vsel %vm1741_vm6, %v1738_v17, %v1740_v6 }
 0x29c   : > { %4314 = vmatpush.msk.msrb.mxu3 %vm1265_vm2, %v1743_v18 }
 0x29d   : > { %v1576_v20 = vpop.permute.xlu1 %1575  ;;  %4315 = vmatmul.msk.f32.vlgmr.msrb.gmra.mxu3 %vm1261_vm3, %v4311_v19  ;;  %v2304_v53 = vpop.permute.xlu2 %2303 }
 0x29e   : > { %4322 = vmatpush.msk.msra.mxu3 %vm1265_vm2, %v5345_v63  ;;  %v1580_v22 = vsel %vm1579_vm5, %v1574_v7, %v1576_v20  ;;  %v1581_v23 = vsel %vm1579_vm5, %v1576_v20, %v1578_v0  ;;  %v4353_v63 = vld [vmem:[%s6289_s7 + $0x18] sm:$0xf]  ;;  %v2306_v1 = vsel %vm2227_vm9, %v5426_v35, %v2304_v53 }
 0x29f   : > { %4298 = vmatpush.msk.msra.mxu0 %vm1265_vm2, %v1580_v22  ;;  %4300 = vmatpush.msk.msrb.mxu1 %vm1265_vm2, %v1581_v23 }
 0x2a0   : > { %4332 = vmatpush.msk.msrb.mxu3 %vm1265_vm2, %v5397_v24  ;;  %4299 = vmatmul.msk.f32.vlgmr.msra.gmra.mxu0 %vm1261_vm3, %v4297_v21 }
 0x2a1   : > { %4301 = vmatmul.msk.f32.vlgmr.msrb.gmra.mxu1 %vm1261_vm3, %v4297_v21  ;;  %4303 = vmatmul.msk.f32.vlgmr.msrb.gmra.mxu2 %vm1261_vm3, %v4297_v21 }
 0x2a2   : > { %4306 = vmatpush.msk.msrb.mxu0 %vm1265_vm2, %v1658_v26  ;;  %4308 = vmatpush.msk.msra.mxu1 %vm1265_vm2, %v1656_v62  ;;  %v1736_v28 = vpop.permute.xlu0 %1735  ;;  %v5562_v26 = vpop.f32.mrf.mxu3 }
 0x2a3   : > { %v1742_v29 = vsel %vm1741_vm6, %v1736_v28, %v1738_v17  ;;  %v1384_v28 = vpop.f32.mrf.mxu0 }
 0x2a4   : > { %4316 = vmatpush.msk.msra.mxu0 %vm1265_vm2, %v1740_v6  ;;  %4318 = vmatpush.msk.msrb.mxu1 %vm1265_vm2, %v1819_v27  ;;  %v4366_v6 = vld [vmem:[%s6288_s6 + $0x1c] sm:$0xf]  ;;  %v1312_v27 = vpop.f32.mrf.mxu1 }
 0x2a5   : > { %4312 = vmatpush.msk.msra.mxu2 %vm1265_vm2, %v1742_v29  ;;  %v2064_v34 = vpop.permute.xlu1 %2063  ;;  %4323 = vmatmul.msk.f32.vlgmr.msra.gmra.mxu3 %vm1261_vm3, %v4310_v30  ;;  %v2462_v58 = vpop.permute.xlu2 %2461 }
 0x2a7   : > { %4320 = vmatpush.msk.msrb.mxu2 %vm1265_vm2, %v1820_v31 }
 0x2a8   : > { %4307 = vmatmul.msk.f32.vlgmr.msrb.gmra.mxu0 %vm1261_vm3, %v4296_v14 }
 0x2a9   : > { %4309 = vmatmul.msk.f32.vlgmr.msra.gmra.mxu1 %vm1261_vm3, %v4296_v14  ;;  %4313 = vmatmul.msk.f32.vlgmr.msra.gmra.mxu2 %vm1261_vm3, %v4311_v19  ;;  %v4380_v14 = vld [vmem:[%s6288_s6 + $0x20] sm:$0xf] }
 0x2aa   : > { %4330 = vmatpush.msk.msra.mxu2 %vm1265_vm2, %v5363_v8  ;;  %v1898_v36 = vpop.permute.xlu0 %1897 }
 0x2ac   : > { %v1404_v31 = vpop.f32.mrf.mxu1 }
 0x2ad   : > { %v2142_v39 = vpop.permute.xlu1 %2141  ;;  %4333 = vmatmul.msk.f32.vlgmr.msrb.gmra.mxu3 %vm1261_vm3, %v4324_v38  ;;  %v2626_v3 = vpop.permute.xlu2 %2625 }
 0x2ae   : > { %v2144_v51 = vsel %vm2065_vm8, %v5373_v12, %v2142_v39 }
 0x2b0   : > { %4317 = vmatmul.msk.f32.vlgmr.msra.gmra.mxu0 %vm1261_vm3, %v4311_v19  ;;  %v4381_v19 = vld [vmem:[%s6289_s7 + $0x20] sm:$0xf] }
 0x2b1   : > { %4319 = vmatmul.msk.f32.vlgmr.msrb.gmra.mxu1 %vm1261_vm3, %v4310_v30  ;;  %4321 = vmatmul.msk.f32.vlgmr.msrb.gmra.mxu2 %vm1261_vm3, %v4310_v30  ;;  %v1332_v30 = vpop.f32.mrf.mxu2 }
 0x2b2   : > { %v2062_v40 = vpop.permute.xlu0 %2061 }
 0x2b3   : > { %v2067_v41 = vsel %vm2065_vm8, %v2062_v40, %v2064_v34 }
 0x2b4   : > { %4342 = vmatpush.msk.msra.mxu3 %vm1265_vm2, %v2067_v41  ;;  %v5568_v41 = vpop.f32.mrf.mxu1 }
 0x2b5   : > { %v1900_v44 = vpop.permute.xlu1 %1899  ;;  %4343 = vmatmul.msk.f32.vlgmr.msra.gmra.mxu3 %vm1261_vm3, %v4339_v42  ;;  %v2550_v11 = vpop.permute.xlu2 %2549 }
 0x2b6   : > { %4350 = vmatpush.msk.msrb.mxu3 %vm1265_vm2, %v2142_v39  ;;  %v5447_v37 = vsel %vm1903_vm7, %v1898_v36, %v1900_v44  ;;  %v5451_v33 = vsel %vm1903_vm7, %v1900_v44, %v5363_v8  ;;  %v1405_v36 = vadd.f32 %v1404_v31, %v1332_v30  ;;  %v2758_v44 = vld [vmem:[%s6291_s9 + $0x158] sm:$0xff]  ;;  %v2733_v30 = vld [vmem:[%s6291_s9 + $0x90] sm:$0xff]  ;;  %v2784_v31 = vld [vmem:[%s6291_s9 + $0x228] sm:$0xff] }
 0x2b7   : > { %4326 = vmatpush.msk.msrb.mxu0 %vm1265_vm2, %v5447_v37  ;;  %4328 = vmatpush.msk.msra.mxu1 %vm1265_vm2, %v5451_v33 }
 0x2b8   : > { %4327 = vmatmul.msk.f32.vlgmr.msrb.gmra.mxu0 %vm1261_vm3, %v4325_v45 }
 0x2b9   : > { %4336 = vmatpush.msk.msrb.mxu1 %vm1265_vm2, %v5379_v16  ;;  %4331 = vmatmul.msk.f32.vlgmr.msra.gmra.mxu2 %vm1261_vm3, %v4325_v45 }
 0x2ba   : > { %4329 = vmatmul.msk.f32.vlgmr.msra.gmra.mxu1 %vm1261_vm3, %v4325_v45  ;;  %4334 = vmatpush.msk.msra.mxu0 %vm1265_vm2, %v5464_v46  ;;  %v2060_v48 = vpop.permute.xlu0 %2059 }
 0x2bb   : > { %4346 = vmatpush.msk.msra.mxu1 %vm1265_vm2, %v2143_v47  ;;  %v2066_v49 = vsel %vm2065_vm8, %v2060_v48, %v2062_v40  ;;  %v2755_v48 = vld [vmem:[%s6291_s9 + $0x140] sm:$0xff] }
 0x2bc   : > { %4344 = vmatpush.msk.msrb.mxu0 %vm1265_vm2, %v2064_v34  ;;  %4340 = vmatpush.msk.msrb.mxu2 %vm1265_vm2, %v2066_v49 }
 0x2bd   : > { %v2300_v52 = vpop.permute.xlu1 %2299  ;;  %4351 = vmatmul.msk.f32.vlgmr.msrb.gmra.mxu3 %vm1261_vm3, %v4338_v50 }
 0x2be   : > { %4348 = vmatpush.msk.msra.mxu2 %vm1265_vm2, %v2144_v51  ;;  %v2305_v54 = vsel %vm2227_vm9, %v2300_v52, %v5426_v35  ;;  %v2760_v51 = vld [vmem:[%s6291_s9 + $0x168] sm:$0xff] }
 0x2bf   : > { %4360 = vmatpush.msk.msra.mxu3 %vm1265_vm2, %v2305_v54  ;;  %v2752_v52 = vld [vmem:[%s6291_s9 + $0x128] sm:$0xff]  ;;  %v2757_v54 = vld [vmem:[%s6291_s9 + $0x150] sm:$0xff] }
 0x2c0   : > { %4335 = vmatmul.msk.f32.vlgmr.msra.gmra.mxu0 %vm1261_vm3, %v4324_v38 }
 0x2c1   : > { %4341 = vmatmul.msk.f32.vlgmr.msrb.gmra.mxu2 %vm1261_vm3, %v4339_v42 }
 0x2c2   : > { %4337 = vmatmul.msk.f32.vlgmr.msrb.gmra.mxu1 %vm1261_vm3, %v4324_v38  ;;  %4358 = vmatpush.msk.msrb.mxu2 %vm1265_vm2, %v2226_v43  ;;  %v2222_v55 = vpop.permute.xlu0 %2221 }
 0x2c5   : > { %v2388_v57 = vpop.permute.xlu1 %2387  ;;  %4361 = vmatmul.msk.f32.vlgmr.msra.gmra.mxu3 %vm1261_vm3, %v4352_v56 }
 0x2c8   : > { %4345 = vmatmul.msk.f32.vlgmr.msrb.gmra.mxu0 %vm1261_vm3, %v4339_v42 }
 0x2c9   : > { %4349 = vmatmul.msk.f32.vlgmr.msra.gmra.mxu2 %vm1261_vm3, %v4338_v50 }
 0x2ca   : > { %4347 = vmatmul.msk.f32.vlgmr.msra.gmra.mxu1 %vm1261_vm3, %v4338_v50  ;;  %v2386_v59 = vpop.permute.xlu0 %2385 }
 0x2cb   : > { %v2391_v60 = vsel %vm2389_vm10, %v2386_v59, %v2388_v57 }
 0x2cc   : > { %4370 = vmatpush.msk.msrb.mxu3 %vm1265_vm2, %v2391_v60  ;;  %v1385_v60 = vadd.f32 %v1384_v28, %v1312_v27  ;;  %v2787_v27 = vld [vmem:[%s6291_s9 + $0x240] sm:$0xff] }
 0x2cd   : > { %v2224_v62 = vpop.permute.xlu1 %2223  ;;  %4371 = vmatmul.msk.f32.vlgmr.msrb.gmra.mxu3 %vm1261_vm3, %v4367_v61  ;;  %v2835_v28 = vld [vmem:[%s6291_s9 + $0x3c0] sm:$0xf] }
 0x2ce   : > { %v2228_v0 = vsel %vm2227_vm9, %v2222_v55, %v2224_v62  ;;  %v2229_v13 = vsel %vm2227_vm9, %v2224_v62, %v2226_v43  ;;  %v2761_v43 = vld [vmem:[%s6291_s9 + $0x170] sm:$0xff]  ;;  %v2808_v55 = vld [vmem:[%s6291_s9 + $0x2e8] sm:$0xff]  ;;  %v2751_v62 = vld [vmem:[%s6291_s9 + $0x120] sm:$0xff] }
 0x2cf   : > { %4354 = vmatpush.msk.msra.mxu0 %vm1265_vm2, %v2228_v0  ;;  %4356 = vmatpush.msk.msrb.mxu1 %vm1265_vm2, %v2229_v13  ;;  %v2743_v0 = vld [vmem:[%s6291_s9 + $0xe0] sm:$0xff] }
 0x2d0   : > { %4355 = vmatmul.msk.f32.vlgmr.msra.gmra.mxu0 %vm1261_vm3, %v4353_v63 }
 0x2d1   : > { %4364 = vmatpush.msk.msra.mxu1 %vm1265_vm2, %v2304_v53  ;;  %4359 = vmatmul.msk.f32.vlgmr.msrb.gmra.mxu2 %vm1261_vm3, %v4353_v63 }
 0x2d2   : > { %4357 = vmatmul.msk.f32.vlgmr.msrb.gmra.mxu1 %vm1261_vm3, %v4353_v63  ;;  %4362 = vmatpush.msk.msrb.mxu0 %vm1265_vm2, %v2306_v1  ;;  %v2384_v4 = vpop.permute.xlu0 %2383  ;;  %v2802_v63 = vld [vmem:[%s6291_s9 + $0x2b8] sm:$0xff] }
 0x2d3   : > { %v2390_v5 = vsel %vm2389_vm10, %v2384_v4, %v2386_v59  ;;  %v2746_v59 = vld [vmem:[%s6291_s9 + $0xf8] sm:$0xff]  ;;  %v2748_v4 = vld [vmem:[%s6291_s9 + $0x108] sm:$0xff] }
 0x2d4   : > { %4372 = vmatpush.msk.msra.mxu0 %vm1265_vm2, %v2388_v57  ;;  %4368 = vmatpush.msk.msra.mxu2 %vm1265_vm2, %v2390_v5  ;;  %v2754_v57 = vld [vmem:[%s6291_s9 + $0x138] sm:$0xff]  ;;  %v2799_v5 = vld [vmem:[%s6291_s9 + $0x2a0] sm:$0xff] }
 0x2d5   : > { %v2466_v32 = vpop.permute.xlu1 %2465 }
 0x2d6   : > { %4378 = vmatpush.msk.msra.mxu3 %vm1265_vm2, %v2466_v32 }
 0x2d7   : > { %4379 = vmatmul.msk.f32.vlgmr.msra.gmra.mxu3 %vm1261_vm3, %v4366_v6 }
 0x2d8   : > { %4363 = vmatmul.msk.f32.vlgmr.msrb.gmra.mxu0 %vm1261_vm3, %v4352_v56 }
 0x2d9   : > { %4369 = vmatmul.msk.f32.vlgmr.msra.gmra.mxu2 %vm1261_vm3, %v4367_v61 }
 0x2da   : > { %4365 = vmatmul.msk.f32.vlgmr.msra.gmra.mxu1 %vm1261_vm3, %v4352_v56  ;;  %v2464_v7 = vpop.permute.xlu0 %2463  ;;  %v2749_v56 = vld [vmem:[%s6291_s9 + $0x110] sm:$0xff] }
 0x2db   : > { %v2467_v9 = vsel %vm2389_vm10, %v2462_v58, %v2464_v7  ;;  %v2468_v10 = vsel %vm2389_vm10, %v2464_v7, %v2466_v32  ;;  %v2805_v58 = vld [vmem:[%s6291_s9 + $0x2d0] sm:$0xff] }
 0x2dc   : > { %4376 = vmatpush.msk.msrb.mxu2 %vm1265_vm2, %v2468_v10  ;;  %4374 = vmatpush.msk.msrb.mxu1 %vm1265_vm2, %v2467_v9  ;;  %v2745_v9 = vld [vmem:[%s6291_s9 + $0xf0] sm:$0xff]  ;;  %v2796_v10 = vld [vmem:[%s6291_s9 + $0x288] sm:$0xff] }
 0x2dd   : > { %v2624_v12 = vpop.permute.xlu1 %2623 }
 0x2de   : > { %4386 = vmatpush.msk.msra.mxu2 %vm1265_vm2, %v2550_v11  ;;  %v2629_v15 = vsel %vm2551_vm11, %v2624_v12, %v2626_v3  ;;  %v2742_v12 = vld [vmem:[%s6291_s9 + $0xd8] sm:$0xff] }
 0x2df   : > { %4388 = vmatpush.msk.msrb.mxu3 %vm1265_vm2, %v2629_v15  ;;  %v2734_v15 = vld [vmem:[%s6291_s9 + $0x98] sm:$0xff] }
 0x2e0   : > { %4373 = vmatmul.msk.f32.vlgmr.msra.gmra.mxu0 %vm1261_vm3, %v4367_v61  ;;  %4389 = vmatmul.msk.f32.vlgmr.msrb.gmra.mxu3 %vm1261_vm3, %v4380_v14 }
 0x2e1   : > { %4377 = vmatmul.msk.f32.vlgmr.msrb.gmra.mxu2 %vm1261_vm3, %v4366_v6  ;;  %2871 = vmatpush.msra.mxu3 %v2808_v55 }
 0x2e2   : > { %4375 = vmatmul.msk.f32.vlgmr.msrb.gmra.mxu1 %vm1261_vm3, %v4366_v6  ;;  %v2546_v17 = vpop.permute.xlu0 %2545  ;;  %2851 = vmatpush.msrb.mxu2 %v2760_v51  ;;  %v2740_v6 = vld [vmem:[%s6291_s9 + $0xc8] sm:$0xff]  ;;  %v2826_v51 = vld [vmem:[%s6291_s9 + $0x378] sm:$0xff] }
 0x2e3   : > { %2872 = vmatpush.msra.mxu3 %v2805_v58  ;;  %v2823_v58 = vld [vmem:[%s6291_s9 + $0x360] sm:$0xff] }
 0x2e4   : > { %2852 = vmatpush.msrb.mxu2 %v2757_v54  ;;  %v2719_v54 = vld [vmem:[%s6291_s9 + $0x20] sm:$0xff] }
 0x2e5   : > { %v2548_v18 = vpop.permute.xlu1 %2547  ;;  %2873 = vmatpush.msra.mxu3 %v2802_v63  ;;  %v2721_v63 = vld [vmem:[%s6291_s9 + $0x30] sm:$0xff] }
 0x2e6   : > { %v2552_v20 = vsel %vm2551_vm11, %v2546_v17, %v2548_v18  ;;  %v2553_v21 = vsel %vm2551_vm11, %v2548_v18, %v2550_v11  ;;  %2853 = vmatpush.msrb.mxu2 %v2754_v57  ;;  %v2737_v11 = vld [vmem:[%s6291_s9 + $0xb0] sm:$0xff]  ;;  %v2775_v57 = vld [vmem:[%s6291_s9 + $0x1e0] sm:$0xff] }
 0x2e7   : > { %4382 = vmatpush.msk.msrb.mxu0 %vm1265_vm2, %v2552_v20  ;;  %4384 = vmatpush.msk.msra.mxu1 %vm1265_vm2, %v2553_v21  ;;  %v2790_v20 = vld [vmem:[%s6291_s9 + $0x258] sm:$0xff]  ;;  %v2731_v21 = vld [vmem:[%s6291_s9 + $0x80] sm:$0xff] }
 0x2e8   : > { %4383 = vmatmul.msk.f32.vlgmr.msrb.gmra.mxu0 %vm1261_vm3, %v4381_v19  ;;  %2854 = vmatpush.msrb.mxu2 %v2751_v62 }
 0x2e9   : > { %4387 = vmatmul.msk.f32.vlgmr.msra.gmra.mxu2 %vm1261_vm3, %v4381_v19  ;;  %2874 = vmatpush.msra.mxu3 %v2799_v5  ;;  %v2817_v5 = vld [vmem:[%s6291_s9 + $0x330] sm:$0xff] }
 0x2ea   : > { %4385 = vmatmul.msk.f32.vlgmr.msra.gmra.mxu1 %vm1261_vm3, %v4381_v19  ;;  %v2628_v22 = vpop.permute.xlu0 %2627  ;;  %2855 = vmatpush.msrb.mxu2 %v2748_v4  ;;  %v2739_v19 = vld [vmem:[%s6291_s9 + $0xc0] sm:$0xff]  ;;  %v2769_v4 = vld [vmem:[%s6291_s9 + $0x1b0] sm:$0xff] }
 0x2eb   : > { %v2630_v23 = vsel %vm2551_vm11, %v2626_v3, %v2628_v22  ;;  %4392 = vmatpush.msk.msrb.mxu1 %vm1265_vm2, %v2628_v22  ;;  %2875 = vmatpush.msra.mxu3 %v2796_v10  ;;  %v2715_v10 = vld [vmem:[%s6291_s9] sm:$0xff] }
 0x2ec   : > { %4390 = vmatpush.msk.msra.mxu0 %vm1265_vm2, %v2630_v23  ;;  %2856 = vmatpush.msrb.mxu2 %v2745_v9  ;;  %v2736_v23 = vld [vmem:[%s6291_s9 + $0xa8] sm:$0xff] }
 0x2ed   : > { %2911 = vmatpush.msra.mxu1 %v2761_v43  ;;  %v2781_v43 = vld [vmem:[%s6291_s9 + $0x210] sm:$0xff]  ;;  %v2804_v9 = vld [vmem:[%s6291_s9 + $0x2c8] sm:$0xff] }
 0x2ee   : > { %2857 = vmatpush.msrb.mxu2 %v2742_v12  ;;  %4394 = vmatpush.msk.msrb.mxu0 %vm1265_vm2, %v2835_v28  ;;  %v2833_v28 = vld [vmem:[%s6291_s9 + $0x3b0] sm:$0xff] }
 0x2ef   : > { %2912 = vmatpush.msra.mxu1 %v2758_v44  ;;  %v2829_v44 = vld [vmem:[%s6291_s9 + $0x390] sm:$0xff] }
 0x2f0   : > { %4391 = vmatmul.msk.f32.vlgmr.msra.gmra.mxu0 %vm1261_vm3, %v4380_v14  ;;  %2858 = vmatpush.msrb.mxu2 %v2739_v19  ;;  %v2836_v19 = vld [vmem:[%s6291_s9 + $0x3c8] sm:$0xf] }
 0x2f1   : > { %2913 = vmatpush.msra.mxu1 %v2755_v48  ;;  %v2727_v48 = vld [vmem:[%s6291_s9 + $0x60] sm:$0xff] }
 0x2f2   : > { %4393 = vmatmul.msk.f32.vlgmr.msrb.gmra.mxu1 %vm1261_vm3, %v4380_v14  ;;  %v2793_v14 = vld [vmem:[%s6291_s9 + $0x270] sm:$0xff]  ;;  %2859 = vmatpush.msrb.mxu2 %v2736_v23  ;;  %v2811_v23 = vld [vmem:[%s6291_s9 + $0x300] sm:$0xff] }
 0x2f3   : > { %2914 = vmatpush.msra.mxu1 %v2752_v52  ;;  %2876 = vmatpush.msra.mxu3 %v2793_v14  ;;  %v2814_v14 = vld [vmem:[%s6291_s9 + $0x318] sm:$0xff] }
 0x2f4   : > { %2860 = vmatpush.msrb.mxu2 %v2733_v30 }
 0x2f5   : > { %2915 = vmatpush.msra.mxu1 %v2749_v56  ;;  %2877 = vmatpush.msra.mxu3 %v2790_v20  ;;  %v2724_v56 = vld [vmem:[%s6291_s9 + $0x48] sm:$0xff]  ;;  %v2801_v20 = vld [vmem:[%s6291_s9 + $0x2b0] sm:$0xff] }
 0x2f7   : > { %2916 = vmatpush.msra.mxu1 %v2746_v59  ;;  %2878 = vmatpush.msra.mxu3 %v2787_v27  ;;  %v2716_v59 = vld [vmem:[%s6291_s9 + $0x8] sm:$0xff]  ;;  %v2809_v27 = vld [vmem:[%s6291_s9 + $0x2f0] sm:$0xff] }
 0x2f9   : > { %2917 = vmatpush.msra.mxu1 %v2743_v0  ;;  %2879 = vmatpush.msra.mxu3 %v2784_v31  ;;  %v2772_v0 = vld [vmem:[%s6291_s9 + $0x1c8] sm:$0xff]  ;;  %v2798_v31 = vld [vmem:[%s6291_s9 + $0x298] sm:$0xff] }
 0x2fb   : > { %2918 = vmatpush.msra.mxu1 %v2740_v6  ;;  %2880 = vmatpush.msra.mxu3 %v2781_v43  ;;  %v2795_v43 = vld [vmem:[%s6291_s9 + $0x280] sm:$0xff] }
 0x2fc   : > { %v1486_v34 = vpop.f32.mrf.mxu0 }
 0x2fd   : > { %2919 = vmatpush.msra.mxu1 %v2737_v11  ;;  %v2766_v11 = vld [vmem:[%s6291_s9 + $0x198] sm:$0xff] }
 0x2ff   : > { %2920 = vmatpush.msra.mxu1 %v2734_v15 }
 0x301   : > { %2921 = vmatpush.msra.mxu1 %v2731_v21  ;;  %v2763_v21 = vld [vmem:[%s6291_s9 + $0x180] sm:$0xff] }
 0x308   : > { %v1466_v29 = vpop.f32.mrf.mxu3 }
 0x310   : > { %v1563_v35 = vpop.f32.mrf.mxu3 }
 0x311   : > { %v1564_v38 = vadd.f32 %v1563_v35, %v1486_v34  ;;  %v2832_v35 = vld [vmem:[%s6291_s9 + $0x3a8] sm:$0xff] }
 0x312   : > { %2899 = vmatpush.msrb.mxu0 %v2832_v35  ;;  %v2806_v35 = vld [vmem:[%s6291_s9 + $0x2d8] sm:$0xff] }
 0x313   : > { %v5564_v39 = vadd.f32 %v1564_v38, %v1405_v36  ;;  %v5566_v40 = vpop.f32.mrf.mxu2  ;;  %v2725_v36 = vld [vmem:[%s6291_s9 + $0x50] sm:$0xff]  ;;  %v2730_v38 = vld [vmem:[%s6291_s9 + $0x78] sm:$0xff] }
 0x314   : > { %2861 = vmatpush.msrb.mxu2 %v2730_v38  ;;  %2900 = vmatpush.msrb.mxu0 %v2829_v44  ;;  %v2759_v38 = vld [vmem:[%s6291_s9 + $0x160] sm:$0xff] }
 0x316   : > { %2862 = vmatpush.msrb.mxu2 %v2727_v48  ;;  %2901 = vmatpush.msrb.mxu0 %v2826_v51  ;;  %v2827_v48 = vld [vmem:[%s6291_s9 + $0x380] sm:$0xff] }
 0x318   : > { %v5570_v42 = vpop.f32.mrf.mxu3  ;;  %2863 = vmatpush.msrb.mxu2 %v2724_v56  ;;  %2902 = vmatpush.msrb.mxu0 %v2823_v58  ;;  %v2824_v58 = vld [vmem:[%s6291_s9 + $0x368] sm:$0xff] }
 0x31a   : > { %2864 = vmatpush.msrb.mxu2 %v2721_v63  ;;  %v2797_v63 = vld [vmem:[%s6291_s9 + $0x290] sm:$0xff] }
 0x31b   : > { %v1543_v45 = vpop.f32.mrf.mxu2 }
 0x31c   : > { %v1544_v47 = vadd.f32 %v1543_v45, %v1466_v29  ;;  %v2728_v29 = vld [vmem:[%s6291_s9 + $0x68] sm:$0xff]  ;;  %v2722_v45 = vld [vmem:[%s6291_s9 + $0x38] sm:$0xff] }
 0x31d   : > { %v5581_v49 = vpop.f32.mrf.mxu0  ;;  %2922 = vmatpush.msra.mxu1 %v2728_v29  ;;  %v2762_v29 = vld [vmem:[%s6291_s9 + $0x178] sm:$0xff] }
 0x31e   : > { %v1628_v50 = vpop.f32.mrf.mxu1  ;;  %v1567_v1 = vadd.f32 %v1544_v47, %v1385_v60  ;;  %v2810_v60 = vld [vmem:[%s6291_s9 + $0x2f8] sm:$0xff] }
 0x31f   : > { %2923 = vmatpush.msra.mxu1 %v2725_v36  ;;  %v2830_v36 = vld [vmem:[%s6291_s9 + $0x398] sm:$0xff] }
 0x320   : > { %v5589_v53 = vpop.f32.mrf.mxu3 }
 0x321   : > { %2924 = vmatpush.msra.mxu1 %v2722_v45  ;;  %v2803_v45 = vld [vmem:[%s6291_s9 + $0x2c0] sm:$0xff] }
 0x323   : > { %2925 = vmatpush.msra.mxu1 %v2719_v54  ;;  %v2792_v54 = vld [vmem:[%s6291_s9 + $0x268] sm:$0xff] }
 0x324   : > { %v5609_v61 = vpop.f32.mrf.mxu2 }
 0x325   : > { %v1705_v13 = vpop.f32.mrf.mxu0  ;;  %2926 = vmatpush.msra.mxu1 %v2716_v59  ;;  %v2753_v59 = vld [vmem:[%s6291_s9 + $0x130] sm:$0xff] }
 0x326   : > { %v1706_v2 = vadd.f32 %v1705_v13, %v1628_v50  ;;  %v5620_v3 = vpop.f32.mrf.mxu1  ;;  %v2778_v50 = vld [vmem:[%s6291_s9 + $0x1f8] sm:$0xff]  ;;  %v2820_v13 = vld [vmem:[%s6291_s9 + $0x348] sm:$0xff] }
 0x327   : > { %2881 = vmatpush.msra.mxu3 %v2778_v50  ;;  %2991 = vmatpush.msrb.mxu1 %v2810_v60  ;;  %v2756_v50 = vld [vmem:[%s6291_s9 + $0x148] sm:$0xff]  ;;  %v2789_v60 = vld [vmem:[%s6291_s9 + $0x250] sm:$0xff] }
 0x328   : > { %v5631_v32 = vadd.f32 %v1706_v2, %v1567_v1  ;;  %v5633_v7 = vpop.f32.mrf.mxu3  ;;  %v2807_v1 = vld [vmem:[%s6291_s9 + $0x2e0] sm:$0xff]  ;;  %v2718_v2 = vld [vmem:[%s6291_s9 + $0x18] sm:$0xff]  ;;  %2903 = vmatpush.msrb.mxu0 %v2820_v13 }
 0x329   : > { %2882 = vmatpush.msra.mxu3 %v2775_v57  ;;  %2992 = vmatpush.msrb.mxu1 %v2807_v1  ;;  %v2800_v57 = vld [vmem:[%s6291_s9 + $0x2a8] sm:$0xff]  ;;  %v2750_v13 = vld [vmem:[%s6291_s9 + $0x118] sm:$0xff] }
 0x32a   : > { %2865 = vmatpush.msrb.mxu2 %v2718_v2  ;;  %2904 = vmatpush.msrb.mxu0 %v2817_v5  ;;  %v2786_v2 = vld [vmem:[%s6291_s9 + $0x238] sm:$0xff] }
 0x32b   : > { %2883 = vmatpush.msra.mxu3 %v2772_v0  ;;  %2993 = vmatpush.msrb.mxu1 %v2804_v9  ;;  %v2821_v0 = vld [vmem:[%s6291_s9 + $0x350] sm:$0xff]  ;;  %v2818_v5 = vld [vmem:[%s6291_s9 + $0x338] sm:$0xff]  ;;  %v2747_v9 = vld [vmem:[%s6291_s9 + $0x100] sm:$0xff] }
 0x32c   : > { %v5653_v17 = vpop.f32.mrf.mxu2  ;;  %2866 = vmatpush.msrb.mxu2 %v2715_v10  ;;  %2905 = vmatpush.msrb.mxu0 %v2814_v14  ;;  %v2783_v10 = vld [vmem:[%s6291_s9 + $0x220] sm:$0xff] }
 0x32d   : > { %v5655_v18 = vpop.f32.mrf.mxu0  ;;  %2884 = vmatpush.msra.mxu3 %v2769_v4  ;;  %2994 = vmatpush.msrb.mxu1 %v2801_v20  ;;  %v2794_v4 = vld [vmem:[%s6291_s9 + $0x278] sm:$0xff]  ;;  %v2791_v14 = vld [vmem:[%s6291_s9 + $0x260] sm:$0xff]  ;;  %v2744_v20 = vld [vmem:[%s6291_s9 + $0xe8] sm:$0xff] }
 0x32e   : > { %v5666_v22 = vpop.f32.mrf.mxu1  ;;  %4396 = vmatpush.msk.msra.mxu2 %vm1265_vm2, %v2836_v19  ;;  %2906 = vmatpush.msrb.mxu0 %v2811_v23  ;;  %v2815_v19 = vld [vmem:[%s6291_s9 + $0x320] sm:$0xff]  ;;  %v2780_v23 = vld [vmem:[%s6291_s9 + $0x208] sm:$0xff] }
 0x32f   : > { %2885 = vmatpush.msra.mxu3 %v2766_v11  ;;  %2995 = vmatpush.msrb.mxu1 %v2798_v31  ;;  %v2741_v31 = vld [vmem:[%s6291_s9 + $0xd0] sm:$0xff] }
 0x330   : > { %v5686_v34 = vpop.f32.mrf.mxu3  ;;  %2931 = vmatpush.msra.mxu0 %v2809_v27  ;;  %2959 = vmatpush.msra.mxu2 %v2833_v28  ;;  %v2788_v28 = vld [vmem:[%s6291_s9 + $0x248] sm:$0xff] }
 0x331   : > { %2886 = vmatpush.msra.mxu3 %v2763_v21  ;;  %2996 = vmatpush.msrb.mxu1 %v2795_v43  ;;  %v2774_v43 = vld [vmem:[%s6291_s9 + $0x1d8] sm:$0xff] }
 0x332   : > { %2932 = vmatpush.msra.mxu0 %v2806_v35  ;;  %2960 = vmatpush.msra.mxu2 %v2830_v36  ;;  %v2777_v35 = vld [vmem:[%s6291_s9 + $0x1f0] sm:$0xff] }
 0x333   : > { %2971 = vmatpush.msrb.mxu3 %v2762_v29  ;;  %2997 = vmatpush.msrb.mxu1 %v2792_v54  ;;  %v2812_v29 = vld [vmem:[%s6291_s9 + $0x308] sm:$0xff]  ;;  %v2785_v36 = vld [vmem:[%s6291_s9 + $0x230] sm:$0xff]  ;;  %v2771_v54 = vld [vmem:[%s6291_s9 + $0x1c0] sm:$0xff] }
 0x334   : > { %v5707_v47 = vpop.f32.mrf.mxu2  ;;  %2933 = vmatpush.msra.mxu0 %v2803_v45  ;;  %2961 = vmatpush.msra.mxu2 %v2827_v48  ;;  %v2782_v48 = vld [vmem:[%s6291_s9 + $0x218] sm:$0xff] }
 0x335   : > { %v5718_v52 = vpop.f32.mrf.mxu0  ;;  %2972 = vmatpush.msrb.mxu3 %v2759_v38  ;;  %2998 = vmatpush.msrb.mxu1 %v2789_v60  ;;  %v2738_v38 = vld [vmem:[%s6291_s9 + $0xb8] sm:$0xff]  ;;  %v2768_v60 = vld [vmem:[%s6291_s9 + $0x1a8] sm:$0xff] }
 0x336   : > { %2934 = vmatpush.msra.mxu0 %v2800_v57  ;;  %2962 = vmatpush.msra.mxu2 %v2824_v58  ;;  %v2779_v58 = vld [vmem:[%s6291_s9 + $0x200] sm:$0xff] }
 0x337   : > { %v5723_v55 = vpop.f32.mrf.mxu1  ;;  %2973 = vmatpush.msrb.mxu3 %v2756_v50  ;;  %2999 = vmatpush.msrb.mxu1 %v2786_v2  ;;  %v2735_v50 = vld [vmem:[%s6291_s9 + $0xa0] sm:$0xff] }
 0x338   : > { %v5740_v62 = vpop.f32.mrf.mxu3  ;;  %2935 = vmatpush.msra.mxu0 %v2797_v63  ;;  %2963 = vmatpush.msra.mxu2 %v2821_v0  ;;  %v2776_v0 = vld [vmem:[%s6291_s9 + $0x1e8] sm:$0xff] }
 0x339   : > { %2974 = vmatpush.msrb.mxu3 %v2753_v59  ;;  %3000 = vmatpush.msrb.mxu1 %v2783_v10  ;;  %v2732_v59 = vld [vmem:[%s6291_s9 + $0x88] sm:$0xff]  ;;  %v1686_v10 = vadd.f32 %v5570_v42, %v5581_v49  ;;  %v2010_v49 = vadd.f32 %v5686_v34, %v5718_v52  ;;  %v2717_v52 = vld [vmem:[%s6291_s9 + $0x10] sm:$0xff] }
 0x33a   : > { %2936 = vmatpush.msra.mxu0 %v2794_v4  ;;  %2964 = vmatpush.msra.mxu2 %v2818_v5  ;;  %v2729_v4 = vld [vmem:[%s6291_s9 + $0x70] sm:$0xff]  ;;  %v2764_v34 = vld [vmem:[%s6291_s9 + $0x188] sm:$0xff] }
 0x33b   : > { %2975 = vmatpush.msrb.mxu3 %v2750_v13  ;;  %3001 = vmatpush.msrb.mxu1 %v2780_v23  ;;  %v1524_v13 = vadd.f32 %v5568_v41, %v5566_v40  ;;  %v2765_v5 = vld [vmem:[%s6291_s9 + $0x190] sm:$0xff]  ;;  %v2726_v41 = vld [vmem:[%s6291_s9 + $0x58] sm:$0xff] }
 0x33c   : > { %v5763_v6 = vpop.f32.mrf.mxu2  ;;  %2937 = vmatpush.msra.mxu0 %v2791_v14  ;;  %2965 = vmatpush.msra.mxu2 %v2815_v19  ;;  %v2773_v40 = vld [vmem:[%s6291_s9 + $0x1d0] sm:$0xff]  ;;  %v1848_v19 = vadd.f32 %v5666_v22, %v5653_v17  ;;  %v2767_v17 = vld [vmem:[%s6291_s9 + $0x1a0] sm:$0xff]  ;;  %v2720_v22 = vld [vmem:[%s6291_s9 + $0x28] sm:$0xff] }
 0x33d   : > { %v5774_v12 = vpop.f32.mrf.mxu0  ;;  %2976 = vmatpush.msrb.mxu3 %v2747_v9  ;;  %3002 = vmatpush.msrb.mxu1 %v2777_v35  ;;  %v1365_v9 = vadd.f32 %v5562_v26, %v5560_v25  ;;  %v2770_v25 = vld [vmem:[%s6291_s9 + $0x1b8] sm:$0xff]  ;;  %v2723_v26 = vld [vmem:[%s6291_s9 + $0x40] sm:$0xff] }
 0x33e   : > { %2938 = vmatpush.msra.mxu0 %v2788_v28  ;;  %2966 = vmatpush.msra.mxu2 %v2812_v29 }
 0x33f   : > { %v5779_v15 = vpop.f32.mrf.mxu1  ;;  %2977 = vmatpush.msrb.mxu3 %v2744_v20  ;;  %3003 = vmatpush.msrb.mxu1 %v2774_v43  ;;  %v1566_v14 = vadd.f32 %v1524_v13, %v1365_v9  ;;  %v1726_v43 = vadd.f32 %v5620_v3, %v5609_v61 }
 0x340   : > { %v5803_v30 = vpop.f32.mrf.mxu3  ;;  %2939 = vmatpush.msra.mxu0 %v2785_v36  ;;  %v2050_v61 = vadd.f32 %v5779_v15, %v5763_v6 }
 0x341   : > { %2978 = vmatpush.msrb.mxu3 %v2741_v31  ;;  %3004 = vmatpush.msrb.mxu1 %v2771_v54  ;;  %v1728_v42 = vadd.f32 %v1686_v10, %v1566_v14 }
 0x342   : > { %2940 = vmatpush.msra.mxu0 %v2782_v48 }
 0x343   : > { %2979 = vmatpush.msrb.mxu3 %v2738_v38  ;;  %3005 = vmatpush.msrb.mxu1 %v2768_v60  ;;  %v1890_v29 = vadd.f32 %v1848_v19, %v1728_v42 }
 0x344   : > { %v5820_v44 = vpop.f32.mrf.mxu2  ;;  %2941 = vmatpush.msra.mxu0 %v2779_v58  ;;  %v2030_v58 = vadd.f32 %v5774_v12, %v5723_v55  ;;  %v2707_v12 = vpop.permute.xlu1 %2706 }
 0x345   : > { %v5831_v51 = vpop.f32.mrf.mxu0  ;;  %2980 = vmatpush.msrb.mxu3 %v2735_v50  ;;  %3006 = vmatpush.msrb.mxu1 %v2765_v5  ;;  %v2052_v36 = vadd.f32 %v2010_v49, %v1890_v29  ;;  %v1888_v50 = vadd.f32 %v5633_v7, %v5655_v18  ;;  %v2828_v49 = vld [vmem:[%s6291_s9 + $0x388] sm:$0xff]  ;;  %v2822_v29 = vld [vmem:[%s6291_s9 + $0x358] sm:$0xff] }
 0x346   : > { %2942 = vmatpush.msra.mxu0 %v2776_v0  ;;  %v2212_v55 = vadd.f32 %v5803_v30, %v5831_v51  ;;  %v2837_v30 = vld [vmem:[%s6291_s9 + $0x3d0] sm:$0xf] }
 0x347   : > { %v5836_v56 = vpop.f32.mrf.mxu1  ;;  %2981 = vmatpush.msrb.mxu3 %v2732_v59 }
 0x348   : > { %v5859_v1 = vpop.f32.mrf.mxu3  ;;  %2943 = vmatpush.msra.mxu0 %v2773_v40  ;;  %v2172_v31 = vadd.f32 %v5836_v56, %v5820_v44  ;;  %v1868_v44 = vadd.f32 %v5707_v47, %v5589_v53 }
 0x349   : > { %2982 = vmatpush.msrb.mxu3 %v2729_v4 }
 0x34a   : > { %2944 = vmatpush.msra.mxu0 %v2770_v25  ;;  %v2214_v56 = vadd.f32 %v2172_v31, %v2052_v36  ;;  %v2831_v25 = vld [vmem:[%s6291_s9 + $0x3a0] sm:$0xff] }
 0x34b   : > { %2983 = vmatpush.msrb.mxu3 %v2726_v41  ;;  %v2819_v31 = vld [vmem:[%s6291_s9 + $0x340] sm:$0xff] }
 0x34c   : > { %v5876_v11 = vpop.f32.mrf.mxu2  ;;  %2945 = vmatpush.msra.mxu0 %v2767_v17 }
 0x34d   : > { %v5887_v21 = vpop.f32.mrf.mxu0  ;;  %2984 = vmatpush.msrb.mxu3 %v2723_v26  ;;  %v2192_v53 = vadd.f32 %v5876_v11, %v5740_v62 }
 0x34e   : > { %v2334_v38 = vadd.f32 %v5859_v1, %v5887_v21  ;;  %2946 = vmatpush.msra.mxu0 %v2764_v34  ;;  %v1730_v1 = vadd.f32 %v1726_v43, %v5564_v39  ;;  %v1891_v21 = vadd.f32 %v1868_v44, %v5631_v32  ;;  %v2813_v34 = vld [vmem:[%s6291_s9 + $0x310] sm:$0xff] }
 0x34f   : > { %v5892_v27 = vpop.f32.mrf.mxu1  ;;  %2985 = vmatpush.msrb.mxu3 %v2720_v22 }
 0x350   : > { %v5915_v45 = vpop.f32.mrf.mxu3  ;;  %v2376_v59 = vadd.f32 %v2334_v38, %v2214_v56  ;;  %v1892_v18 = vadd.f32 %v1888_v50, %v1730_v1  ;;  %v2053_v13 = vadd.f32 %v2030_v58, %v1891_v21  ;;  %v3897_v21 = vld [vmem:[%s6296_s14] sm:$0xf] }
 0x351   : > { %2986 = vmatpush.msrb.mxu3 %v2717_v52 }
 0x352   : > { %v2054_v6 = vadd.f32 %v2050_v61, %v1892_v18  ;;  %v2215_v15 = vadd.f32 %v2192_v53, %v2053_v13 }
 0x354   : > { %v5926_v57 = vpop.f32.mrf.mxu2  ;;  %v2216_v5 = vadd.f32 %v2212_v55, %v2054_v6  ;;  %v4400_v6 = vld [vmem:[%s6292_s10 + $0x4] sm:$0xf] }
 0x355   : > { %v5937_v63 = vpop.f32.mrf.mxu0 }
 0x356   : > { %v2354_v39 = vadd.f32 %v5937_v63, %v5892_v27 }
 0x357   : > { %v5944_v2 = vpop.f32.mrf.mxu1 }
 0x358   : > { %v2374_v32 = vadd.f32 %v5944_v2, %v5926_v57  ;;  %v2377_v10 = vadd.f32 %v2354_v39, %v2215_v15 }
 0x35a   : > { %v2535_v20 = vpop.f32.mrf.mxu3  ;;  %v2378_v51 = vadd.f32 %v2374_v32, %v2216_v5 }
 0x35c   : > { %v2418_v23 = vpop.f32.mrf.mxu2 }
 0x35d   : > { %v2458_v28 = vpop.f32.mrf.mxu0 }
 0x35e   : > { %v2536_v9 = vadd.f32 %v2535_v20, %v2458_v28  ;;  %v2825_v28 = vld [vmem:[%s6291_s9 + $0x370] sm:$0xff] }
 0x35f   : > { %v2495_v35 = vpop.f32.mrf.mxu1 }
 0x360   : > { %v2496_v48 = vadd.f32 %v2495_v35, %v2418_v23  ;;  %v2540_v57 = vadd.f32 %v2536_v9, %v2378_v51  ;;  %v2816_v35 = vld [vmem:[%s6291_s9 + $0x328] sm:$0xff] }
 0x361   : > { %v4420_v51 = vld [vmem:[%s6292_s10 + $0xc] sm:$0xf] }
 0x362   : > { %v2538_v47 = vadd.f32 %v2496_v48, %v2376_v59 }
 0x363   : > { %v2657_v54 = vpop.f32.mrf.mxu3 }
 0x364   : > { %v2515_v60 = vpop.f32.mrf.mxu2 }
 0x365   : > { %v2580_v3 = vpop.f32.mrf.mxu0  ;;  %v2516_v62 = vadd.f32 %v2515_v60, %v5915_v45  ;;  %v2834_v45 = vld [vmem:[%s6291_s9 + $0x3b8] sm:$0xff] }
 0x366   : > { %v2658_v7 = vadd.f32 %v2657_v54, %v2580_v3 }
 0x367   : > { %v2600_v0 = vpop.f32.mrf.mxu1  ;;  %v2539_v63 = vadd.f32 %v2516_v62, %v2377_v10 }
 0x368   : > { %v2700_v4 = vadd.f32 %v2658_v7, %v2538_v47  ;;  %v3031_v47 = vld [vmem:[%s6292_s10] sm:$0xf] }
 0x36a   : > { %v2709_v11 = vadd.f32 %v2707_v12, %v2700_v4 }
 0x36c   : > { %v2712_v40 = vmax.f32 %v2709_v11, 0.0  ;;  %v2620_v41 = vpop.f32.mrf.mxu2 }
 0x36d   : > { %v2677_v27 = vpop.f32.mrf.mxu0 }
 0x36e   : > { %v2678_v14 = vadd.f32 %v2677_v27, %v2600_v0  ;;  %2867 = vmatmul.f32.vlgmr.msrb.gmra.mxu2 %v2712_v40  ;;  %2927 = vmatmul.f32.vlgmr.msra.gmra.mxu1 %v2712_v40 }
 0x36f   : > { %v2697_v19 = vpop.f32.mrf.mxu1  ;;  %4398 = vmatpush.msk.msrb.mxu2 %vm1265_vm2, %v2837_v30 }
 0x370   : > { %v2698_v2 = vadd.f32 %v2697_v19, %v2620_v41  ;;  %v2701_v20 = vadd.f32 %v2678_v14, %v2539_v63  ;;  %v4427_v41 = vld [vmem:[%s6292_s10 + $0x10] sm:$0xf] }
 0x371   : > { %3019 = vmatpush.msrb.mxu2 %v2834_v45 }
 0x372   : > { %v2702_v26 = vadd.f32 %v2698_v2, %v2540_v57  ;;  %v2710_v42 = vadd.f32 %v2707_v12, %v2701_v20  ;;  %v4434_v57 = vld [vmem:[%s6292_s10 + $0x14] sm:$0xf] }
 0x373   : > { %3020 = vmatpush.msrb.mxu2 %v2831_v25 }
 0x374   : > { %v2711_v23 = vadd.f32 %v2707_v12, %v2702_v26  ;;  %v2713_v17 = vmax.f32 %v2710_v42, 0.0  ;;  %v4413_v12 = vld [vmem:[%s6292_s10 + $0x8] sm:$0xf] }
 0x375   : > { %3021 = vmatpush.msrb.mxu2 %v2828_v49 }
 0x376   : > { %v2714_v22 = vmax.f32 %v2711_v23, 0.0  ;;  %2887 = vmatmul.f32.vlgmr.msra.gmra.mxu3 %v2713_v17  ;;  %3007 = vmatmul.f32.vlgmr.msrb.gmra.mxu1 %v2713_v17  ;;  %v4441_v23 = vld [vmem:[%s6292_s10 + $0x18] sm:$0xf] }
 0x377   : > { %3022 = vmatpush.msrb.mxu2 %v2825_v28 }
 0x378   : > { %4395 = vmatmul.msk.f32.vlgmr.msrb.gmra.mxu0 %vm2838_vm12, %v2714_v22  ;;  %4397 = vmatmul.msk.f32.vlgmr.msra.gmra.mxu2 %vm2838_vm12, %v2714_v22 }
 0x379   : > { %3023 = vmatpush.msrb.mxu2 %v2822_v29 }
 0x37b   : > { %3024 = vmatpush.msrb.mxu2 %v2819_v31 }
 0x37d   : > { %3025 = vmatpush.msrb.mxu2 %v2816_v35 }
 0x37e   : > { %2987 = vmatmul.f32.vlgmr.msrb.gmra.mxu3 %v2712_v40 }
 0x37f   : > { %3026 = vmatpush.msrb.mxu2 %v2813_v34 }
 0x380   : > { %2947 = vmatmul.f32.vlgmr.msra.gmra.mxu0 %v2713_v17  ;;  %4399 = vmatmul.msk.f32.vlgmr.msrb.gmra.mxu2 %vm2838_vm12, %v2714_v22  ;;  %v3757_v22 = vld [vmem:[%s6293_s11] sm:$0xf] }
 0x3eb   : > { %v2928_v38 = vpop.f32.mrf.mxu1 }
 0x3f1   : > { %v2868_v52 = vpop.f32.mrf.mxu2 }
 0x3f3   : > { %v3008_v60 = vpop.f32.mrf.mxu1 }
 0x3f5   : > { %v2908_v36 = vpop.f32.mrf.mxu0 }
 0x3f9   : > { %v2888_v43 = vpop.f32.mrf.mxu3 }
 0x3fa   : > { %v2889_v44 = vadd.f32 %v2888_v43, %v2868_v52  ;;  %v4455_v43 = vld [vmem:[%s6292_s10 + $0x20] sm:$0xf] }
 0x3fb   : > { %v2968_v56 = vpop.f32.mrf.mxu2 }
 0x3fc   : > { %v2909_v48 = vadd.f32 %v2908_v36, %v2889_v44  ;;  %v4448_v36 = vld [vmem:[%s6292_s10 + $0x1c] sm:$0xf] }
 0x3fd   : > { %v2948_v50 = vpop.f32.mrf.mxu0 }
 0x3fe   : > { %v2949_v54 = vadd.f32 %v2948_v50, %v2928_v38  ;;  %3185 = vrot.lane.b32.xlu0 %v2909_v48, %s4701_s26  ;;  %3037 = vrot.lane.b32.xlu2 %v2909_v48, %s4700_s18  ;;  %v3992_v50 = vld [vmem:[#allocation5 + $0x280] sm:$0xf] }
 0x3ff   : > { %4407 = vmatpush.msk.msra.mxu2 %vm1265_vm2, %v2909_v48 }
 0x400   : > { %v2969_v58 = vadd.f32 %v2968_v56, %v2949_v54  ;;  %4408 = vmatmul.msk.f32.vlgmr.msra.gmra.mxu2 %vm1261_vm3, %v3031_v47  ;;  %v3940_v54 = vld [vmem:[#allocation5 + $0xe0] sm:$0xff] }
 0x401   : > { %v2988_v59 = vpop.f32.mrf.mxu3 }
 0x402   : > { %3187 = vrot.lane.b32.xlu1 %v2969_v58, %s4701_s26  ;;  %4409 = vmatpush.msk.msra.mxu1 %vm1265_vm2, %v2969_v58  ;;  %v3009_v1 = vadd.f32 %v3008_v60, %v2988_v59  ;;  %v3938_v59 = vld [vmem:[#allocation5 + $0xd0] sm:$0xff] }
 0x403   : > { %v3028_v61 = vpop.f32.mrf.mxu2  ;;  %4410 = vmatmul.msk.f32.vlgmr.msra.gmra.mxu1 %vm1261_vm3, %v3031_v47 }
 0x404   : > { %v3029_v3 = vadd.f32 %v3028_v61, %v3009_v1  ;;  %v3988_v1 = vld [vmem:[#allocation5 + $0x260] sm:$0xff] }
 0x405   : > { %v3936_v61 = vld [vmem:[#allocation5 + $0xc0] sm:$0xff] }
 0x406   : > { %3039 = vrot.lane.b32.xlu0 %v2969_v58, %s4700_s18  ;;  %3267 = vrot.lane.b32.xlu2 %v2909_v48, %s4702_s29 }
 0x40a   : > { %3041 = vrot.lane.b32.xlu1 %v3029_v3, %s4700_s18  ;;  %s6330_s18 = smov 91  }
 0x40e   : > { %3269 = vrot.lane.b32.xlu0 %v2969_v58, %s4702_s29  ;;  %3351 = vrot.lane.b32.xlu2 %v2969_v58, %s4703_s30 }
 0x412   : > { %3349 = vrot.lane.b32.xlu1 %v2909_v48, %s4703_s30 }
 0x416   : > { %3271 = vrot.lane.b32.xlu0 %v3029_v3, %s4702_s29  ;;  %3189 = vrot.lane.b32.xlu2 %v3029_v3, %s4701_s26  ;;  %s6331_s29 = smov 90   ;;  %s4484_s26 = sshll.u32 %s4814_s25, 3 }
 0x417   : > { %s4141_s20 = scalar_lea.hbm %s6298_s16, %s4484_s26 }
 0x418   : > { %s4145_s27 = sshll.u32 %s4141_s20, 4  ;;  %s4146_s27 = int_to_ptr.hbm [resolvable:$true] %s4145_s27 }
 0x419   : > { %s4635_s28 = sshra.s32 %s4146_s27, 4  ;;  %s4636_s28 = int_to_ptr.hbm [resolvable:$true] %s4635_s28 }
 0x41a   : > { %3431 = vrot.lane.b32.xlu1 %v2909_v48, %s6328_s1  ;;  %s4637_s4 = scalar_lea.hbm %s4636_s28, 8  ;;  %p4642_p3 = scmp.lt.s32.totalorder %s4636_s28, %s6298_s16 }
 0x41b   : > { %p4638_p0 = scmp.ne.s32.totalorder %s4636_s28, %s4637_s4 }
 0x41d   : > { %p4639_p1 = pnand %p4638_p0, %p4831_p5 }
 0x41e   : > { %3435 = vrot.lane.b32.xlu0 %v3029_v3, %s6328_s1  ;;  %3433 = vrot.lane.b32.xlu2 %v2969_v58, %s6328_s1 }
 0x41f   : > { %p4640_p2 = pneg %p4639_p1 }
 0x422   : > { %3353 = vrot.lane.b32.xlu1 %v3029_v3, %s4703_s30 }
 0x426   : > { %3513 = vrot.lane.b32.xlu0 %v2909_v48, %s6329_s17  ;;  %3595 = vrot.lane.b32.xlu2 %v2909_v48, %s6330_s18 }
 0x42a   : > { %3515 = vrot.lane.b32.xlu1 %v2969_v58, %s6329_s17 }
 0x42e   : > { %3597 = vrot.lane.b32.xlu0 %v2969_v58, %s6330_s18  ;;  %3517 = vrot.lane.b32.xlu2 %v3029_v3, %s6329_s17  ;;  %s4641_s17 = scalar_lea.hbm %s6298_s16, 16 }
 0x42f   : > { %p4643_p4 = scmp.lt.s32.totalorder %s4641_s17, %s4637_s4 }
 0x431   : > { %p4644_p7 = por %p4643_p4, %p4642_p3 }
 0x432   : > { %3677 = vrot.lane.b32.xlu1 %v2909_v48, %s6331_s29 }
 0x433   : > { %p4645_p8 = pnand %p4644_p7, %p4640_p2 }
 0x436   : > { %3599 = vrot.lane.b32.xlu0 %v3029_v3, %s6330_s18  ;;  %3679 = vrot.lane.b32.xlu2 %v2969_v58, %s6331_s29  ;;  %v3990_v58 = vld [vmem:[#allocation5 + $0x270] sm:$0xff]  ;;  %s559_s18 = sand.u32 1, %s4683_s22  }
 0x437   : > { %s4130_s25 = scalar_lea.sflag [#allocation4], %s559_s18 }
 0x43a   : > { %3681 = vrot.lane.b32.xlu1 %v3029_v3, %s6331_s29  ;;  %s4247_s29 = sshll.u32 %s559_s18, 3 }
 0x43b   : > { %s561_s21 = scalar_lea.vmem [#allocation7], %s4247_s29 }
 0x43c   : > { %s4143_s23 = sshll.u32 %s561_s21, 4  ;;  %s4144_s23 = int_to_ptr.vmem [resolvable:$true] %s4143_s23 }
 0x43e   : > { %3900 = vperm.xlu0 %4558, %v3897_v21   ;;  %3760 = vperm.xlu2 %4560, %v3757_v22  }
 0x458   : > { %v3038_v53 = vpop.permute.xlu2 %3037 }
 0x460   : > { %v3268_v0 = vpop.permute.xlu2 %3267 }
 0x468   : > { %v3352_v7 = vpop.permute.xlu2 %3351 }
 0x470   : > { %v3186_v18 = vpop.permute.xlu0 %3185  ;;  %v3190_v55 = vpop.permute.xlu2 %3189 }
 0x471   : > { %4418 = vmatpush.msk.msrb.mxu1 %vm1265_vm2, %v3190_v55 }
 0x472   : > { %4419 = vmatmul.msk.f32.vlgmr.msrb.gmra.mxu1 %vm1261_vm3, %v4413_v12 }
 0x474   : > { %v3188_v13 = vpop.permute.xlu1 %3187 }
 0x475   : > { %v3192_v39 = vsel %vm1579_vm5, %v3188_v13, %v3190_v55  ;;  %v3191_v62 = vsel %vm1579_vm5, %v3186_v18, %v3188_v13  ;;  %v3943_v18 = vld [vmem:[#allocation5 + $0xf8] sm:$0xff]  ;;  %v3932_v55 = vld [vmem:[#allocation5 + $0xa0] sm:$0xff]  ;;  %v3941_v13 = vld [vmem:[#allocation5 + $0xe8] sm:$0xff] }
 0x476   : > { %4416 = vmatpush.msk.msrb.mxu2 %vm1265_vm2, %v3192_v39  ;;  %v3930_v39 = vld [vmem:[#allocation5 + $0x90] sm:$0xff] }
 0x477   : > { %4417 = vmatmul.msk.f32.vlgmr.msrb.gmra.mxu2 %vm1261_vm3, %v4413_v12 }
 0x478   : > { %v3040_v4 = vpop.permute.xlu0 %3039  ;;  %v3434_v5 = vpop.permute.xlu2 %3433 }
 0x479   : > { %v3043_v32 = vsel %vm1417_vm4, %v3038_v53, %v3040_v4 }
 0x47a   : > { %4401 = vmatpush.msk.msrb.mxu0 %vm1265_vm2, %v3043_v32  ;;  %v3928_v32 = vld [vmem:[#allocation5 + $0x80] sm:$0xff] }
 0x47b   : > { %4402 = vmatmul.msk.f32.vlgmr.msrb.gmra.mxu0 %vm1261_vm3, %v4400_v6 }
 0x47c   : > { %v3042_v15 = vpop.permute.xlu1 %3041 }
 0x47d   : > { %v3044_v11 = vsel %vm1417_vm4, %v3040_v4, %v3042_v15  ;;  %4405 = vmatpush.msk.msra.mxu0 %vm1265_vm2, %v3042_v15  ;;  %v3980_v4 = vld [vmem:[#allocation5 + $0x220] sm:$0xff]  ;;  %v3974_v15 = vld [vmem:[#allocation5 + $0x1f0] sm:$0xff] }
 0x47e   : > { %4403 = vmatpush.msk.msra.mxu3 %vm1265_vm2, %v3044_v11 }
 0x47f   : > { %4414 = vmatpush.msk.msrb.mxu0 %vm1265_vm2, %v3191_v62  ;;  %4404 = vmatmul.msk.f32.vlgmr.msra.gmra.mxu3 %vm1261_vm3, %v4400_v6  ;;  %v3978_v62 = vld [vmem:[#allocation5 + $0x210] sm:$0xff] }
 0x480   : > { %4411 = vmatpush.msk.msrb.mxu3 %vm1265_vm2, %v3029_v3  ;;  %v3270_v9 = vpop.permute.xlu0 %3269  ;;  %v3596_v27 = vpop.permute.xlu2 %3595  ;;  %v3986_v3 = vld [vmem:[#allocation5 + $0x250] sm:$0xff] }
 0x481   : > { %v3273_v10 = vsel %vm1741_vm6, %v3268_v0, %v3270_v9  ;;  %v3934_v0 = vld [vmem:[#allocation5 + $0xb0] sm:$0xff] }
 0x482   : > { %4421 = vmatpush.msk.msra.mxu3 %vm1265_vm2, %v3273_v10  ;;  %v3937_v10 = vld [vmem:[#allocation5 + $0xc8] sm:$0xff] }
 0x483   : > { %4406 = vmatmul.msk.f32.vlgmr.msra.gmra.mxu0 %vm1261_vm3, %v4400_v6  ;;  %v6200_v53 = vpop.f32.mrf.mxu2  ;;  %v3939_v6 = vld [vmem:[#allocation5 + $0xd8] sm:$0xff] }
 0x484   : > { %v3350_v40 = vpop.permute.xlu1 %3349 }
 0x485   : > { %v3355_v30 = vsel %vm1903_vm7, %v3350_v40, %v3352_v7  ;;  %v3926_v40 = vld [vmem:[#allocation5 + $0x70] sm:$0xff] }
 0x486   : > { %4428 = vmatpush.msk.msra.mxu1 %vm1265_vm2, %v3355_v30  ;;  %v3976_v30 = vld [vmem:[#allocation5 + $0x200] sm:$0xff] }
 0x487   : > { %4412 = vmatmul.msk.f32.vlgmr.msrb.gmra.mxu3 %vm1261_vm3, %v3031_v47  ;;  %4429 = vmatmul.msk.f32.vlgmr.msra.gmra.mxu1 %vm1261_vm3, %v4427_v41 }
 0x488   : > { %v3272_v63 = vpop.permute.xlu0 %3271  ;;  %v3518_v25 = vpop.permute.xlu2 %3517 }
 0x489   : > { %v3274_v14 = vsel %vm1741_vm6, %v3270_v9, %v3272_v63  ;;  %4425 = vmatpush.msk.msra.mxu2 %vm1265_vm2, %v3272_v63  ;;  %v3975_v63 = vld [vmem:[#allocation5 + $0x1f8] sm:$0xff] }
 0x48a   : > { %4423 = vmatpush.msk.msra.mxu0 %vm1265_vm2, %v3274_v14  ;;  %4426 = vmatmul.msk.f32.vlgmr.msra.gmra.mxu2 %vm1261_vm3, %v4420_v51  ;;  %v3924_v14 = vld [vmem:[#allocation5 + $0x60] sm:$0xff] }
 0x48b   : > { %4415 = vmatmul.msk.f32.vlgmr.msrb.gmra.mxu0 %vm1261_vm3, %v4413_v12  ;;  %v3982_v12 = vld [vmem:[#allocation5 + $0x230] sm:$0xff] }
 0x48c   : > { %v3432_v19 = vpop.permute.xlu1 %3431 }
 0x48d   : > { %v3437_v45 = vsel %vm2065_vm8, %v3432_v19, %v3434_v5  ;;  %v3970_v19 = vld [vmem:[#allocation5 + $0x1d0] sm:$0xff] }
 0x48e   : > { %4435 = vmatpush.msk.msrb.mxu2 %vm1265_vm2, %v3437_v45  ;;  %v3933_v45 = vld [vmem:[#allocation5 + $0xa8] sm:$0xff] }
 0x48f   : > { %4422 = vmatmul.msk.f32.vlgmr.msra.gmra.mxu3 %vm1261_vm3, %v4420_v51 }
 0x490   : > { %v3436_v2 = vpop.permute.xlu0 %3435  ;;  %v3680_v34 = vpop.permute.xlu2 %3679 }
 0x491   : > { %v3438_v20 = vsel %vm2065_vm8, %v3434_v5, %v3436_v2 }
 0x492   : > { %4436 = vmatmul.msk.f32.vlgmr.msrb.gmra.mxu2 %vm1261_vm3, %v4434_v57  ;;  %4437 = vmatpush.msk.msrb.mxu1 %vm1265_vm2, %v3438_v20  ;;  %v3968_v20 = vld [vmem:[#allocation5 + $0x1c0] sm:$0xff] }
 0x493   : > { %4424 = vmatmul.msk.f32.vlgmr.msra.gmra.mxu0 %vm1261_vm3, %v4420_v51  ;;  %4438 = vmatmul.msk.f32.vlgmr.msrb.gmra.mxu1 %vm1261_vm3, %v4434_v57 }
 0x494   : > { %v3354_v26 = vpop.permute.xlu1 %3353  ;;  %4446 = vmatpush.msk.msra.mxu1 %vm1265_vm2, %v3518_v25 }
 0x495   : > { %v3356_v42 = vsel %vm1903_vm7, %v3352_v7, %v3354_v26  ;;  %4432 = vmatpush.msk.msrb.mxu0 %vm1265_vm2, %v3354_v26  ;;  %v3984_v7 = vld [vmem:[#allocation5 + $0x240] sm:$0xff]  ;;  %v3971_v26 = vld [vmem:[#allocation5 + $0x1d8] sm:$0xff] }
 0x496   : > { %4430 = vmatpush.msk.msrb.mxu3 %vm1265_vm2, %v3356_v42 }
 0x497   : > { %4431 = vmatmul.msk.f32.vlgmr.msrb.gmra.mxu3 %vm1261_vm3, %v4427_v41 }
 0x498   : > { %4439 = vmatpush.msk.msra.mxu3 %vm1265_vm2, %v3436_v2  ;;  %v3514_v49 = vpop.permute.xlu0 %3513  ;;  %v3922_v2 = vld [vmem:[#allocation5 + $0x50] sm:$0xff] }
 0x49b   : > { %4433 = vmatmul.msk.f32.vlgmr.msrb.gmra.mxu0 %vm1261_vm3, %v4427_v41  ;;  %4447 = vmatmul.msk.f32.vlgmr.msra.gmra.mxu1 %vm1261_vm3, %v4441_v23  ;;  %v3972_v41 = vld [vmem:[#allocation5 + $0x1e0] sm:$0xff] }
 0x49c   : > { %v3516_v17 = vpop.permute.xlu1 %3515 }
 0x49d   : > { %v3519_v28 = vsel %vm2227_vm9, %v3514_v49, %v3516_v17  ;;  %v3520_v29 = vsel %vm2227_vm9, %v3516_v17, %v3518_v25  ;;  %v3931_v25 = vld [vmem:[#allocation5 + $0x98] sm:$0xff]  ;;  %v3920_v49 = vld [vmem:[#allocation5 + $0x40] sm:$0xff] }
 0x49e   : > { %4442 = vmatpush.msk.msra.mxu0 %vm1265_vm2, %v3519_v28  ;;  %4444 = vmatpush.msk.msra.mxu2 %vm1265_vm2, %v3520_v29  ;;  %v3929_v28 = vld [vmem:[#allocation5 + $0x88] sm:$0xff] }
 0x49f   : > { %4440 = vmatmul.msk.f32.vlgmr.msra.gmra.mxu3 %vm1261_vm3, %v4434_v57  ;;  %4445 = vmatmul.msk.f32.vlgmr.msra.gmra.mxu2 %vm1261_vm3, %v4441_v23  ;;  %v3973_v57 = vld [vmem:[#allocation5 + $0x1e8] sm:$0xff] }
 0x4a0   : > { %v3598_v31 = vpop.permute.xlu0 %3597  ;;  %v3969_v29 = vld [vmem:[#allocation5 + $0x1c8] sm:$0xff] }
 0x4a1   : > { %v3601_v35 = vsel %vm2389_vm10, %v3596_v27, %v3598_v31  ;;  %v3935_v27 = vld [vmem:[#allocation5 + $0xb8] sm:$0xff] }
 0x4a2   : > { %4449 = vmatpush.msk.msrb.mxu3 %vm1265_vm2, %v3601_v35  ;;  %v3964_v35 = vld [vmem:[#allocation5 + $0x1a0] sm:$0xff] }
 0x4a3   : > { %4443 = vmatmul.msk.f32.vlgmr.msra.gmra.mxu0 %vm1261_vm3, %v4441_v23  ;;  %v3966_v23 = vld [vmem:[#allocation5 + $0x1b0] sm:$0xff] }
 0x4a4   : > { %v3678_v52 = vpop.permute.xlu1 %3677 }
 0x4a5   : > { %v3683_v38 = vsel %vm2551_vm11, %v3678_v52, %v3680_v34  ;;  %v3927_v52 = vld [vmem:[#allocation5 + $0x78] sm:$0xff] }
 0x4a6   : > { %4456 = vmatpush.msk.msrb.mxu1 %vm1265_vm2, %v3683_v38  ;;  %v3916_v38 = vld [vmem:[#allocation5 + $0x20] sm:$0xff] }
 0x4a7   : > { %4450 = vmatmul.msk.f32.vlgmr.msrb.gmra.mxu3 %vm1261_vm3, %v4448_v36  ;;  %4457 = vmatmul.msk.f32.vlgmr.msrb.gmra.mxu1 %vm1261_vm3, %v4455_v43 }
 0x4a8   : > { %4464 = vmatpush.msk.msra.mxu1 %vm1265_vm2, %v5451_v33  ;;  %v3600_v44 = vpop.permute.xlu0 %3599 }
 0x4a9   : > { %v3602_v56 = vsel %vm2389_vm10, %v3598_v31, %v3600_v44  ;;  %4453 = vmatpush.msk.msrb.mxu2 %vm1265_vm2, %v3600_v44  ;;  %v3918_v31 = vld [vmem:[#allocation5 + $0x30] sm:$0xff]  ;;  %v3925_v44 = vld [vmem:[#allocation5 + $0x68] sm:$0xff] }
 0x4aa   : > { %4472 = vmatpush.msk.msrb.mxu1 %vm1265_vm2, %v5379_v16  ;;  %4451 = vmatpush.msk.msrb.mxu0 %vm1265_vm2, %v3602_v56  ;;  %v3770_v16 = vld [vmem:[%s6295_s13] sm:$0xf]  ;;  %v3965_v56 = vld [vmem:[#allocation5 + $0x1a8] sm:$0xff] }
 0x4ab   : > { %4454 = vmatmul.msk.f32.vlgmr.msrb.gmra.mxu2 %vm1261_vm3, %v4448_v36  ;;  %4452 = vmatmul.msk.f32.vlgmr.msrb.gmra.mxu0 %vm1261_vm3, %v4448_v36  ;;  %v3967_v36 = vld [vmem:[#allocation5 + $0x1b8] sm:$0xff] }
 0x4ac   : > { %v3682_v48 = vpop.permute.xlu1 %3681  ;;  %4462 = vmatpush.msk.msra.mxu2 %vm1265_vm2, %v5447_v37  ;;  %v3769_v37 = vld [vmem:[%s6294_s12] sm:$0xf] }
 0x4ad   : > { %v3684_v33 = vsel %vm2551_vm11, %v3680_v34, %v3682_v48  ;;  %4460 = vmatpush.msk.msra.mxu0 %vm1265_vm2, %v3682_v48  ;;  %v3914_v48 = vld [vmem:[#allocation5 + $0x10] sm:$0xff] }
 0x4ae   : > { %4470 = vmatpush.msk.msrb.mxu2 %vm1265_vm2, %v5464_v46  ;;  %4458 = vmatpush.msk.msra.mxu3 %vm1265_vm2, %v3684_v33  ;;  %v3942_v46 = vld [vmem:[#allocation5 + $0xf0] sm:$0xff]  ;;  %v3960_v33 = vld [vmem:[#allocation5 + $0x180] sm:$0xff] }
 0x4af   : > { %4468 = vmatpush.msk.msrb.mxu0 %vm1265_vm2, %v5397_v24  ;;  %4459 = vmatmul.msk.f32.vlgmr.msra.gmra.mxu3 %vm1261_vm3, %v4455_v43  ;;  %v6191_v24 = vpop.f32.mrf.mxu1 }
 0x4b0   : > { %4466 = vmatpush.msk.msrb.mxu3 %vm1265_vm2, %v5363_v8  ;;  %4465 = vmatmul.msk.f32.vlgmr.msra.gmra.mxu1 %vm1261_vm3, %v3770_v16 }
 0x4b1   : > { %4063 = vmatpush.msra.mxu1 %v3943_v18  ;;  %v3959_v18 = vld [vmem:[#allocation5 + $0x178] sm:$0xff] }
 0x4b2   : > { %4003 = vmatpush.msra.mxu3 %v3942_v46  ;;  %v3912_v46 = vld [vmem:[#allocation5] sm:$0xff] }
 0x4b3   : > { %4463 = vmatmul.msk.f32.vlgmr.msra.gmra.mxu2 %vm1261_vm3, %v3770_v16  ;;  %4461 = vmatmul.msk.f32.vlgmr.msra.gmra.mxu0 %vm1261_vm3, %v4455_v43  ;;  %v3962_v43 = vld [vmem:[#allocation5 + $0x190] sm:$0xff] }
 0x4b4   : > { %4474 = vmatpush.msk.msra.mxu2 %vm1265_vm2, %v3992_v50  ;;  %4004 = vmatpush.msra.mxu3 %v3940_v54  ;;  %v3958_v50 = vld [vmem:[#allocation5 + $0x170] sm:$0xff] }
 0x4b5   : > { %4064 = vmatpush.msra.mxu1 %v3941_v13  ;;  %4023 = vmatpush.msra.mxu0 %v3974_v15  ;;  %v3952_v15 = vld [vmem:[#allocation5 + $0x140] sm:$0xff] }
 0x4b6   : > { %4051 = vmatpush.msra.mxu2 %v3990_v58  ;;  %4005 = vmatpush.msra.mxu3 %v3938_v59  ;;  %v3921_v59 = vld [vmem:[#allocation5 + $0x48] sm:$0xff] }
 0x4b7   : > { %4467 = vmatmul.msk.f32.vlgmr.msrb.gmra.mxu3 %vm1261_vm3, %v3770_v16  ;;  %4065 = vmatpush.msra.mxu1 %v3939_v6  ;;  %v3923_v16 = vld [vmem:[#allocation5 + $0x58] sm:$0xff]  ;;  %v3989_v6 = vld [vmem:[#allocation5 + $0x268] sm:$0xff] }
 0x4b8   : > { %4473 = vmatmul.msk.f32.vlgmr.msrb.gmra.mxu1 %vm1261_vm3, %v3769_v37  ;;  %4052 = vmatpush.msra.mxu2 %v3988_v1  ;;  %v3961_v1 = vld [vmem:[#allocation5 + $0x188] sm:$0xff] }
 0x4b9   : > { %4006 = vmatpush.msra.mxu3 %v3936_v61  ;;  %4066 = vmatpush.msra.mxu1 %v3937_v10  ;;  %v3993_v61 = vld [vmem:[#allocation5 + $0x288] sm:$0xf]  ;;  %v3915_v10 = vld [vmem:[#allocation5 + $0x18] sm:$0xff] }
 0x4ba   : > { %4053 = vmatpush.msra.mxu2 %v3986_v3  ;;  %4024 = vmatpush.msra.mxu0 %v3972_v41  ;;  %v3987_v41 = vld [vmem:[#allocation5 + $0x258] sm:$0xff] }
 0x4bb   : > { %4471 = vmatmul.msk.f32.vlgmr.msrb.gmra.mxu2 %vm1261_vm3, %v3769_v37  ;;  %4469 = vmatmul.msk.f32.vlgmr.msrb.gmra.mxu0 %vm1261_vm3, %v3769_v37  ;;  %v3963_v37 = vld [vmem:[#allocation5 + $0x198] sm:$0xff] }
 0x4bc   : > { %4007 = vmatpush.msra.mxu3 %v3934_v0  ;;  %4054 = vmatpush.msra.mxu2 %v3984_v7  ;;  %v3956_v0 = vld [vmem:[#allocation5 + $0x160] sm:$0xff]  ;;  %v3919_v7 = vld [vmem:[#allocation5 + $0x38] sm:$0xff] }
 0x4bd   : > { %4067 = vmatpush.msra.mxu1 %v3935_v27  ;;  %4025 = vmatpush.msra.mxu0 %v3970_v19  ;;  %v3950_v27 = vld [vmem:[#allocation5 + $0x130] sm:$0xff]  ;;  %v3985_v19 = vld [vmem:[#allocation5 + $0x248] sm:$0xff] }
 0x4be   : > { %4008 = vmatpush.msra.mxu3 %v3932_v55  ;;  %4055 = vmatpush.msra.mxu2 %v3982_v12  ;;  %v3991_v55 = vld [vmem:[#allocation5 + $0x278] sm:$0xff]  ;;  %v3954_v12 = vld [vmem:[#allocation5 + $0x150] sm:$0xff] }
 0x4bf   : > { %4068 = vmatpush.msra.mxu1 %v3933_v45  ;;  %4026 = vmatpush.msra.mxu0 %v3968_v20 }
 0x4c0   : > { %4009 = vmatpush.msra.mxu3 %v3930_v39  ;;  %4056 = vmatpush.msra.mxu2 %v3980_v4  ;;  %v3917_v39 = vld [vmem:[#allocation5 + $0x28] sm:$0xff] }
 0x4c1   : > { %4069 = vmatpush.msra.mxu1 %v3931_v25  ;;  %4027 = vmatpush.msra.mxu0 %v3966_v23  ;;  %v3957_v4 = vld [vmem:[#allocation5 + $0x168] sm:$0xff]  ;;  %v3944_v23 = vld [vmem:[#allocation5 + $0x100] sm:$0xff] }
 0x4c2   : > { %4010 = vmatpush.msra.mxu3 %v3928_v32  ;;  %4057 = vmatpush.msra.mxu2 %v3978_v62  ;;  %v3949_v25 = vld [vmem:[#allocation5 + $0x128] sm:$0xff] }
 0x4c3   : > { %4070 = vmatpush.msra.mxu1 %v3929_v28  ;;  %4028 = vmatpush.msra.mxu0 %v3964_v35 }
 0x4c4   : > { %4011 = vmatpush.msra.mxu3 %v3926_v40  ;;  %4058 = vmatpush.msra.mxu2 %v3976_v30  ;;  %v3955_v40 = vld [vmem:[#allocation5 + $0x158] sm:$0xff] }
 0x4c5   : > { %4071 = vmatpush.msra.mxu1 %v3927_v52  ;;  %4029 = vmatpush.msra.mxu0 %v3962_v43 }
 0x4c6   : > { %4083 = vmatpush.msrb.mxu2 %v3975_v63  ;;  %4012 = vmatpush.msra.mxu3 %v3924_v14 }
 0x4c7   : > { %4072 = vmatpush.msra.mxu1 %v3925_v44  ;;  %4030 = vmatpush.msra.mxu0 %v3960_v33 }
 0x4c8   : > { %4084 = vmatpush.msrb.mxu2 %v3973_v57  ;;  %4013 = vmatpush.msra.mxu3 %v3922_v2  ;;  %v3951_v57 = vld [vmem:[#allocation5 + $0x138] sm:$0xff] }
 0x4c9   : > { %4073 = vmatpush.msra.mxu1 %v3923_v16  ;;  %4031 = vmatpush.msra.mxu0 %v3958_v50  ;;  %v3983_v2 = vld [vmem:[#allocation5 + $0x238] sm:$0xff] }
 0x4ca   : > { %4085 = vmatpush.msrb.mxu2 %v3971_v26  ;;  %4014 = vmatpush.msra.mxu3 %v3920_v49  ;;  %v3981_v26 = vld [vmem:[#allocation5 + $0x228] sm:$0xff] }
 0x4cb   : > { %4074 = vmatpush.msra.mxu1 %v3921_v59  ;;  %4032 = vmatpush.msra.mxu0 %v3956_v0 }
 0x4cc   : > { %4086 = vmatpush.msrb.mxu2 %v3969_v29  ;;  %4015 = vmatpush.msra.mxu3 %v3918_v31  ;;  %v3979_v29 = vld [vmem:[#allocation5 + $0x218] sm:$0xff] }
 0x4cd   : > { %4075 = vmatpush.msra.mxu1 %v3919_v7  ;;  %4033 = vmatpush.msra.mxu0 %v3954_v12 }
 0x4ce   : > { %4087 = vmatpush.msrb.mxu2 %v3967_v36  ;;  %4016 = vmatpush.msra.mxu3 %v3916_v38  ;;  %v3945_v36 = vld [vmem:[#allocation5 + $0x108] sm:$0xff] }
 0x4cf   : > { %4076 = vmatpush.msra.mxu1 %v3917_v39  ;;  %4034 = vmatpush.msra.mxu0 %v3952_v15  ;;  %v3977_v38 = vld [vmem:[#allocation5 + $0x208] sm:$0xff] }
 0x4d0   : > { %4088 = vmatpush.msrb.mxu2 %v3965_v56  ;;  %4017 = vmatpush.msra.mxu3 %v3914_v48 }
 0x4d1   : > { %4077 = vmatpush.msra.mxu1 %v3915_v10  ;;  %4035 = vmatpush.msra.mxu0 %v3950_v27 }
 0x4d2   : > { %4089 = vmatpush.msrb.mxu2 %v3963_v37  ;;  %4018 = vmatpush.msra.mxu3 %v3912_v46 }
 0x4d4   : > { %4090 = vmatpush.msrb.mxu2 %v3961_v1  ;;  %4476 = vmatpush.msk.msrb.mxu3 %vm1265_vm2, %v3993_v61  ;;  %v3761_v61 = vpop.permute.xlu2 %3760 }
 0x4d6   : > { %4091 = vmatpush.msrb.mxu2 %v3959_v18  ;;  %4111 = vmatpush.msrb.mxu3 %v3991_v55 }
 0x4d8   : > { %4092 = vmatpush.msrb.mxu2 %v3957_v4  ;;  %4112 = vmatpush.msrb.mxu3 %v3989_v6 }
 0x4da   : > { %4093 = vmatpush.msrb.mxu2 %v3955_v40  ;;  %4113 = vmatpush.msrb.mxu3 %v3987_v41 }
 0x4dc   : > { %4114 = vmatpush.msrb.mxu3 %v3985_v19 }
 0x4de   : > { %4115 = vmatpush.msrb.mxu3 %v3983_v2 }
 0x4e0   : > { %4116 = vmatpush.msrb.mxu3 %v3981_v26 }
 0x4e2   : > { %4117 = vmatpush.msrb.mxu3 %v3979_v29 }
 0x4e4   : > { %4118 = vmatpush.msrb.mxu3 %v3977_v38 }
 0x4ef   : > { %v6196_v60 = vpop.f32.mrf.mxu1 }
 0x4f8   : > { %v6193_v8 = vpop.f32.mrf.mxu0 }
 0x4f9   : > { %v3141_v62 = vadd.f32 %v6200_v53, %v6193_v8  ;;  %v3948_v8 = vld [vmem:[#allocation5 + $0x120] sm:$0xff] }
 0x4fa   : > { %v6210_v51 = vpop.f32.mrf.mxu2  ;;  %4036 = vmatpush.msra.mxu0 %v3948_v8 }
 0x500   : > { %v6198_v21 = vpop.f32.mrf.mxu0 }
 0x502   : > { %v6202_v47 = vpop.f32.mrf.mxu3 }
 0x504   : > { %v6204_v11 = vpop.f32.mrf.mxu1 }
 0x508   : > { %v6206_v5 = vpop.f32.mrf.mxu0 }
 0x509   : > { %v3262_v63 = vadd.f32 %v6206_v5, %v3141_v62  ;;  %v3946_v5 = vld [vmem:[#allocation5 + $0x110] sm:$0xff] }
 0x50a   : > { %v6208_v9 = vpop.f32.mrf.mxu3  ;;  %4037 = vmatpush.msra.mxu0 %v3946_v5 }
 0x50b   : > { %v3181_v32 = vadd.f32 %v6208_v9, %v6198_v21  ;;  %v3913_v21 = vld [vmem:[#allocation5 + $0x8] sm:$0xff] }
 0x50c   : > { %v3953_v9 = vld [vmem:[#allocation5 + $0x148] sm:$0xff]  ;;  %4078 = vmatpush.msra.mxu1 %v3913_v21  ;;  %4038 = vmatpush.msra.mxu0 %v3944_v23 }
 0x50d   : > { %v6218_v34 = vpop.f32.mrf.mxu2  ;;  %v3264_v45 = vadd.f32 %v6196_v60, %v3181_v32  ;;  %4094 = vmatpush.msrb.mxu2 %v3953_v9  ;;  %v3161_v60 = vadd.f32 %v6191_v24, %v6202_v47 }
 0x50f   : > { %4095 = vmatpush.msrb.mxu2 %v3951_v57  ;;  %v3346_v28 = vadd.f32 %v6218_v34, %v3264_v45  ;;  %v3263_v24 = vadd.f32 %v6210_v51, %v3161_v60 }
 0x510   : > { %v6212_v42 = vpop.f32.mrf.mxu0  ;;  %v6216_v22 = vpop.f32.mrf.mxu1 }
 0x511   : > { %4096 = vmatpush.msrb.mxu2 %v3949_v25 }
 0x512   : > { %v6214_v17 = vpop.f32.mrf.mxu3 }
 0x513   : > { %v3344_v53 = vadd.f32 %v6214_v17, %v3262_v63  ;;  %v3947_v17 = vld [vmem:[#allocation5 + $0x118] sm:$0xff] }
 0x514   : > { %4097 = vmatpush.msrb.mxu2 %v3947_v17 }
 0x515   : > { %v6227_v13 = vpop.f32.mrf.mxu2  ;;  %v3426_v31 = vadd.f32 %v6204_v11, %v3344_v53  ;;  %v3345_v11 = vadd.f32 %v6212_v42, %v3263_v24 }
 0x516   : > { %4098 = vmatpush.msrb.mxu2 %v3945_v36 }
 0x517   : > { %v3508_v34 = vadd.f32 %v6227_v13, %v3426_v31 }
 0x518   : > { %v6220_v54 = vpop.f32.mrf.mxu0  ;;  %v6224_v3 = vpop.f32.mrf.mxu1 }
 0x519   : > { %v3428_v35 = vadd.f32 %v6220_v54, %v3346_v28 }
 0x51a   : > { %v6222_v58 = vpop.f32.mrf.mxu3 }
 0x51b   : > { %v3427_v33 = vadd.f32 %v6222_v58, %v3345_v11 }
 0x51d   : > { %v3509_v51 = vadd.f32 %v6216_v22, %v3427_v33 }
 0x520   : > { %v3547_v30 = vpop.f32.mrf.mxu0 }
 0x521   : > { %v3590_v44 = vadd.f32 %v3547_v30, %v3508_v34 }
 0x522   : > { %v3505_v14 = vpop.f32.mrf.mxu3  ;;  %v3567_v49 = vpop.f32.mrf.mxu2 }
 0x523   : > { %v3510_v47 = vadd.f32 %v3505_v14, %v3428_v35  ;;  %v3591_v1 = vadd.f32 %v3567_v49, %v3509_v51 }
 0x524   : > { %v3711_v20 = vpop.f32.mrf.mxu1 }
 0x525   : > { %v3592_v16 = vadd.f32 %v6224_v3, %v3510_v47  ;;  %v3901_v3 = vpop.permute.xlu0 %3900 }
 0x528   : > { %v3649_v52 = vpop.f32.mrf.mxu0 }
 0x529   : > { %v3673_v18 = vadd.f32 %v3649_v52, %v3591_v1 }
 0x52a   : > { %v3629_v43 = vpop.f32.mrf.mxu3 }
 0x52b   : > { %v3672_v37 = vadd.f32 %v3629_v43, %v3590_v44 }
 0x52d   : > { %v3811_v48 = vpop.f32.mrf.mxu1  ;;  %v3754_v59 = vadd.f32 %v3711_v20, %v3672_v37 }
 0x52e   : > { %v3669_v56 = vpop.f32.mrf.mxu2 }
 0x52f   : > { %v3674_v46 = vadd.f32 %v3669_v56, %v3592_v16  ;;  %v3763_v42 = vadd.f32 %v3761_v61, %v3754_v59 }
 0x530   : > { %v3751_v50 = vpop.f32.mrf.mxu0 }
 0x531   : > { %v3756_v0 = vadd.f32 %v3751_v50, %v3674_v46  ;;  %v3766_v32 = vmax.f32 %v3763_v42, 0.0 }
 0x532   : > { %v3731_v54 = vpop.f32.mrf.mxu3 }
 0x533   : > { %v3755_v12 = vadd.f32 %v3731_v54, %v3673_v18  ;;  %v3765_v13 = vadd.f32 %v3761_v61, %v3756_v0 }
 0x535   : > { %v3894_v55 = vpop.f32.mrf.mxu1  ;;  %v3764_v62 = vadd.f32 %v3761_v61, %v3755_v12  ;;  %v3768_v10 = vmax.f32 %v3765_v13, 0.0 }
 0x536   : > { %v3791_v7 = vpop.f32.mrf.mxu2 }
 0x537   : > { %v3767_v14 = vmax.f32 %v3764_v62, 0.0 }
 0x538   : > { %v3854_v39 = vpop.f32.mrf.mxu0 }
 0x539   : > { %v3855_v4 = vadd.f32 %v3854_v39, %v3791_v7 }
 0x53a   : > { %v3831_v58 = vpop.f32.mrf.mxu3 }
 0x53b   : > { %v3895_v6 = vadd.f32 %v3894_v55, %v3831_v58  ;;  %v3903_v15 = vadd.f32 %v3901_v3, %v3855_v4 }
 0x53d   : > { %v3905_v22 = vadd.f32 %v3901_v3, %v3895_v6  ;;  %v3906_v40 = vadd.f32 %v3903_v15, %v3766_v32 }
 0x53e   : > { %v3874_v41 = vpop.f32.mrf.mxu2 }
 0x53f   : > { %v3908_v30 = vadd.f32 %v3905_v22, %v3768_v10  ;;  %v3875_v27 = vadd.f32 %v3874_v41, %v3811_v48  ;;  %v3909_v63 = vmax.f32 %v3906_v40, 0.0 }
 0x541   : > { %v3911_v21 = vmax.f32 %v3908_v30, 0.0  ;;  %v3904_v9 = vadd.f32 %v3901_v3, %v3875_v27  ;;  %4019 = vmatmul.f32.vlgmr.msra.gmra.mxu3 %v3909_v63  ;;  %4079 = vmatmul.f32.vlgmr.msra.gmra.mxu1 %v3909_v63 }
 0x543   : > { %v3907_v19 = vadd.f32 %v3904_v9, %v3767_v14  ;;  %4475 = vmatmul.msk.f32.vlgmr.msra.gmra.mxu2 %vm2838_vm12, %v3911_v21 }
 0x545   : > { %v3910_v45 = vmax.f32 %v3907_v19, 0.0 }
 0x547   : > { %4039 = vmatmul.f32.vlgmr.msra.gmra.mxu0 %v3910_v45 }
 0x549   : > { %4477 = vmatmul.msk.f32.vlgmr.msrb.gmra.mxu3 %vm2838_vm12, %v3911_v21 }
 0x54b   : > { %4099 = vmatmul.f32.vlgmr.msrb.gmra.mxu2 %v3910_v45 }
 0x5be   : > { %v4080_v2 = vpop.f32.mrf.mxu1 }
 0x5c4   : > { %v4020_v8 = vpop.f32.mrf.mxu3  ;;  %v4040_v57 = vpop.f32.mrf.mxu0 }
 0x5c5   : > { %v4041_v5 = vadd.f32 %v4040_v57, %v4020_v8 }
 0x5c6   : > { %v4060_v53 = vpop.f32.mrf.mxu2 }
 0x5c7   : > { %v4061_v23 = vadd.f32 %v4060_v53, %v4041_v5 }
 0x5cc   : > { %v4120_v26 = vpop.f32.mrf.mxu3 }
 0x5ce   : > { %v4100_v20 = vpop.f32.mrf.mxu2 }
 0x5cf   : > { %v4101_v25 = vadd.f32 %v4100_v20, %v4080_v2 }
 0x5d1   : > { %v4121_v49 = vadd.f32 %v4120_v26, %v4101_v25 }
 0x5d3   : > { %v4125_v60 = vrot.slane %v4121_v49, 4 }
 0x5d5   : > { %v4126_v28 = vsel %vm1265_vm2, %v4061_v23, %v4125_v60 }
 0x5d6   : > { %4128 = vst [vmem:[%s561_s21] sm:$0xff] %v4126_v28 }
 0x5d7   : > { %4648 = shalt.err (!%p4645_p8)
}
 0x5d8   : > { %4493 = dma.vmem_to_hbm [thread:$0]  (%p4831_p5), %s4144_s23, 128, %s4146_s27, %s4130_s25  }
 0x5d9 PF: > { %s6332_s18 = sld [smem:[#allocation13_spill]] }
 0x5da   : > { %s6333_s30 = sld [smem:[#allocation11_spill]] }
 0x5df   : > { %p4510_p9 = scmp.ge.s32.totalorder %s6332_s18, 2 }
 0x5e0   : > { %s4157_s20 = sand.u32 1, %s6333_s30  }
 0x5e1   : > { %p4503_p10 = pnand %p4510_p9, %p4835_p6  ;;  %s4158_s21 = scalar_lea.sflag [#allocation4], %s4157_s20 }
 0x5e3   : > { %p4504_p11 = pneg %p4503_p10 }
 0x5e5   : > { %4674 = dma.done.wait (%p4504_p11), %s4158_s21, 128  }
 0x5e6   : > { %4676 = vsyncadd (%p4504_p11), %s4158_s21, 4294967168  ;;  %s6335_s24 = sld [smem:[#allocation14_spill]]  ;;  %s6338_s21 = smov %s4683_s22 }
 0x5e7   : > { %s6336_s28 = sld [smem:[#allocation12_spill]] }
 0x5e8   : > { %s6337_s23 = sld [smem:[#allocation15_spill]] }
 0x5ec   : > { %p28_p12 = scmp.ge.s32.totalorder %s6335_s24, 4  }
 0x5ed   : > { %s6339_s22 = smov %s6336_s28 }
 0x5ee   :  { %30 = sbr.rel (!%p28_p12) target bundleno = 9 (0x9), region = 161 }
 0x5f3   :  { %4164 = vsyncpa [#allocation3], 1 }
 0x5f4   :  { %4166 = vsyncpa [#allocation3 + $0x1], 1 }
 0x5f5   :  { %4167 = vsyncpa [#allocation6], 1 }
 0x5f6   :  { %4168 = vsyncpa [#allocation4], 1 }
 0x5f7   :  { %4170 = vsyncpa [#allocation4 + $0x1], 1 }

</bundles_post_ra>
